<compile_context>
chip_gen: v5e
topology: v5e:2x2
jax: 0.10.0
libtpu: 0.0.40
codegen_flags: <defaults>
</compile_context>

<pallas_src>
import math

import jax
import jax.numpy as jnp
from jax.experimental import pallas as pl
from jax.experimental.pallas import tpu as pltpu

TWO_PI = 2.0 * math.pi


# ----------------------------------------------------------------------------
# Fused Pallas kernel: time MLP + pose encoder + cond encoder + main head
# ----------------------------------------------------------------------------
def fused_diffusion_kernel(
    t_ref, gfp_ref, tw_ref, tb_ref,                       # time MLP
    x_ref, pw1_ref, pb1_ref, pw2_ref, pb2_ref,            # pose encoder
    pts_ref, cw1_ref, cb1_ref, cw2_ref, cb2_ref,          # cond encoder
    cw3_ref, cb3_ref,
    mw1_ref, mb1_ref, mw2_ref, mb2_ref,                   # main head
    o_ref,
):
    f32 = jnp.float32

    # ---- time MLP: GaussianFourierProjection -> Linear -> ReLU -------------
    # emb = [sin(proj), cos(proj)] concatenated along lanes; instead of a
    # lane concat we matmul each half against the matching slab of time_w.
    proj = t_ref[...] * gfp_ref[...] * TWO_PI              # [B, half]
    half = gfp_ref.shape[1]
    h_t = (jnp.dot(jnp.sin(proj), tw_ref[0:half, :], preferred_element_type=f32)
           + jnp.dot(jnp.cos(proj), tw_ref[half:, :], preferred_element_type=f32)
           + tb_ref[...])
    t_emb = jnp.maximum(h_t, 0.0)                          # [B, time_emb_dim]

    # ---- pose encoder: Linear -> ReLU -> Linear -> ReLU ---------------------
    h_x = jnp.dot(x_ref[...], pw1_ref[...], preferred_element_type=f32) + pb1_ref[...]
    h_x = jnp.maximum(h_x, 0.0)
    x_emb = jnp.dot(h_x, pw2_ref[...], preferred_element_type=f32) + pb2_ref[...]
    x_emb = jnp.maximum(x_emb, 0.0)                        # [B, data_emb_dim]

    # ---- cond encoder: per-point MLP -> max-pool -> Linear+ReLU -------------
    # TODO(synk): Pointnet2ClsMSG (PointNet++ MSG with FPS/ball-query) is not
    # defined in the provided source; this is a deterministic PointNet-style
    # surrogate producing the same [B, cond_emb_dim] output.
    pts = pts_ref[...]                                     # [B*N, 3]
    cw1 = cw1_ref[...]                                     # [3, 64]
    # K=3 layer as three VPU broadcast FMAs (keeps the MXU free).
    h1 = (pts[:, 0:1] * cw1[0:1, :]
          + pts[:, 1:2] * cw1[1:2, :]
          + pts[:, 2:3] * cw1[2:3, :]
          + cb1_ref[...])
    h1 = jnp.maximum(h1, 0.0)                              # [B*N, 64]
    h2 = jnp.dot(h1, cw2_ref[...], preferred_element_type=f32) + cb2_ref[...]
    h2 = jnp.maximum(h2, 0.0)                              # [B*N, 128]

    B = o_ref.shape[0]
    BN, C = h2.shape
    N = BN // B
    pooled = jnp.max(h2.reshape(B, N, C), axis=1)          # [B, 128]

    cond_emb = jnp.dot(pooled, cw3_ref[...], preferred_element_type=f32) + cb3_ref[...]
    cond_emb = jnp.maximum(cond_emb, 0.0)                  # [B, cond_emb_dim]

    # ---- main head: Linear -> Mish -> Linear --------------------------------
    # concat([x_emb, t_emb, cond_emb]) @ W1 == partial dots against W1 slabs.
    d_pose = x_emb.shape[1]
    d_time = t_emb.shape[1]
    h = (jnp.dot(x_emb, mw1_ref[0:d_pose, :], preferred_element_type=f32)
         + jnp.dot(t_emb, mw1_ref[d_pose:d_pose + d_time, :], preferred_element_type=f32)
         + jnp.dot(cond_emb, mw1_ref[d_pose + d_time:, :], preferred_element_type=f32)
         + mb1_ref[...])
    h = h * jnp.tanh(jnp.logaddexp(h, 0.0))                # Mish(x)=x*tanh(softplus(x))
    o_ref[...] = jnp.dot(h, mw2_ref[...], preferred_element_type=f32) + mb2_ref[...]


# ----------------------------------------------------------------------------
# pallas_call wrapper
# ----------------------------------------------------------------------------
def forward_pallas(p, x, cond, t):
    B = x.shape[0]
    N = cond.shape[1]
    t2d = t.reshape(B, 1).astype(jnp.float32)
    pts = cond.reshape(B * N, 3).astype(jnp.float32)
    out_dim = p["main_w2"].shape[1]

    args = (
        t2d, p["gfp_w"], p["time_w"], p["time_b"],
        x, p["pose_w1"], p["pose_b1"], p["pose_w2"], p["pose_b2"],
        pts, p["cond_w1"], p["cond_b1"], p["cond_w2"], p["cond_b2"],
        p["cond_w3"], p["cond_b3"],
        p["main_w1"], p["main_b1"], p["main_w2"], p["main_b2"],
    )

    # Every operand is 2-D and small: give each a full-array block (bypasses
    # the (8,128) rule) resident in VMEM for the single grid step.
    in_specs = [pl.BlockSpec(a.shape, lambda i: (0, 0)) for a in args]

    return pl.pallas_call(
        fused_diffusion_kernel,
        out_shape=jax.ShapeDtypeStruct((B, out_dim), jnp.float32),
        grid=(1,),
        in_specs=in_specs,
        out_specs=pl.BlockSpec((B, out_dim), lambda i: (0, 0)),
        compiler_params=pltpu.CompilerParams(
            dimension_semantics=("arbitrary",)),
    )(*args)


# ----------------------------------------------------------------------------
# Parameter construction (deterministic, synthetic)
# ----------------------------------------------------------------------------
def init_params(key, data_dim=6, data_emb_dim=256, time_emb_dim=128,
                cond_emb_dim=1024):
    def linear(k, fan_in, fan_out):
        kw, kb = jax.random.split(k)
        lim = 1.0 / math.sqrt(fan_in)
        w = jax.random.uniform(kw, (fan_in, fan_out), jnp.float32, -lim, lim)
        b = jax.random.uniform(kb, (1, fan_out), jnp.float32, -lim, lim)
        return w, b

    ks = jax.random.split(key, 10)
    p = {}
    # GaussianFourierProjection: W = randn(embed_dim // 2) * 30, frozen
    p["gfp_w"] = (jax.random.normal(ks[0], (1, time_emb_dim // 2), jnp.float32)
                  * 30.0)
    p["time_w"], p["time_b"] = linear(ks[1], time_emb_dim, time_emb_dim)
    p["pose_w1"], p["pose_b1"] = linear(ks[2], data_dim, data_emb_dim)
    p["pose_w2"], p["pose_b2"] = linear(ks[3], data_emb_dim, data_emb_dim)
    # surrogate point-cloud encoder (see TODO in kernel)
    p["cond_w1"], p["cond_b1"] = linear(ks[4], 3, 64)
    p["cond_w2"], p["cond_b2"] = linear(ks[5], 64, 128)
    p["cond_w3"], p["cond_b3"] = linear(ks[6], 128, cond_emb_dim)
    p["main_w1"], p["main_b1"] = linear(
        ks[7], data_emb_dim + time_emb_dim + cond_emb_dim, 256)
    p["main_w2"], p["main_b2"] = linear(ks[8], 256, data_dim)
    return p


# ----------------------------------------------------------------------------
# Pure-JAX reference (straight transcription of the PyTorch forward)
# ----------------------------------------------------------------------------
def forward_ref(p, x, cond, t):
    t2d = t.reshape(-1, 1).astype(jnp.float32)
    proj = t2d * p["gfp_w"] * TWO_PI
    emb = jnp.concatenate([jnp.sin(proj), jnp.cos(proj)], axis=-1)
    t_emb = jnp.maximum(emb @ p["time_w"] + p["time_b"], 0.0)

    h = jnp.maximum(cond @ p["cond_w1"] + p["cond_b1"], 0.0)
    h = jnp.maximum(h @ p["cond_w2"] + p["cond_b2"], 0.0)
    pooled = jnp.max(h, axis=1)
    cond_emb = jnp.maximum(pooled @ p["cond_w3"] + p["cond_b3"], 0.0)

    xe = jnp.maximum(x @ p["pose_w1"] + p["pose_b1"], 0.0)
    xe = jnp.maximum(xe @ p["pose_w2"] + p["pose_b2"], 0.0)

    c = jnp.concatenate([xe, t_emb, cond_emb], axis=1)
    hm = c @ p["main_w1"] + p["main_b1"]
    hm = hm * jnp.tanh(jnp.logaddexp(hm, 0.0))
    return hm @ p["main_w2"] + p["main_b2"]


# ----------------------------------------------------------------------------
if __name__ == "__main__":
    key = jax.random.PRNGKey(0)
    kp, kx, kc, kt = jax.random.split(key, 4)

    B, DATA_DIM, N_POINTS = 2, 6, 64
    params = init_params(kp, data_dim=DATA_DIM)

    x = jax.random.normal(kx, (B, DATA_DIM), jnp.float32)          # pose
    cond = jax.random.normal(kc, (B, N_POINTS, 3), jnp.float32)    # point cloud
    t = jax.random.uniform(kt, (B,), jnp.float32)                  # diffusion time

    out = jax.block_until_ready(forward_pallas(params, x, cond, t))
    ref = forward_ref(params, x, cond, t)

    assert out.shape == (B, DATA_DIM), out.shape
    # Tolerance slightly relaxed vs. bit-identical layouts: the fused kernel
    # reorders summations (split W1 slabs, sin/cos slab dots, K=3 FMAs), which
    # is mathematically identical but not bit-identical to the concat form.
    assert jnp.allclose(out, ref, atol=2e-3, rtol=2e-3), \
        float(jnp.max(jnp.abs(out - ref)))
    print("KERNEL_OK")
</pallas_src>

<mosaic_0001>
module attributes {stable_mosaic.version = 11 : i64} {
  func.func @fused_diffusion_kernel(%arg0: i32, %arg1: memref<2x1xf32, #tpu.memory_space<vmem>>, %arg2: memref<1x64xf32, #tpu.memory_space<vmem>>, %arg3: memref<128x128xf32, #tpu.memory_space<vmem>>, %arg4: memref<1x128xf32, #tpu.memory_space<vmem>>, %arg5: memref<2x6xf32, #tpu.memory_space<vmem>>, %arg6: memref<6x256xf32, #tpu.memory_space<vmem>>, %arg7: memref<1x256xf32, #tpu.memory_space<vmem>>, %arg8: memref<256x256xf32, #tpu.memory_space<vmem>>, %arg9: memref<1x256xf32, #tpu.memory_space<vmem>>, %arg10: memref<128x3xf32, #tpu.memory_space<vmem>>, %arg11: memref<3x64xf32, #tpu.memory_space<vmem>>, %arg12: memref<1x64xf32, #tpu.memory_space<vmem>>, %arg13: memref<64x128xf32, #tpu.memory_space<vmem>>, %arg14: memref<1x128xf32, #tpu.memory_space<vmem>>, %arg15: memref<128x1024xf32, #tpu.memory_space<vmem>>, %arg16: memref<1x1024xf32, #tpu.memory_space<vmem>>, %arg17: memref<1408x256xf32, #tpu.memory_space<vmem>>, %arg18: memref<1x256xf32, #tpu.memory_space<vmem>>, %arg19: memref<256x6xf32, #tpu.memory_space<vmem>>, %arg20: memref<1x6xf32, #tpu.memory_space<vmem>>, %arg21: memref<2x6xf32, #tpu.memory_space<vmem>>) attributes {dimension_semantics = [#tpu.dimension_semantics<arbitrary>], iteration_bounds = array<i64: 1>, scalar_prefetch = 0 : i64, scratch_operands = 0 : i64, tpu.core_type = #tpu.core_type<tc>, window_params = [{pipeline_mode = #tpu.pipeline_mode<synchronous>, transform_indices = @transform_0, window_bounds = array<i64: 2, 1>}, {pipeline_mode = #tpu.pipeline_mode<synchronous>, transform_indices = @transform_1, window_bounds = array<i64: 1, 64>}, {pipeline_mode = #tpu.pipeline_mode<synchronous>, transform_indices = @transform_2, window_bounds = array<i64: 128, 128>}, {pipeline_mode = #tpu.pipeline_mode<synchronous>, transform_indices = @transform_3, window_bounds = array<i64: 1, 128>}, {pipeline_mode = #tpu.pipeline_mode<synchronous>, transform_indices = @transform_4, window_bounds = array<i64: 2, 6>}, {pipeline_mode = #tpu.pipeline_mode<synchronous>, transform_indices = @transform_5, window_bounds = array<i64: 6, 256>}, {pipeline_mode = #tpu.pipeline_mode<synchronous>, transform_indices = @transform_6, window_bounds = array<i64: 1, 256>}, {pipeline_mode = #tpu.pipeline_mode<synchronous>, transform_indices = @transform_7, window_bounds = array<i64: 256, 256>}, {pipeline_mode = #tpu.pipeline_mode<synchronous>, transform_indices = @transform_8, window_bounds = array<i64: 1, 256>}, {pipeline_mode = #tpu.pipeline_mode<synchronous>, transform_indices = @transform_9, window_bounds = array<i64: 128, 3>}, {pipeline_mode = #tpu.pipeline_mode<synchronous>, transform_indices = @transform_10, window_bounds = array<i64: 3, 64>}, {pipeline_mode = #tpu.pipeline_mode<synchronous>, transform_indices = @transform_11, window_bounds = array<i64: 1, 64>}, {pipeline_mode = #tpu.pipeline_mode<synchronous>, transform_indices = @transform_12, window_bounds = array<i64: 64, 128>}, {pipeline_mode = #tpu.pipeline_mode<synchronous>, transform_indices = @transform_13, window_bounds = array<i64: 1, 128>}, {pipeline_mode = #tpu.pipeline_mode<synchronous>, transform_indices = @transform_14, window_bounds = array<i64: 128, 1024>}, {pipeline_mode = #tpu.pipeline_mode<synchronous>, transform_indices = @transform_15, window_bounds = array<i64: 1, 1024>}, {pipeline_mode = #tpu.pipeline_mode<synchronous>, transform_indices = @transform_16, window_bounds = array<i64: 1408, 256>}, {pipeline_mode = #tpu.pipeline_mode<synchronous>, transform_indices = @transform_17, window_bounds = array<i64: 1, 256>}, {pipeline_mode = #tpu.pipeline_mode<synchronous>, transform_indices = @transform_18, window_bounds = array<i64: 256, 6>}, {pipeline_mode = #tpu.pipeline_mode<synchronous>, transform_indices = @transform_19, window_bounds = array<i64: 1, 6>}, {pipeline_mode = #tpu.pipeline_mode<synchronous>, transform_indices = @transform_20, window_bounds = array<i64: 2, 6>}]} {
    %c0 = arith.constant 0 : index
    %c0_0 = arith.constant 0 : index
    %0 = vector.load %arg1[%c0, %c0_0] : memref<2x1xf32, #tpu.memory_space<vmem>>, vector<2x1xf32>
    %c0_1 = arith.constant 0 : index
    %c0_2 = arith.constant 0 : index
    %1 = vector.load %arg2[%c0_1, %c0_2] : memref<1x64xf32, #tpu.memory_space<vmem>>, vector<1x64xf32>
    %2 = vector.broadcast %0 : vector<2x1xf32> to vector<2x64xf32>
    %3 = vector.broadcast %1 : vector<1x64xf32> to vector<2x64xf32>
    %4 = arith.mulf %2, %3 : vector<2x64xf32>
    %cst = arith.constant 6.28318548 : f32
    %5 = vector.broadcast %cst : f32 to vector<2x64xf32>
    %6 = arith.mulf %4, %5 : vector<2x64xf32>
    %7 = math.sin %6 : vector<2x64xf32>
    %c0_3 = arith.constant 0 : index
    %c0_4 = arith.constant 0 : index
    %8 = vector.load %arg3[%c0_3, %c0_4] : memref<128x128xf32, #tpu.memory_space<vmem>>, vector<64x128xf32>
    %cst_5 = arith.constant dense<0.000000e+00> : vector<2x128xf32>
    %9 = tpu.matmul %7, %8, %cst_5 {dimension_numbers = #tpu.dot_dimension_numbers<[1], [0], [0], [1], [0, 0, 1, 1], [], []>} : vector<2x64xf32>, vector<64x128xf32>, vector<2x128xf32> -> vector<2x128xf32>
    %10 = math.cos %6 : vector<2x64xf32>
    %c64 = arith.constant 64 : index
    %c0_6 = arith.constant 0 : index
    %11 = vector.load %arg3[%c64, %c0_6] : memref<128x128xf32, #tpu.memory_space<vmem>>, vector<64x128xf32>
    %cst_7 = arith.constant dense<0.000000e+00> : vector<2x128xf32>
    %12 = tpu.matmul %10, %11, %cst_7 {dimension_numbers = #tpu.dot_dimension_numbers<[1], [0], [0], [1], [0, 0, 1, 1], [], []>} : vector<2x64xf32>, vector<64x128xf32>, vector<2x128xf32> -> vector<2x128xf32>
    %13 = arith.addf %9, %12 : vector<2x128xf32>
    %c0_8 = arith.constant 0 : index
    %c0_9 = arith.constant 0 : index
    %14 = vector.load %arg4[%c0_8, %c0_9] : memref<1x128xf32, #tpu.memory_space<vmem>>, vector<1x128xf32>
    %15 = vector.broadcast %14 : vector<1x128xf32> to vector<2x128xf32>
    %16 = arith.addf %13, %15 : vector<2x128xf32>
    %cst_10 = arith.constant 0.000000e+00 : f32
    %17 = vector.broadcast %cst_10 : f32 to vector<2x128xf32>
    %18 = arith.maximumf %16, %17 : vector<2x128xf32>
    %c0_11 = arith.constant 0 : index
    %c0_12 = arith.constant 0 : index
    %19 = vector.load %arg5[%c0_11, %c0_12] : memref<2x6xf32, #tpu.memory_space<vmem>>, vector<2x6xf32>
    %c0_13 = arith.constant 0 : index
    %c0_14 = arith.constant 0 : index
    %20 = vector.load %arg6[%c0_13, %c0_14] : memref<6x256xf32, #tpu.memory_space<vmem>>, vector<6x256xf32>
    %cst_15 = arith.constant dense<0.000000e+00> : vector<2x256xf32>
    %21 = tpu.matmul %19, %20, %cst_15 {dimension_numbers = #tpu.dot_dimension_numbers<[1], [0], [0], [1], [0, 0, 1, 1], [], []>} : vector<2x6xf32>, vector<6x256xf32>, vector<2x256xf32> -> vector<2x256xf32>
    %c0_16 = arith.constant 0 : index
    %c0_17 = arith.constant 0 : index
    %22 = vector.load %arg7[%c0_16, %c0_17] : memref<1x256xf32, #tpu.memory_space<vmem>>, vector<1x256xf32>
    %23 = vector.broadcast %22 : vector<1x256xf32> to vector<2x256xf32>
    %24 = arith.addf %21, %23 : vector<2x256xf32>
    %cst_18 = arith.constant 0.000000e+00 : f32
    %25 = vector.broadcast %cst_18 : f32 to vector<2x256xf32>
    %26 = arith.maximumf %24, %25 : vector<2x256xf32>
    %c0_19 = arith.constant 0 : index
    %c0_20 = arith.constant 0 : index
    %27 = vector.load %arg8[%c0_19, %c0_20] : memref<256x256xf32, #tpu.memory_space<vmem>>, vector<256x256xf32>
    %cst_21 = arith.constant dense<0.000000e+00> : vector<2x256xf32>
    %28 = tpu.matmul %26, %27, %cst_21 {dimension_numbers = #tpu.dot_dimension_numbers<[1], [0], [0], [1], [0, 0, 1, 1], [], []>} : vector<2x256xf32>, vector<256x256xf32>, vector<2x256xf32> -> vector<2x256xf32>
    %c0_22 = arith.constant 0 : index
    %c0_23 = arith.constant 0 : index
    %29 = vector.load %arg9[%c0_22, %c0_23] : memref<1x256xf32, #tpu.memory_space<vmem>>, vector<1x256xf32>
    %30 = vector.broadcast %29 : vector<1x256xf32> to vector<2x256xf32>
    %31 = arith.addf %28, %30 : vector<2x256xf32>
    %cst_24 = arith.constant 0.000000e+00 : f32
    %32 = vector.broadcast %cst_24 : f32 to vector<2x256xf32>
    %33 = arith.maximumf %31, %32 : vector<2x256xf32>
    %c0_25 = arith.constant 0 : index
    %c0_26 = arith.constant 0 : index
    %34 = vector.load %arg10[%c0_25, %c0_26] : memref<128x3xf32, #tpu.memory_space<vmem>>, vector<128x3xf32>
    %c0_27 = arith.constant 0 : index
    %c0_28 = arith.constant 0 : index
    %35 = vector.load %arg11[%c0_27, %c0_28] : memref<3x64xf32, #tpu.memory_space<vmem>>, vector<3x64xf32>
    %36 = vector.extract_strided_slice %34 {offsets = [0, 0], sizes = [128, 1], strides = [1, 1]} : vector<128x3xf32> to vector<128x1xf32>
    %37 = vector.extract_strided_slice %35 {offsets = [0, 0], sizes = [1, 64], strides = [1, 1]} : vector<3x64xf32> to vector<1x64xf32>
    %38 = vector.broadcast %36 : vector<128x1xf32> to vector<128x64xf32>
    %39 = vector.broadcast %37 : vector<1x64xf32> to vector<128x64xf32>
    %40 = arith.mulf %38, %39 : vector<128x64xf32>
    %41 = vector.extract_strided_slice %34 {offsets = [0, 1], sizes = [128, 1], strides = [1, 1]} : vector<128x3xf32> to vector<128x1xf32>
    %42 = vector.extract_strided_slice %35 {offsets = [1, 0], sizes = [1, 64], strides = [1, 1]} : vector<3x64xf32> to vector<1x64xf32>
    %43 = vector.broadcast %41 : vector<128x1xf32> to vector<128x64xf32>
    %44 = vector.broadcast %42 : vector<1x64xf32> to vector<128x64xf32>
    %45 = arith.mulf %43, %44 : vector<128x64xf32>
    %46 = arith.addf %40, %45 : vector<128x64xf32>
    %47 = vector.extract_strided_slice %34 {offsets = [0, 2], sizes = [128, 1], strides = [1, 1]} : vector<128x3xf32> to vector<128x1xf32>
    %48 = vector.extract_strided_slice %35 {offsets = [2, 0], sizes = [1, 64], strides = [1, 1]} : vector<3x64xf32> to vector<1x64xf32>
    %49 = vector.broadcast %47 : vector<128x1xf32> to vector<128x64xf32>
    %50 = vector.broadcast %48 : vector<1x64xf32> to vector<128x64xf32>
    %51 = arith.mulf %49, %50 : vector<128x64xf32>
    %52 = arith.addf %46, %51 : vector<128x64xf32>
    %c0_29 = arith.constant 0 : index
    %c0_30 = arith.constant 0 : index
    %53 = vector.load %arg12[%c0_29, %c0_30] : memref<1x64xf32, #tpu.memory_space<vmem>>, vector<1x64xf32>
    %54 = vector.broadcast %53 : vector<1x64xf32> to vector<128x64xf32>
    %55 = arith.addf %52, %54 : vector<128x64xf32>
    %cst_31 = arith.constant 0.000000e+00 : f32
    %56 = vector.broadcast %cst_31 : f32 to vector<128x64xf32>
    %57 = arith.maximumf %55, %56 : vector<128x64xf32>
    %c0_32 = arith.constant 0 : index
    %c0_33 = arith.constant 0 : index
    %58 = vector.load %arg13[%c0_32, %c0_33] : memref<64x128xf32, #tpu.memory_space<vmem>>, vector<64x128xf32>
    %cst_34 = arith.constant dense<0.000000e+00> : vector<128x128xf32>
    %59 = tpu.matmul %57, %58, %cst_34 {dimension_numbers = #tpu.dot_dimension_numbers<[1], [0], [0], [1], [0, 0, 1, 1], [], []>} : vector<128x64xf32>, vector<64x128xf32>, vector<128x128xf32> -> vector<128x128xf32>
    %c0_35 = arith.constant 0 : index
    %c0_36 = arith.constant 0 : index
    %60 = vector.load %arg14[%c0_35, %c0_36] : memref<1x128xf32, #tpu.memory_space<vmem>>, vector<1x128xf32>
    %61 = vector.broadcast %60 : vector<1x128xf32> to vector<128x128xf32>
    %62 = arith.addf %59, %61 : vector<128x128xf32>
    %cst_37 = arith.constant 0.000000e+00 : f32
    %63 = vector.broadcast %cst_37 : f32 to vector<128x128xf32>
    %64 = arith.maximumf %62, %63 : vector<128x128xf32>
    %65 = vector.shape_cast %64 : vector<128x128xf32> to vector<2x64x128xf32>
    %cst_38 = arith.constant dense<0xFF800000> : vector<2x128xf32>
    %66 = vector.multi_reduction <maximumf>, %65, %cst_38 [1] : vector<2x64x128xf32> to vector<2x128xf32>
    %c0_39 = arith.constant 0 : index
    %c0_40 = arith.constant 0 : index
    %67 = vector.load %arg15[%c0_39, %c0_40] : memref<128x1024xf32, #tpu.memory_space<vmem>>, vector<128x1024xf32>
    %cst_41 = arith.constant dense<0.000000e+00> : vector<2x1024xf32>
    %68 = tpu.matmul %66, %67, %cst_41 {dimension_numbers = #tpu.dot_dimension_numbers<[1], [0], [0], [1], [0, 0, 1, 1], [], []>} : vector<2x128xf32>, vector<128x1024xf32>, vector<2x1024xf32> -> vector<2x1024xf32>
    %c0_42 = arith.constant 0 : index
    %c0_43 = arith.constant 0 : index
    %69 = vector.load %arg16[%c0_42, %c0_43] : memref<1x1024xf32, #tpu.memory_space<vmem>>, vector<1x1024xf32>
    %70 = vector.broadcast %69 : vector<1x1024xf32> to vector<2x1024xf32>
    %71 = arith.addf %68, %70 : vector<2x1024xf32>
    %cst_44 = arith.constant 0.000000e+00 : f32
    %72 = vector.broadcast %cst_44 : f32 to vector<2x1024xf32>
    %73 = arith.maximumf %71, %72 : vector<2x1024xf32>
    %c0_45 = arith.constant 0 : index
    %c0_46 = arith.constant 0 : index
    %74 = vector.load %arg17[%c0_45, %c0_46] : memref<1408x256xf32, #tpu.memory_space<vmem>>, vector<256x256xf32>
    %cst_47 = arith.constant dense<0.000000e+00> : vector<2x256xf32>
    %75 = tpu.matmul %33, %74, %cst_47 {dimension_numbers = #tpu.dot_dimension_numbers<[1], [0], [0], [1], [0, 0, 1, 1], [], []>} : vector<2x256xf32>, vector<256x256xf32>, vector<2x256xf32> -> vector<2x256xf32>
    %c256 = arith.constant 256 : index
    %c0_48 = arith.constant 0 : index
    %76 = vector.load %arg17[%c256, %c0_48] : memref<1408x256xf32, #tpu.memory_space<vmem>>, vector<128x256xf32>
    %cst_49 = arith.constant dense<0.000000e+00> : vector<2x256xf32>
    %77 = tpu.matmul %18, %76, %cst_49 {dimension_numbers = #tpu.dot_dimension_numbers<[1], [0], [0], [1], [0, 0, 1, 1], [], []>} : vector<2x128xf32>, vector<128x256xf32>, vector<2x256xf32> -> vector<2x256xf32>
    %78 = arith.addf %75, %77 : vector<2x256xf32>
    %c384 = arith.constant 384 : index
    %c0_50 = arith.constant 0 : index
    %79 = vector.load %arg17[%c384, %c0_50] : memref<1408x256xf32, #tpu.memory_space<vmem>>, vector<1024x256xf32>
    %cst_51 = arith.constant dense<0.000000e+00> : vector<2x256xf32>
    %80 = tpu.matmul %73, %79, %cst_51 {dimension_numbers = #tpu.dot_dimension_numbers<[1], [0], [0], [1], [0, 0, 1, 1], [], []>} : vector<2x1024xf32>, vector<1024x256xf32>, vector<2x256xf32> -> vector<2x256xf32>
    %81 = arith.addf %78, %80 : vector<2x256xf32>
    %c0_52 = arith.constant 0 : index
    %c0_53 = arith.constant 0 : index
    %82 = vector.load %arg18[%c0_52, %c0_53] : memref<1x256xf32, #tpu.memory_space<vmem>>, vector<1x256xf32>
    %83 = vector.broadcast %82 : vector<1x256xf32> to vector<2x256xf32>
    %84 = arith.addf %81, %83 : vector<2x256xf32>
    %cst_54 = arith.constant 0.000000e+00 : f32
    %85 = vector.broadcast %cst_54 : f32 to vector<2x256xf32>
    %86 = arith.maximumf %84, %85 : vector<2x256xf32>
    %87 = vector.broadcast %cst_54 : f32 to vector<2x256xf32>
    %88 = arith.subf %84, %87 : vector<2x256xf32>
    %89 = arith.cmpf one, %88, %88 : vector<2x256xf32>
    %90 = vector.broadcast %cst_54 : f32 to vector<2x256xf32>
    %91 = arith.addf %84, %90 : vector<2x256xf32>
    %92 = math.absf %88 : vector<2x256xf32>
    %cst_55 = arith.constant 0.000000e+00 : f32
    %93 = vector.broadcast %cst_55 : f32 to vector<2x256xf32>
    %94 = arith.subf %93, %92 : vector<2x256xf32>
    %95 = math.exp %94 : vector<2x256xf32>
    %96 = math.log1p %95 : vector<2x256xf32>
    %97 = arith.addf %86, %96 : vector<2x256xf32>
    %98 = arith.select %89, %91, %97 : vector<2x256xi1>, vector<2x256xf32>
    %99 = math.tanh %98 : vector<2x256xf32>
    %100 = arith.mulf %84, %99 : vector<2x256xf32>
    %c0_56 = arith.constant 0 : index
    %c0_57 = arith.constant 0 : index
    %101 = vector.load %arg19[%c0_56, %c0_57] : memref<256x6xf32, #tpu.memory_space<vmem>>, vector<256x6xf32>
    %cst_58 = arith.constant dense<0.000000e+00> : vector<2x6xf32>
    %102 = tpu.matmul %100, %101, %cst_58 {dimension_numbers = #tpu.dot_dimension_numbers<[1], [0], [0], [1], [0, 0, 1, 1], [], []>} : vector<2x256xf32>, vector<256x6xf32>, vector<2x6xf32> -> vector<2x6xf32>
    %c0_59 = arith.constant 0 : index
    %c0_60 = arith.constant 0 : index
    %103 = vector.load %arg20[%c0_59, %c0_60] : memref<1x6xf32, #tpu.memory_space<vmem>>, vector<1x6xf32>
    %104 = vector.broadcast %103 : vector<1x6xf32> to vector<2x6xf32>
    %105 = arith.addf %102, %104 : vector<2x6xf32>
    %c0_61 = arith.constant 0 : index
    %c0_62 = arith.constant 0 : index
    %106 = vector.load %arg21[%c0_61, %c0_62] : memref<2x6xf32, #tpu.memory_space<vmem>>, vector<2x6xf32>
    tpu.vector_store %arg21[%c0_61, %c0_62], %105 {strides = array<i32>} : memref<2x6xf32, #tpu.memory_space<vmem>>, vector<2x6xf32>,
    return
  }
  func.func @transform_0(%arg0: i32) -> (i32, i32) {
    %c0_i32 = arith.constant 0 : i32
    %c0_i32_0 = arith.constant 0 : i32
    %c0_i32_1 = arith.constant 0 : i32
    return %c0_i32, %c0_i32_0 : i32, i32
  }
  func.func @transform_1(%arg0: i32) -> (i32, i32) {
    %c0_i32 = arith.constant 0 : i32
    %c0_i32_0 = arith.constant 0 : i32
    %c0_i32_1 = arith.constant 0 : i32
    return %c0_i32, %c0_i32_0 : i32, i32
  }
  func.func @transform_2(%arg0: i32) -> (i32, i32) {
    %c0_i32 = arith.constant 0 : i32
    %c0_i32_0 = arith.constant 0 : i32
    %c0_i32_1 = arith.constant 0 : i32
    return %c0_i32, %c0_i32_0 : i32, i32
  }
  func.func @transform_3(%arg0: i32) -> (i32, i32) {
    %c0_i32 = arith.constant 0 : i32
    %c0_i32_0 = arith.constant 0 : i32
    %c0_i32_1 = arith.constant 0 : i32
    return %c0_i32, %c0_i32_0 : i32, i32
  }
  func.func @transform_4(%arg0: i32) -> (i32, i32) {
    %c0_i32 = arith.constant 0 : i32
    %c0_i32_0 = arith.constant 0 : i32
    %c0_i32_1 = arith.constant 0 : i32
    return %c0_i32, %c0_i32_0 : i32, i32
  }
  func.func @transform_5(%arg0: i32) -> (i32, i32) {
    %c0_i32 = arith.constant 0 : i32
    %c0_i32_0 = arith.constant 0 : i32
    %c0_i32_1 = arith.constant 0 : i32
    return %c0_i32, %c0_i32_0 : i32, i32
  }
  func.func @transform_6(%arg0: i32) -> (i32, i32) {
    %c0_i32 = arith.constant 0 : i32
    %c0_i32_0 = arith.constant 0 : i32
    %c0_i32_1 = arith.constant 0 : i32
    return %c0_i32, %c0_i32_0 : i32, i32
  }
  func.func @transform_7(%arg0: i32) -> (i32, i32) {
    %c0_i32 = arith.constant 0 : i32
    %c0_i32_0 = arith.constant 0 : i32
    %c0_i32_1 = arith.constant 0 : i32
    return %c0_i32, %c0_i32_0 : i32, i32
  }
  func.func @transform_8(%arg0: i32) -> (i32, i32) {
    %c0_i32 = arith.constant 0 : i32
    %c0_i32_0 = arith.constant 0 : i32
    %c0_i32_1 = arith.constant 0 : i32
    return %c0_i32, %c0_i32_0 : i32, i32
  }
  func.func @transform_9(%arg0: i32) -> (i32, i32) {
    %c0_i32 = arith.constant 0 : i32
    %c0_i32_0 = arith.constant 0 : i32
    %c0_i32_1 = arith.constant 0 : i32
    return %c0_i32, %c0_i32_0 : i32, i32
  }
  func.func @transform_10(%arg0: i32) -> (i32, i32) {
    %c0_i32 = arith.constant 0 : i32
    %c0_i32_0 = arith.constant 0 : i32
    %c0_i32_1 = arith.constant 0 : i32
    return %c0_i32, %c0_i32_0 : i32, i32
  }
  func.func @transform_11(%arg0: i32) -> (i32, i32) {
    %c0_i32 = arith.constant 0 : i32
    %c0_i32_0 = arith.constant 0 : i32
    %c0_i32_1 = arith.constant 0 : i32
    return %c0_i32, %c0_i32_0 : i32, i32
  }
  func.func @transform_12(%arg0: i32) -> (i32, i32) {
    %c0_i32 = arith.constant 0 : i32
    %c0_i32_0 = arith.constant 0 : i32
    %c0_i32_1 = arith.constant 0 : i32
    return %c0_i32, %c0_i32_0 : i32, i32
  }
  func.func @transform_13(%arg0: i32) -> (i32, i32) {
    %c0_i32 = arith.constant 0 : i32
    %c0_i32_0 = arith.constant 0 : i32
    %c0_i32_1 = arith.constant 0 : i32
    return %c0_i32, %c0_i32_0 : i32, i32
  }
  func.func @transform_14(%arg0: i32) -> (i32, i32) {
    %c0_i32 = arith.constant 0 : i32
    %c0_i32_0 = arith.constant 0 : i32
    %c0_i32_1 = arith.constant 0 : i32
    return %c0_i32, %c0_i32_0 : i32, i32
  }
  func.func @transform_15(%arg0: i32) -> (i32, i32) {
    %c0_i32 = arith.constant 0 : i32
    %c0_i32_0 = arith.constant 0 : i32
    %c0_i32_1 = arith.constant 0 : i32
    return %c0_i32, %c0_i32_0 : i32, i32
  }
  func.func @transform_16(%arg0: i32) -> (i32, i32) {
    %c0_i32 = arith.constant 0 : i32
    %c0_i32_0 = arith.constant 0 : i32
    %c0_i32_1 = arith.constant 0 : i32
    return %c0_i32, %c0_i32_0 : i32, i32
  }
  func.func @transform_17(%arg0: i32) -> (i32, i32) {
    %c0_i32 = arith.constant 0 : i32
    %c0_i32_0 = arith.constant 0 : i32
    %c0_i32_1 = arith.constant 0 : i32
    return %c0_i32, %c0_i32_0 : i32, i32
  }
  func.func @transform_18(%arg0: i32) -> (i32, i32) {
    %c0_i32 = arith.constant 0 : i32
    %c0_i32_0 = arith.constant 0 : i32
    %c0_i32_1 = arith.constant 0 : i32
    return %c0_i32, %c0_i32_0 : i32, i32
  }
  func.func @transform_19(%arg0: i32) -> (i32, i32) {
    %c0_i32 = arith.constant 0 : i32
    %c0_i32_0 = arith.constant 0 : i32
    %c0_i32_1 = arith.constant 0 : i32
    return %c0_i32, %c0_i32_0 : i32, i32
  }
  func.func @transform_20(%arg0: i32) -> (i32, i32) {
    %c0_i32 = arith.constant 0 : i32
    %c0_i32_0 = arith.constant 0 : i32
    %c0_i32_1 = arith.constant 0 : i32
    return %c0_i32, %c0_i32_0 : i32, i32
  }
}

</mosaic_0001>

<bundles_post_ra>
// kernel: tpu_custom_call.1
= control target key start
LH: loop header
LB: loop body
LE: loop exit
PB: predicated region body
PF: predicated region fallthrough
CT: control target
= control target key end

     0   :  { %s3991_s0 = inlined_call_operand.vmem [shape: f32[2,1], index: 0, kind: input, shape index: {}]   ;;  %s3992_s1 = inlined_call_operand.hbm [shape: f32[1,64], index: 1, kind: input, shape index: {}]   ;;  %s3993_s2 = inlined_call_operand.hbm [shape: f32[128,128], index: 2, kind: input, shape index: {}]   ;;  %s3994_s3 = inlined_call_operand.hbm [shape: f32[1,128], index: 3, kind: input, shape index: {}]   ;;  %s3995_s4 = inlined_call_operand.hbm [shape: f32[2,6], index: 4, kind: input, shape index: {}]   ;;  %s3996_s5 = inlined_call_operand.hbm [shape: f32[6,256], index: 5, kind: input, shape index: {}]   ;;  %s3997_s6 = inlined_call_operand.hbm [shape: f32[1,256], index: 6, kind: input, shape index: {}]   ;;  %s3998_s7 = inlined_call_operand.hbm [shape: f32[256,256], index: 7, kind: input, shape index: {}]   ;;  %s3999_s8 = inlined_call_operand.hbm [shape: f32[1,256], index: 8, kind: input, shape index: {}]   ;;  %s4000_s9 = inlined_call_operand.vmem [shape: f32[128,3], index: 9, kind: input, shape index: {}]   ;;  %s4001_s10 = inlined_call_operand.hbm [shape: f32[3,64], index: 10, kind: input, shape index: {}]   ;;  %s4002_s11 = inlined_call_operand.hbm [shape: f32[1,64], index: 11, kind: input, shape index: {}]   ;;  %s4003_s12 = inlined_call_operand.hbm [shape: f32[64,128], index: 12, kind: input, shape index: {}]   ;;  %s4004_s13 = inlined_call_operand.hbm [shape: f32[1,128], index: 13, kind: input, shape index: {}]   ;;  %s4005_s14 = inlined_call_operand.hbm [shape: f32[128,1024], index: 14, kind: input, shape index: {}]   ;;  %s4006_s15 = inlined_call_operand.hbm [shape: f32[1,1024], index: 15, kind: input, shape index: {}]   ;;  %s4007_s16 = inlined_call_operand.hbm [shape: f32[1408,256], index: 16, kind: input, shape index: {}]   ;;  %s4008_s17 = inlined_call_operand.hbm [shape: f32[1,256], index: 17, kind: input, shape index: {}]   ;;  %s4009_s18 = inlined_call_operand.vmem [shape: f32[256,6], index: 18, kind: input, shape index: {}]   ;;  %s4010_s19 = inlined_call_operand.hbm [shape: f32[1,6], index: 19, kind: input, shape index: {}]   ;;  %s4011_s20 = inlined_call_operand.hbm [shape: f32[2,6], index: 20, kind: output, shape index: {}]  }
   0x1   :  { %4014 = sst [smem:[#allocation40_spill]] %s3991_s0 }
   0x2   :  { %4015 = sst [smem:[#allocation41_spill]] %s3992_s1 }
   0x3   :  { %4016 = sst [smem:[#allocation42_spill]] %s3993_s2 }
   0x4   :  { %4017 = sst [smem:[#allocation43_spill]] %s3994_s3 }
   0x5   :  { %4018 = sst [smem:[#allocation44_spill]] %s3995_s4 }
   0x6   :  { %25 = vsyncpa [#allocation3], 0 }
   0x7   :  { %26 = vsyncpa [#allocation6], 0 }
   0x8   :  { %27 = vsyncpa [#allocation9], 0 }
   0x9   :  { %28 = vsyncpa [#allocation12], 0 }
   0xa   :  { %29 = vsyncpa [#allocation15], 0 }
   0xb   :  { %30 = vsyncpa [#allocation18], 0 }
   0xc   :  { %31 = vsyncpa [#allocation21], 0 }
   0xd   :  { %32 = vsyncpa [#allocation24], 0 }
   0xe   :  { %33 = vsyncpa [#allocation27], 0  ;;  %s4019_s23 = sld [smem:[#allocation42_spill]] }
  0x14   :  { %s52_s24 = sshll.u32 %s4019_s23, 4  ;;  %s53_s24 = int_to_ptr.hbm [resolvable:$true] %s52_s24 }
  0x15   :  { %34 = vsyncpa [#allocation4], 0  ;;  %s3247_s2 = smov [#allocation5]   ;;  %s4020_s27 = sld [smem:[#allocation44_spill]] }
  0x16   :  { %s54_s25 = sshll.u32 %s3247_s2, 4  ;;  %s4012_s4 = smov 128   ;;  %s55_s25 = int_to_ptr.vmem [resolvable:$true] %s54_s25 }
  0x17   :  { %s4013_s29 = smov 8   ;;  %s3250_s30 = smov [#allocation8]  }
  0x18   :  { %60 = dma.hbm_to_vmem [thread:$0]  %s53_s24, 2048, %s55_s25, [#allocation6], %s4012_s4, %s4012_s4, %s4013_s29  }
  0x19   :  { %s79_s0 = sshll.u32 %s3250_s30, 4  ;;  %s99_s22 = sshll.u32 %s3997_s6, 4  ;;  %s80_s0 = int_to_ptr.vmem [resolvable:$true] %s79_s0  ;;  %s100_s22 = int_to_ptr.hbm [resolvable:$true] %s99_s22 }
  0x1a   :  { %s123_s3 = sshll.u32 %s3999_s8, 4  ;;  %s3251_s26 = smov [#allocation11]   ;;  %s124_s3 = int_to_ptr.hbm [resolvable:$true] %s123_s3 }
  0x1b   :  { %s77_s28 = sshll.u32 %s4020_s27, 4  ;;  %s101_s27 = sshll.u32 %s3251_s26, 4  ;;  %s78_s28 = int_to_ptr.hbm [resolvable:$true] %s77_s28  ;;  %s102_s27 = int_to_ptr.vmem [resolvable:$true] %s101_s27 }
  0x1c   :  { %82 = dma.hbm_to_vmem [thread:$0]  %s78_s28, 32, %s80_s0, [#allocation9]  }
  0x1d   :  { %104 = dma.hbm_to_vmem [thread:$0]  %s100_s22, 32, %s102_s27, [#allocation12]  }
  0x1e   :  { %s3252_s24 = smov [#allocation14]   ;;  %s147_s29 = sshll.u32 %s4002_s11, 4  ;;  %s148_s29 = int_to_ptr.hbm [resolvable:$true] %s147_s29 }
  0x1f   :  { %s125_s25 = sshll.u32 %s3252_s24, 4  ;;  %s171_s0 = sshll.u32 %s4004_s13, 4  ;;  %s126_s25 = int_to_ptr.vmem [resolvable:$true] %s125_s25  ;;  %s172_s0 = int_to_ptr.hbm [resolvable:$true] %s171_s0 }
  0x20   :  { %128 = dma.hbm_to_vmem [thread:$0]  %s124_s3, 32, %s126_s25, [#allocation15]  }
  0x21   :  { %s3253_s21 = smov [#allocation17]   ;;  %s3254_s1 = smov [#allocation20]  }
  0x22   :  { %s149_s8 = sshll.u32 %s3253_s21, 4  ;;  %s173_s22 = sshll.u32 %s3254_s1, 4  ;;  %s150_s8 = int_to_ptr.vmem [resolvable:$true] %s149_s8  ;;  %s174_s22 = int_to_ptr.vmem [resolvable:$true] %s173_s22 }
  0x23   :  { %152 = dma.hbm_to_vmem [thread:$0]  %s148_s29, 16, %s150_s8, [#allocation18]  }
  0x24   :  { %s195_s26 = sshll.u32 %s4006_s15, 4  ;;  %s219_s3 = sshll.u32 %s4008_s17, 4  ;;  %s196_s26 = int_to_ptr.hbm [resolvable:$true] %s195_s26  ;;  %s220_s3 = int_to_ptr.hbm [resolvable:$true] %s219_s3 }
  0x25   :  { %176 = dma.hbm_to_vmem [thread:$0]  %s172_s0, 16, %s174_s22, [#allocation21]  }
  0x26   :  { %s3255_s27 = smov [#allocation23]   ;;  %s3256_s24 = smov [#allocation26]  }
  0x27   :  { %s197_s13 = sshll.u32 %s3255_s27, 4  ;;  %s221_s29 = sshll.u32 %s3256_s24, 4  ;;  %s198_s13 = int_to_ptr.vmem [resolvable:$true] %s197_s13  ;;  %s222_s29 = int_to_ptr.vmem [resolvable:$true] %s221_s29 }
  0x28   :  { %200 = dma.hbm_to_vmem [thread:$0]  %s196_s26, 128, %s198_s13, [#allocation24]  }
  0x29   :  { %s4021_s6 = sld [smem:[#allocation41_spill]]  ;;  %s3257_s1 = smov [#allocation2]  }
  0x2a   :  { %224 = dma.hbm_to_vmem [thread:$0]  %s220_s3, 32, %s222_s29, [#allocation27]  }
  0x2b   :  { %s4022_s21 = sld [smem:[#allocation43_spill]]  ;;  %s44_s17 = sshll.u32 %s3257_s1, 4  ;;  %s45_s17 = int_to_ptr.vmem [resolvable:$true] %s44_s17 }
  0x2c   :  { %s3258_s22 = smov [#allocation7]   ;;  %s88_s11 = sshll.u32 %s3996_s5, 4  ;;  %s89_s11 = int_to_ptr.hbm [resolvable:$true] %s88_s11 }
  0x2d   :  { %s68_s23 = sshll.u32 %s3258_s22, 4  ;;  %s109_s27 = sshll.u32 %s3998_s7, 4  ;;  %s69_s23 = int_to_ptr.vmem [resolvable:$true] %s68_s23  ;;  %s110_s27 = int_to_ptr.hbm [resolvable:$true] %s109_s27 }
  0x2e   :  { %s3259_s13 = smov [#allocation10]   ;;  %s3260_s29 = smov [#allocation13]  }
  0x2f   :  { %s42_s28 = sshll.u32 %s4021_s6, 4  ;;  %s90_s24 = sshll.u32 %s3259_s13, 4  ;;  %s43_s28 = int_to_ptr.hbm [resolvable:$true] %s42_s28  ;;  %s91_s24 = int_to_ptr.vmem [resolvable:$true] %s90_s24 }
  0x30   :  { %47 = dma.hbm_to_vmem [thread:$0]  %s43_s28, 16, %s45_s17, [#allocation3]  }
  0x31   :  { %s66_s8 = sshll.u32 %s4022_s21, 4  ;;  %s111_s25 = sshll.u32 %s3260_s29, 4  ;;  %s67_s8 = int_to_ptr.hbm [resolvable:$true] %s66_s8  ;;  %s112_s25 = int_to_ptr.vmem [resolvable:$true] %s111_s25 }
  0x32   :  { %71 = dma.hbm_to_vmem [thread:$0]  %s67_s8, 16, %s69_s23, [#allocation6]  }
  0x33   :  { %93 = dma.hbm_to_vmem [thread:$0]  %s89_s11, 256, %s91_s24, [#allocation9]  }
  0x34   :  { %s3261_s30 = smov 256   ;;  %s3262_s6 = smov 16  }
  0x35   :  { %117 = dma.hbm_to_vmem [thread:$0]  %s110_s27, 8192, %s112_s25, [#allocation12], %s3261_s30, %s3261_s30, %s3262_s6  }
  0x36   :  { %s136_s15 = sshll.u32 %s4001_s10, 4  ;;  %s3263_s7 = smov [#allocation16]   ;;  %s137_s15 = int_to_ptr.hbm [resolvable:$true] %s136_s15 }
  0x37   :  { %s138_s0 = sshll.u32 %s3263_s7, 4  ;;  %s157_s1 = sshll.u32 %s4003_s12, 4  ;;  %s139_s0 = int_to_ptr.vmem [resolvable:$true] %s138_s0  ;;  %s158_s1 = int_to_ptr.hbm [resolvable:$true] %s157_s1 }
  0x38   :  { %141 = dma.hbm_to_vmem [thread:$0]  %s137_s15, 64, %s139_s0, [#allocation15]  }
  0x39   :  { %s3264_s17 = smov [#allocation19]   ;;  %s181_s26 = sshll.u32 %s4005_s14, 4  ;;  %s182_s26 = int_to_ptr.hbm [resolvable:$true] %s181_s26 }
  0x3a   :  { %s159_s22 = sshll.u32 %s3264_s17, 4  ;;  %s4023_s11 = smov 8   ;;  %s160_s22 = int_to_ptr.vmem [resolvable:$true] %s159_s22 }
  0x3b   :  { %s4024_s10 = smov 128   ;;  %s3265_s4 = smov [#allocation22]  }
  0x3c   :  { %165 = dma.hbm_to_vmem [thread:$0]  %s158_s1, 1024, %s160_s22, [#allocation18], %s4024_s10, %s4024_s10, %s4023_s11  }
  0x3d   :  { %s183_s3 = sshll.u32 %s3265_s4, 4  ;;  %s205_s12 = sshll.u32 %s4007_s16, 4  ;;  %s184_s3 = int_to_ptr.vmem [resolvable:$true] %s183_s3  ;;  %s206_s12 = int_to_ptr.hbm [resolvable:$true] %s205_s12 }
  0x3e   :  { %s3266_s24 = smov 1024   ;;  %s3267_s29 = smov 64  }
  0x3f   :  { %189 = dma.hbm_to_vmem [thread:$0]  %s182_s26, 16384, %s184_s3, [#allocation21], %s3266_s24, %s3266_s24, %s3267_s29  }
  0x40   :  { %s3268_s25 = smov [#allocation25]   ;;  %s232_s15 = sshll.u32 %s4010_s19, 4  ;;  %s233_s15 = int_to_ptr.hbm [resolvable:$true] %s232_s15 }
  0x41   :  { %s207_s5 = sshll.u32 %s3268_s25, 4  ;;  %s3269_s7 = smov [#allocation28]   ;;  %s208_s5 = int_to_ptr.vmem [resolvable:$true] %s207_s5 }
  0x42   :  { %213 = dma.hbm_to_vmem [thread:$0]  %s206_s12, 45056, %s208_s5, [#allocation24], %s3261_s30, %s3261_s30, %s3262_s6  }
  0x43   :  { %s234_s0 = sshll.u32 %s3269_s7, 4  ;;  %s235_s0 = int_to_ptr.vmem [resolvable:$true] %s234_s0 }
  0x44   :  { %237 = dma.hbm_to_vmem [thread:$0]  %s233_s15, 16, %s235_s0, [#allocation27]  }
  0x45   :  { %3227 = dma.done.wait [#allocation3], 16  }
  0x46   :  { %3228 = vsyncadd [#allocation3], 4294967280 }
  0x47   :  { %3229 = dma.done.wait [#allocation6], 2064  }
  0x48   :  { %3230 = vsyncadd [#allocation6], 4294965232 }
  0x49   :  { %3231 = dma.done.wait [#allocation9], 288  }
  0x4a   :  { %3232 = vsyncadd [#allocation9], 4294967008 }
  0x4b   :  { %3233 = dma.done.wait [#allocation12], 8224  }
  0x4c   :  { %3234 = vsyncadd [#allocation12], 4294959072 }
  0x4d   :  { %3235 = dma.done.wait [#allocation15], 96  }
  0x4e   :  { %3236 = vsyncadd [#allocation15], 4294967200 }
  0x4f   :  { %3237 = dma.done.wait [#allocation18], 1040  }
  0x50   :  { %3238 = vsyncadd [#allocation18], 4294966256 }
  0x51   :  { %3239 = dma.done.wait [#allocation21], 16400  }
  0x52   :  { %3240 = vsyncadd [#allocation21], 4294950896 }
  0x53   :  { %3241 = dma.done.wait [#allocation24], 45184  }
  0x54   :  { %3242 = vsyncadd [#allocation24], 4294922112 }
  0x55   :  { %3243 = dma.done.wait [#allocation27], 48  }
  0x56   :  { %3244 = vsyncadd [#allocation27], 4294967248  ;;  %v3270_v0 = vmov 0   ;;  %v3271_v1 = vmov 1   ;;  %s4025_s30 = sld [smem:[#allocation40_spill]]  ;;  %v910_v3 = vld [vmem:[%s4000_s9] sm:$0xff] }
  0x57   :  { %2746 = vset.pattern.permute.xlu0 %v3270_v0  ;;  %2747 = vset.pattern.permute.xlu1 %v3271_v1  ;;  %v3272_v4 = vmov 2   ;;  %v642_v5 = vld [vmem:[#allocation5 + $0x78] sm:$0xff]  ;;  %v641_v7 = vld [vmem:[#allocation5 + $0x70] sm:$0xff]  ;;  %v640_v9 = vld [vmem:[#allocation5 + $0x68] sm:$0xff]  ;;  %v3273_v38 = vmov 2102212464  }
  0x58   :  { %2749 = vset.pattern.permute.xlu2 %v3270_v0  ;;  %1025 = vperm.xlu1 %2747, %v910_v3   ;;  %v480_v6 = vld [vmem:[#allocation5 + $0x38] sm:$0xff]  ;;  %v479_v8 = vld [vmem:[#allocation5 + $0x30] sm:$0xff]  ;;  %v478_v10 = vld [vmem:[#allocation5 + $0x28] sm:$0xff]  ;;  %v3274_v40 = vmov 920167782   ;;  %vm709_vm12 = vcmask 1045504  }
  0x59   :  { %655 = vmatpush.msra.mxu2 %v642_v5  ;;  %678 = vmatpush.msra.mxu1 %v480_v6  ;;  %v639_v11 = vld [vmem:[#allocation5 + $0x60] sm:$0xff]  ;;  %v912_v13 = vld [vmem:[%s4000_s9 + $0x10] sm:$0xff]  ;;  %v2778_v15 = vld [vmem:[#allocation2] ss:$0 sm:$0xff]  ;;  %v3275_v43 = vmov 1326507024  }
  0x5a   :  { %v477_v12 = vld [vmem:[#allocation5 + $0x20] sm:$0xff]  ;;  %v638_v16 = vld [vmem:[#allocation5 + $0x58] sm:$0xff]  ;;  %v637_v18 = vld [vmem:[#allocation5 + $0x50] sm:$0xff]  ;;  %v3276_v45 = vmov 683565275   ;;  %vm705_vm15 = vcmask 48128  }
  0x5b   :  { %656 = vmatpush.msra.mxu2 %v641_v7  ;;  %679 = vmatpush.msra.mxu1 %v479_v8  ;;  %v911_v14 = vld [vmem:[%s4000_s9 + $0x8] sm:$0xff]  ;;  %v476_v17 = vld [vmem:[#allocation5 + $0x18] sm:$0xff]  ;;  %v475_v19 = vld [vmem:[#allocation5 + $0x10] sm:$0xff]  ;;  %v3277_v47 = vmov 2475754826   ;;  %s2667_s3 = sshll.u32 %s4011_s20, 4  ;;  %s2668_s3 = int_to_ptr.hbm [resolvable:$true] %s2667_s3 }
  0x5c   :  { %v306_v2 = vld [vmem:[%s4025_s30] sm:$0x3]  ;;  %934 = vperm.xlu2 %2749, %v911_v14   ;;  %v636_v22 = vld [vmem:[#allocation5 + $0x48] sm:$0xff]  ;;  %v635_v25 = vld [vmem:[#allocation5 + $0x40] sm:$0xff]  ;;  %v3278_v50 = vmov 2131351028  }
  0x5d   :  { %310 = vperm.xlu0 %2746, %v306_v2   ;;  %657 = vmatpush.msra.mxu2 %v640_v9  ;;  %v474_v23 = vld [vmem:[#allocation5 + $0x8] sm:$0xff]  ;;  %v473_v26 = vld [vmem:[#allocation5] sm:$0xff] }
  0x5e   :  { %680 = vmatpush.msra.mxu1 %v478_v10 }
  0x5f   :  { %658 = vmatpush.msra.mxu2 %v639_v11 }
  0x60   :  { %2748 = vset.pattern.permute.xlu1 %v3272_v4  ;;  %681 = vmatpush.msra.mxu1 %v477_v12 }
  0x61   :  { %1122 = vperm.xlu1 %2748, %v910_v3   ;;  %659 = vmatpush.msra.mxu2 %v638_v16 }
  0x62   :  { %682 = vmatpush.msra.mxu1 %v476_v17 }
  0x63   :  { %660 = vmatpush.msra.mxu2 %v637_v18 }
  0x64   :  { %683 = vmatpush.msra.mxu1 %v475_v19  ;;  %2750 = vset.pattern.permute.xlu2 %v3271_v1 }
  0x65   :  { %929 = vperm.xlu0 %2746, %v910_v3   ;;  %661 = vmatpush.msra.mxu2 %v636_v22 }
  0x66   :  { %684 = vmatpush.msra.mxu1 %v474_v23  ;;  %1029 = vperm.xlu2 %2750, %v911_v14  }
  0x67   :  { %662 = vmatpush.msra.mxu2 %v635_v25 }
  0x68   :  { %685 = vmatpush.msra.mxu1 %v473_v26 }
  0x69   :  { %2752 = vset.pattern.permute.xlu1 %v3270_v0 }
  0x6a   :  { %939 = vperm.xlu1 %2752, %v912_v13  }
  0x6d   :  { %2751 = vset.pattern.permute.xlu0 %v3272_v4 }
  0x6e   :  { %1126 = vperm.xlu0 %2751, %v911_v14   ;;  %1033 = vperm.xlu2 %2750, %v912_v13  }
  0x72   :  { %2753 = vset.pattern.permute.xlu1 %v3272_v4 }
  0x73   :  { %1130 = vperm.xlu1 %2753, %v912_v13  }
  0x76   :  { %2755 = vset.pattern.permute.xlu0 %v3271_v1  ;;  %2754 = vset.pattern.permute.xlu2 %v3270_v0 }
  0xcf   :  { %v311_v20 = vpop.permute.xlu0 %310 }
  0xd0   :  { %v316_v21 = vmul.f32 %v2778_v15, %v311_v20 }
  0xd2   :  { %v3466_v24 = vmul.f32 6.2831855, %v316_v21 }
  0xd4   :  { %v321_v27 = vand.u32 2139095040, %v3466_v24  ;;  %v318_v30 = vand.u32 2147483647, %v3466_v24  ;;  %vm320_vm13 = vcmp.lt.s32.totalorder %v3466_v24, 0 }
  0xd6   :  { %v322_v28 = vshrl.u32 %v321_v27, 23  ;;  %v325_v32 = vand.u32 8388607, %v318_v30  ;;  %vm3529_vm14 = vcmp.le.f32.partialorder %v318_v30, 0.7853982 }
  0xd8   :  { %v2685_v29 = vadd.s32 4294967169, %v322_v28  ;;  %v326_v36 = vor.u32 8388608, %v325_v32 }
  0xda   :  { %v328_v31 = vadd.s32 1, %v2685_v29  ;;  %v3484_v57 = vshll.u32 %v326_v36, 8 }
  0xdc   :  { %vm329_vm0 = vcmp.gt.s32.totalorder %v328_v31, 0  ;;  %v367_v6 = vand.u32 65535, %v3484_v57  ;;  %v368_v8 = vshrl.u32 %v3484_v57, 16 }
  0xdd   :  { %v330_v33 = vsel %vm329_vm0, %v328_v31, 0 }
  0xde   :  { %v332_v34 = vand.u32 31, %v330_v33  ;;  %v3477_v37 = vshrl.u32 %v330_v33, 5 }
  0xe0   :  { %v3475_v35 = vsub.s32 32, %v332_v34  ;;  %v344_v39 = vshll.u32 %v3273_v38, %v332_v34  ;;  %v347_v41 = vshll.u32 %v3274_v40, %v332_v34  ;;  %v335_v46 = vshll.u32 %v3276_v45, %v332_v34 }
  0xe1   :  { %v338_v49 = vshll.u32 %v3277_v47, %v332_v34  ;;  %v341_v52 = vshll.u32 %v3278_v50, %v332_v34  ;;  %vm353_vm1 = vcmp.lt.s32.totalorder %v3477_v37, 4  ;;  %vm350_vm2 = vcmp.lt.s32.totalorder %v3477_v37, 1 }
  0xe2   :  { %v345_v42 = vshrl.u32 %v3274_v40, %v3475_v35  ;;  %v348_v44 = vshrl.u32 %v3275_v43, %v3475_v35  ;;  %v336_v48 = vshrl.u32 %v3277_v47, %v3475_v35  ;;  %v339_v51 = vshrl.u32 %v3278_v50, %v3475_v35 }
  0xe3   :  { %v342_v53 = vshrl.u32 %v3273_v38, %v3475_v35  ;;  %vm352_vm3 = vcmp.lt.s32.totalorder %v3477_v37, 3  ;;  %vm351_vm4 = vcmp.lt.s32.totalorder %v3477_v37, 2  ;;  %v334_v33 = vshrl.u32 %v3276_v45, %v3475_v35 }
  0xe4   :  { %v346_v54 = vor.u32 %v345_v42, %v344_v39  ;;  %v349_v55 = vor.u32 %v348_v44, %v347_v41  ;;  %v337_v56 = vor.u32 %v336_v48, %v335_v46  ;;  %v340_v58 = vor.u32 %v339_v51, %v338_v49 }
  0xe5   :  { %v343_v59 = vor.u32 %v342_v53, %v341_v52 }
  0xe6   :  { %v359_v60 = vsel %vm353_vm1, %v346_v54, 920167782  ;;  %v363_v61 = vsel %vm353_vm1, %v349_v55, 1326507024  ;;  %v358_v62 = vsel %vm350_vm2, %v337_v56, %v340_v58  ;;  %v354_v41 = vsel %vm350_vm2, %v334_v33, %v337_v56 }
  0xe7   :  { %v360_v63 = vsel %vm352_vm3, %v343_v59, %v359_v60  ;;  %v362_v2 = vsel %vm350_vm2, %v340_v58, %v343_v59  ;;  %v364_v5 = vsel %vm352_vm3, %v346_v54, %v363_v61  ;;  %v355_v29 = vsel %vm353_vm1, %v343_v59, 2102212464 }
  0xe8   :  { %v361_v3 = vsel %vm351_vm4, %v358_v62, %v360_v63  ;;  %v365_v7 = vsel %vm351_vm4, %v362_v2, %v364_v5  ;;  %v356_v42 = vsel %vm352_vm3, %v340_v58, %v355_v29  ;;  %vm643_vm3 = vcmask 523264  }
  0xe9   :  { %v391_v9 = vand.u32 65535, %v361_v3  ;;  %v392_v10 = vshrl.u32 %v361_v3, 16  ;;  %v369_v11 = vand.u32 65535, %v365_v7  ;;  %v370_v12 = vshrl.u32 %v365_v7, 16 }
  0xea   :  { %v357_v45 = vsel %vm351_vm4, %v354_v41, %v356_v42 }
  0xeb   :  { %v394_v13 = vmul.u32 %v392_v10, %v367_v6  ;;  %v395_v14 = vmul.u32 %v391_v9, %v368_v8  ;;  %v372_v15 = vmul.u32 %v370_v12, %v367_v6  ;;  %v373_v16 = vmul.u32 %v369_v11, %v368_v8 }
  0xec   :  { %v393_v17 = vmul.u32 %v391_v9, %v367_v6  ;;  %v371_v19 = vmul.u32 %v369_v11, %v367_v6  ;;  %v396_v21 = vmul.u32 %v392_v10, %v368_v8  ;;  %v374_v22 = vmul.u32 %v370_v12, %v368_v8  ;;  %v697_v11 = vld [vmem:[#allocation10] sm:$0x3f] }
  0xed   :  { %v397_v18 = vshll.u32 %v394_v13, 16  ;;  %v375_v20 = vshll.u32 %v372_v15, 16  ;;  %v399_v23 = vshll.u32 %v395_v14, 16  ;;  %v377_v26 = vshll.u32 %v373_v16, 16  ;;  %2693 = vmatpush.msk.msrb.mxu2 %vm709_vm12, %v697_v11  ;;  %v818_v11 = vld [vmem:[#allocation13 + $0x1e0] sm:$0xff] }
  0xee   :  { %v398_v39 = vshrl.u32 %v394_v13, 16  ;;  %v376_v43 = vshrl.u32 %v372_v15, 16  ;;  %v400_v46 = vshrl.u32 %v395_v14, 16  ;;  %v378_v48 = vshrl.u32 %v373_v16, 16 }
  0xef   :  { %vm401_vm5 = vc.u32 %v393_v17, %v397_v18  ;;  %v403_v25 = vadd.s32 %v397_v18, %v393_v17  ;;  %vm379_vm6 = vc.u32 %v371_v19, %v375_v20  ;;  %v381_v27 = vadd.s32 %v375_v20, %v371_v19  ;;  %v698_v17 = vld [vmem:[#allocation10 + $0x8] sm:$0x3f]  ;;  %v913_v18 = vld [vmem:[%s4000_s9 + $0x18] sm:$0xff] }
  0xf0   :  { %v402_v28 = vsel %vm401_vm5, 1, %v3270_v0  ;;  %v380_v31 = vsel %vm379_vm6, 1, %v3270_v0  ;;  %v411_v53 = vmul.u32 %v3484_v57, %v357_v45  ;;  %2695 = vmatpush.msk.msra.mxu3 %vm709_vm12, %v698_v17  ;;  %1134 = vperm.xlu1 %2753, %v913_v18   ;;  %v817_v17 = vld [vmem:[#allocation13 + $0x1d8] sm:$0xff]  ;;  %v814_v19 = vld [vmem:[#allocation13 + $0x1c0] sm:$0xff] }
  0xf1   :  { %v404_v32 = vadd.s32 %v402_v28, %v396_v21  ;;  %vm405_vm7 = vc.u32 %v403_v25, %v399_v23  ;;  %v382_v34 = vadd.s32 %v380_v31, %v374_v22  ;;  %vm383_vm8 = vc.u32 %v381_v27, %v377_v26  ;;  %v3535_v21 = vld [vmem:[#allocation8] sm:$0x3]  ;;  %1037 = vperm.xlu0 %2755, %v913_v18  }
  0xf2   :  { %v406_v36 = vsel %vm405_vm7, 1, %v3270_v0  ;;  %v384_v38 = vsel %vm383_vm8, 1, %v3270_v0  ;;  %v407_v51 = vadd.s32 %v403_v25, %v399_v23  ;;  %2696 = vmatmul.msk.f32.vlgmr.msra.gmra.mxu3 %vm705_vm15, %v3535_v21  ;;  %944 = vperm.xlu2 %2754, %v913_v18   ;;  %v914_v31 = vld [vmem:[%s4000_s9 + $0x20] sm:$0xff]  ;;  %vm461_vm7 = vweird.f32 %v3466_v24  ;;  %v774_v18 = vld [vmem:[#allocation13 + $0x80] sm:$0xff] }
  0xf3   :  { %v408_v40 = vadd.s32 %v406_v36, %v404_v32  ;;  %v386_v44 = vadd.s32 %v384_v38, %v382_v34  ;;  %v915_v36 = vld [vmem:[%s4000_s9 + $0x28] sm:$0xff]  ;;  %vm1569_vm8 = vcmask 1041409  }
  0xf5   :  { %v409_v47 = vadd.s32 %v408_v40, %v398_v39  ;;  %v387_v35 = vadd.s32 %v386_v44, %v376_v43 }
  0xf7   :  { %v410_v49 = vadd.s32 %v409_v47, %v400_v46  ;;  %v388_v50 = vadd.s32 %v387_v35, %v378_v48 }
  0xf8   :  { %2756 = vset.pattern.permute.xlu1 %v3271_v1 }
  0xf9   :  { %v414_v52 = vadd.s32 1, %v410_v49  ;;  %vm413_vm9 = vc.u32 %v388_v50, %v407_v51  ;;  %v412_v3 = vadd.s32 %v407_v51, %v388_v50  ;;  %1041 = vperm.xlu1 %2756, %v914_v31   ;;  %2758 = vset.pattern.permute.xlu0 %v3270_v0 }
  0xfa   :  { %954 = vperm.xlu0 %2758, %v915_v36   ;;  %949 = vperm.xlu2 %2754, %v914_v31  }
  0xfb   :  { %v415_v54 = vsel %vm413_vm9, %v414_v52, %v410_v49  ;;  %v916_v49 = vld [vmem:[%s4000_s9 + $0x30] sm:$0xff] }
  0xfc   :  { %v416_v55 = vadd.s32 %v415_v54, %v411_v53 }
  0xfe   :  { %v417_v56 = vadd.s32 536870912, %v416_v55 }
 0x100   :  { %v418_v58 = vshrl.u32 %v417_v56, 30 }
 0x101   :  { %1045 = vperm.xlu1 %2756, %v915_v36  }
 0x102   :  { %v419_v59 = vshll.u32 %v418_v58, 30  ;;  %v442_v22 = vsub.s32 4, %v418_v58  ;;  %2757 = vset.pattern.permute.xlu2 %v3272_v4  ;;  %2761 = vset.pattern.permute.xlu0 %v3272_v4 }
 0x103   :  { %1138 = vperm.xlu2 %2757, %v914_v31   ;;  %1146 = vperm.xlu0 %2761, %v916_v49   ;;  %v924_v31 = vld [vmem:[%s4000_s9 + $0x70] sm:$0xff] }
 0x104   :  { %v420_v60 = vsub.s32 %v416_v55, %v419_v59  ;;  %v443_v27 = vsel %vm320_vm13, %v442_v22, %v418_v58  ;;  %v918_v59 = vld [vmem:[%s4000_s9 + $0x40] sm:$0xff]  ;;  %v772_v22 = vld [vmem:[#allocation13 + $0x70] sm:$0xff] }
 0x105   :  { %v445_v32 = vsel %vm3529_vm14, 0, %v443_v27  ;;  %v922_v27 = vld [vmem:[%s4000_s9 + $0x60] sm:$0xff] }
 0x106   :  { %vm421_vm10 = vcmp.lt.s32.totalorder %v420_v60, 0  ;;  %v422_v61 = vsub.s32 0, %v420_v60  ;;  %v462_v40 = vadd.s32 3, %v445_v32  ;;  %v625_v46 = vand.u32 3, %v445_v32 }
 0x108   :  { %v423_v62 = vsel %vm421_vm10, %v422_v61, %v420_v60  ;;  %v463_v47 = vand.u32 3, %v462_v40  ;;  %vm626_vm0 = vcmp.lt.s32.totalorder %v625_v46, 2  ;;  %vm627_vm1 = vcmp.eq.s32.totalorder %v625_v46, 0  ;;  %v3585_v61 = vld [vmem:[%s4000_s9 + $0x58] sm:$0xff]  ;;  %v775_v40 = vld [vmem:[#allocation13 + $0x88] sm:$0xff] }
 0x109   :  { %v424_v63 = vclz %v423_v62  ;;  %vm630_vm2 = vcmp.eq.s32.totalorder %v625_v46, 2  ;;  %2759 = vset.pattern.permute.xlu1 %v3270_v0  ;;  %v919_v62 = vld [vmem:[%s4000_s9 + $0x48] sm:$0xff] }
 0x10a   :  { %vm464_vm4 = vcmp.lt.s32.totalorder %v463_v47, 2  ;;  %vm465_vm5 = vcmp.eq.s32.totalorder %v463_v47, 0  ;;  %vm468_vm6 = vcmp.eq.s32.totalorder %v463_v47, 2  ;;  %959 = vperm.xlu1 %2759, %v916_v49   ;;  %v764_v46 = vld [vmem:[#allocation13 + $0x30] sm:$0xff] }
 0x10b   :  { %v2686_v2 = vadd.s32 4294967294, %v424_v63  ;;  %1142 = vperm.xlu2 %2757, %v915_v36   ;;  %2764 = vset.pattern.permute.xlu0 %v3271_v1  ;;  %v788_v63 = vld [vmem:[#allocation13 + $0xf0] sm:$0xff]  ;;  %v777_v36 = vld [vmem:[#allocation13 + $0x98] sm:$0xff] }
 0x10c   :  { %1057 = vperm.xlu0 %2764, %v918_v59  }
 0x10d   :  { %vm2687_vm11 = vcmp.lt.s32.totalorder %v2686_v2, 0 }
 0x10e   :  { %v427_v37 = vsel %vm2687_vm11, 0, %v2686_v2  ;;  %v786_v2 = vld [vmem:[#allocation13 + $0xe0] sm:$0xff] }
 0x10f   :  { %v428_v5 = vsub.s32 32, %v427_v37  ;;  %v432_v6 = vsub.s32 4294967266, %v427_v37  ;;  %v429_v7 = vshll.u32 %v420_v60, %v427_v37  ;;  %v3577_v60 = vld [vmem:[%s4000_s9 + $0x50] sm:$0xff]  ;;  %v784_v37 = vld [vmem:[#allocation13 + $0xd0] sm:$0xff] }
 0x111   :  { %v430_v8 = vshrl.u32 %v412_v3, %v428_v5  ;;  %v433_v57 = vadd.s32 127, %v432_v6  ;;  %v789_v3 = vld [vmem:[#allocation13 + $0xf8] sm:$0xff]  ;;  %v3598_v5 = vld [vmem:[%s4000_s9 + $0x68] sm:$0xff]  ;;  %v782_v6 = vld [vmem:[#allocation13 + $0xc0] sm:$0xff] }
 0x112   :  { %868 = vmatpush.msra.mxu0 %v789_v3  ;;  %v763_v3 = vld [vmem:[#allocation13 + $0x28] sm:$0xff] }
 0x113   :  { %v431_v9 = vor.u32 %v430_v8, %v429_v7  ;;  %v434_v10 = vshll.u32 %v433_v57, 23  ;;  %2760 = vset.pattern.permute.xlu2 %v3271_v1  ;;  %v780_v7 = vld [vmem:[#allocation13 + $0xb0] sm:$0xff]  ;;  %v787_v57 = vld [vmem:[#allocation13 + $0xe8] sm:$0xff] }
 0x114   :  { %1049 = vperm.xlu2 %2760, %v916_v49   ;;  %2767 = vset.pattern.permute.xlu0 %v3270_v0  ;;  %v820_v8 = vld [vmem:[#allocation13 + $0x1f0] sm:$0xff]  ;;  %v805_v49 = vld [vmem:[#allocation13 + $0x178] sm:$0xff] }
 0x115   :  { %v435_v12 = vor.u32 4788187, %v434_v10  ;;  %v438_v14 = vcvt.s32.f32 %v431_v9  ;;  %979 = vperm.xlu0 %2767, %v3577_v60   ;;  %v821_v9 = vld [vmem:[#allocation13 + $0x1f8] sm:$0xff]  ;;  %848 = vmatpush.msrb.mxu3 %v820_v8  ;;  %v778_v10 = vld [vmem:[#allocation13 + $0xa0] sm:$0xff] }
 0x116   :  { %869 = vmatpush.msra.mxu0 %v787_v57  ;;  %888 = vmatpush.msrb.mxu1 %v821_v9 }
 0x117   :  { %v436_v13 = vand.u32 2147483647, %v435_v12  ;;  %v785_v12 = vld [vmem:[#allocation13 + $0xd8] sm:$0xff]  ;;  %849 = vmatpush.msrb.mxu3 %v818_v11 }
 0x118   :  { %870 = vmatpush.msra.mxu0 %v785_v12  ;;  %v761_v11 = vld [vmem:[#allocation13 + $0x18] sm:$0xff] }
 0x119   :  { %v439_v15 = vmul.f32 %v438_v14, %v436_v13  ;;  %v819_v13 = vld [vmem:[#allocation13 + $0x1e8] sm:$0xff]  ;;  %v776_v14 = vld [vmem:[#allocation13 + $0x90] sm:$0xff] }
 0x11a   :  { %889 = vmatpush.msrb.mxu1 %v819_v13  ;;  %v795_v13 = vld [vmem:[#allocation13 + $0x128] sm:$0xff] }
 0x11b   :  { %v440_v16 = vxor.u32 2147483648, %v439_v15 }
 0x11c   :  { %890 = vmatpush.msrb.mxu1 %v817_v17  ;;  %v793_v17 = vld [vmem:[#allocation13 + $0x118] sm:$0xff] }
 0x11d   :  { %v441_v20 = vsel %vm320_vm13, %v440_v16, %v439_v15  ;;  %2770 = vset.pattern.permute.xlu0 %v3272_v4  ;;  %v816_v15 = vld [vmem:[#allocation13 + $0x1d0] sm:$0xff]  ;;  %v783_v16 = vld [vmem:[#allocation13 + $0xc8] sm:$0xff]  ;;  %vm2658_vm13 = vcmask 41984  }
 0x11e   :  { %v444_v23 = vsel %vm3529_vm14, %v3466_v24, %v441_v20  ;;  %v917_v24 = vld [vmem:[%s4000_s9 + $0x38] sm:$0xff]  ;;  %1166 = vperm.xlu0 %2770, %v3585_v61   ;;  %850 = vmatpush.msrb.mxu3 %v816_v15  ;;  %v781_v20 = vld [vmem:[#allocation13 + $0xb8] sm:$0xff]  ;;  %v792_v15 = vld [vmem:[#allocation13 + $0x110] sm:$0xff] }
 0x11f   :  { %v446_v30 = vmul.f32 %v444_v23, %v444_v23  ;;  %964 = vperm.xlu1 %2759, %v917_v24   ;;  %1053 = vperm.xlu2 %2760, %v917_v24  }
 0x120   :  { %871 = vmatpush.msra.mxu0 %v783_v16  ;;  %851 = vmatpush.msrb.mxu3 %v814_v19  ;;  %v759_v16 = vld [vmem:[#allocation13 + $0x8] sm:$0xff]  ;;  %v790_v19 = vld [vmem:[#allocation13 + $0x100] sm:$0xff] }
 0x121   :  { %v447_v25 = vmul.f32 -0.001358992, %v446_v30  ;;  %v454_v26 = vmul.f32 -0.00019511016, %v446_v30 }
 0x122   :  { %872 = vmatpush.msra.mxu0 %v781_v20 }
 0x123   :  { %v448_v28 = vadd.f32 0.041655596, %v447_v25  ;;  %v455_v29 = vadd.f32 0.008332121, %v454_v26  ;;  %v813_v25 = vld [vmem:[#allocation13 + $0x1b8] sm:$0xff]  ;;  %v770_v26 = vld [vmem:[#allocation13 + $0x60] sm:$0xff] }
 0x125   :  { %v449_v33 = vmul.f32 %v448_v28, %v446_v30  ;;  %v456_v34 = vmul.f32 %v455_v29, %v446_v30  ;;  %v3613_v28 = vpop.permute.xlu1 %1025  ;;  %v3617_v29 = vpop.permute.xlu2 %934 }
 0x126   :  { %2773 = vset.pattern.permute.xlu0 %v3271_v1 }
 0x127   :  { %v450_v38 = vadd.f32 -0.4999988, %v449_v33  ;;  %v457_v39 = vadd.f32 -0.16666654, %v456_v34  ;;  %2762 = vset.pattern.permute.xlu1 %v3272_v4  ;;  %2763 = vset.pattern.permute.xlu2 %v3270_v0  ;;  %v810_v34 = vld [vmem:[#allocation13 + $0x1a0] sm:$0xff] }
 0x128   :  { %1150 = vperm.xlu1 %2762, %v917_v24   ;;  %969 = vperm.xlu2 %2763, %v918_v59   ;;  %v798_v24 = vld [vmem:[#allocation13 + $0x140] sm:$0xff] }
 0x129   :  { %v451_v41 = vmul.f32 %v450_v38, %v446_v30  ;;  %v458_v42 = vmul.f32 %v457_v39, %v446_v30  ;;  %1077 = vperm.xlu0 %2773, %v3598_v5   ;;  %v779_v30 = vld [vmem:[#allocation13 + $0xa8] sm:$0xff]  ;;  %v808_v39 = vld [vmem:[#allocation13 + $0x190] sm:$0xff] }
 0x12a   :  { %873 = vmatpush.msra.mxu0 %v779_v30  ;;  %v811_v38 = vld [vmem:[#allocation13 + $0x1a8] sm:$0xff]  ;;  %v1256_v30 = vld [vmem:[#allocation19 + $0x10] sm:$0xff] }
 0x12b   :  { %v452_v43 = vadd.f32 1.0, %v451_v41  ;;  %v459_v44 = vadd.f32 1.0, %v458_v42  ;;  %v809_v41 = vld [vmem:[#allocation13 + $0x198] sm:$0xff]  ;;  %v766_v42 = vld [vmem:[#allocation13 + $0x40] sm:$0xff] }
 0x12c   :  { %874 = vmatpush.msra.mxu0 %v777_v36 }
 0x12d   :  { %v460_v48 = vmul.f32 %v459_v44, %v444_v23  ;;  %v469_v35 = vxor.u32 2147483648, %v452_v43  ;;  %v812_v23 = vld [vmem:[#allocation13 + $0x1b0] sm:$0xff]  ;;  %v3624_v32 = vpop.permute.xlu1 %1122  ;;  %v3626_v33 = vpop.permute.xlu2 %1029  ;;  %v807_v44 = vld [vmem:[#allocation13 + $0x188] sm:$0xff] }
 0x12e   :  { %852 = vmatpush.msrb.mxu3 %v812_v23  ;;  %875 = vmatpush.msra.mxu0 %v775_v40 }
 0x12f   :  { %v466_v45 = vxor.u32 2147483648, %v460_v48  ;;  %v632_v51 = vsel %vm630_vm2, %v469_v35, %v460_v48  ;;  %v470_v53 = vsel %vm468_vm6, %v469_v35, %v460_v48  ;;  %v804_v35 = vld [vmem:[#allocation13 + $0x170] sm:$0xff] }
 0x130   :  { %1154 = vperm.xlu1 %2762, %v918_v59   ;;  %974 = vperm.xlu2 %2763, %v919_v62   ;;  %v758_v59 = vld [vmem:[#allocation13] sm:$0xff] }
 0x131   :  { %v629_v50 = vsel %vm627_vm1, %v452_v43, %v466_v45  ;;  %v467_v52 = vsel %vm465_vm5, %v452_v43, %v466_v45  ;;  %2776 = vset.pattern.permute.xlu0 %v3270_v0  ;;  %853 = vmatpush.msrb.mxu3 %v810_v34  ;;  %v806_v43 = vld [vmem:[#allocation13 + $0x180] sm:$0xff]  ;;  %v771_v45 = vld [vmem:[#allocation13 + $0x68] sm:$0xff] }
 0x132   :  { %v633_v54 = vsel %vm626_vm0, %v629_v50, %v632_v51  ;;  %v471_v55 = vsel %vm464_vm4, %v467_v52, %v470_v53  ;;  %v762_v50 = vld [vmem:[#allocation13 + $0x20] sm:$0xff]  ;;  %v769_v52 = vld [vmem:[#allocation13 + $0x58] sm:$0xff]  ;;  %v803_v53 = vld [vmem:[#allocation13 + $0x168] sm:$0xff] }
 0x133   :  { %v634_v56 = vsel %vm461_vm7, nan, %v633_v54  ;;  %v472_v58 = vsel %vm461_vm7, nan, %v471_v55  ;;  %854 = vmatpush.msrb.mxu3 %v808_v39  ;;  %v802_v51 = vld [vmem:[#allocation13 + $0x160] sm:$0xff]  ;;  %v760_v54 = vld [vmem:[#allocation13 + $0x10] sm:$0xff] }
 0x134   :  { %2691 = vmatmul.msk.f32.vlgmr.msra.gmra.mxu2 %vm643_vm3, %v634_v56  ;;  %2692 = vmatmul.msk.f32.vlgmr.msra.gmra.mxu1 %vm643_vm3, %v472_v58  ;;  %v800_v55 = vld [vmem:[#allocation13 + $0x150] sm:$0xff]  ;;  %v767_v56 = vld [vmem:[#allocation13 + $0x48] sm:$0xff]  ;;  %v801_v58 = vld [vmem:[#allocation13 + $0x158] sm:$0xff] }
 0x135   :  { %828 = vmatpush.msra.mxu2 %v788_v63  ;;  %v3628_v47 = vpop.permute.xlu1 %939  ;;  %855 = vmatpush.msrb.mxu3 %v806_v43  ;;  %v3631_v48 = vpop.permute.xlu2 %1033  ;;  %v1261_v63 = vld [vmem:[#allocation19 + $0x38] sm:$0xff] }
 0x137   :  { %829 = vmatpush.msra.mxu2 %v786_v2  ;;  %856 = vmatpush.msrb.mxu3 %v804_v35  ;;  %v925_v2 = vld [vmem:[%s4000_s9 + $0x78] sm:$0xff] }
 0x138   :  { %2765 = vset.pattern.permute.xlu1 %v3271_v1  ;;  %2766 = vset.pattern.permute.xlu2 %v3272_v4 }
 0x139   :  { %1061 = vperm.xlu1 %2765, %v919_v62   ;;  %830 = vmatpush.msra.mxu2 %v784_v37  ;;  %v796_v37 = vld [vmem:[#allocation13 + $0x130] sm:$0xff] }
 0x13a   :  { %1158 = vperm.xlu2 %2766, %v919_v62   ;;  %857 = vmatpush.msrb.mxu3 %v802_v51  ;;  %v799_v62 = vld [vmem:[#allocation13 + $0x148] sm:$0xff] }
 0x13b   :  { %831 = vmatpush.msra.mxu2 %v782_v6  ;;  %v3638_v6 = vld [vmem:[#allocation11] sm:$0x3]  ;;  %1004 = vperm.xlu0 %2776, %v925_v2  }
 0x13c   :  { %2694 = vmatmul.msk.f32.vlgmr.msrb.gmra.mxu2 %vm705_vm15, %v3535_v21  ;;  %v815_v21 = vld [vmem:[#allocation13 + $0x1c8] sm:$0xff]  ;;  %858 = vmatpush.msrb.mxu3 %v800_v55  ;;  %v702_v8 = vperm.slane %v3638_v6, 1 }
 0x13d   :  { %832 = vmatpush.msra.mxu2 %v780_v7  ;;  %891 = vmatpush.msrb.mxu1 %v815_v21  ;;  %v1260_v7 = vld [vmem:[#allocation19 + $0x30] sm:$0xff]  ;;  %v791_v21 = vld [vmem:[#allocation13 + $0x108] sm:$0xff] }
 0x13e   :  { %859 = vmatpush.msrb.mxu3 %v798_v24 }
 0x13f   :  { %833 = vmatpush.msra.mxu2 %v778_v10  ;;  %892 = vmatpush.msrb.mxu1 %v813_v25  ;;  %v794_v10 = vld [vmem:[#allocation13 + $0x120] sm:$0xff]  ;;  %v1255_v25 = vld [vmem:[#allocation19 + $0x8] sm:$0xff] }
 0x140   :  { %860 = vmatpush.msrb.mxu3 %v796_v37 }
 0x141   :  { %1065 = vperm.xlu1 %2765, %v3577_v60   ;;  %834 = vmatpush.msra.mxu2 %v776_v14  ;;  %v1259_v14 = vld [vmem:[#allocation19 + $0x28] sm:$0xff] }
 0x142   :  { %1162 = vperm.xlu2 %2766, %v3577_v60   ;;  %893 = vmatpush.msrb.mxu1 %v811_v38  ;;  %v3633_v60 = vpop.permute.xlu1 %1130 }
 0x143   :  { %835 = vmatpush.msra.mxu2 %v774_v18  ;;  %861 = vmatpush.msrb.mxu3 %v794_v10  ;;  %v1258_v18 = vld [vmem:[#allocation19 + $0x20] sm:$0xff] }
 0x144   :  { %894 = vmatpush.msrb.mxu1 %v809_v41  ;;  %2777 = vset.pattern.permute.xlu0 %v3272_v4 }
 0x145   :  { %836 = vmatpush.msra.mxu2 %v772_v22  ;;  %862 = vmatpush.msrb.mxu3 %v792_v15  ;;  %v1257_v22 = vld [vmem:[#allocation19 + $0x18] sm:$0xff] }
 0x146   :  { %895 = vmatpush.msrb.mxu1 %v807_v44 }
 0x147   :  { %837 = vmatpush.msra.mxu2 %v770_v26  ;;  %863 = vmatpush.msrb.mxu3 %v790_v19 }
 0x148   :  { %896 = vmatpush.msrb.mxu1 %v805_v49 }
 0x149   :  { %2768 = vset.pattern.permute.xlu1 %v3270_v0 }
 0x14a   :  { %984 = vperm.xlu1 %2768, %v3585_v61   ;;  %2769 = vset.pattern.permute.xlu2 %v3271_v1 }
 0x14b   :  { %1069 = vperm.xlu2 %2769, %v3585_v61   ;;  %897 = vmatpush.msrb.mxu1 %v803_v53  ;;  %v765_v61 = vld [vmem:[#allocation13 + $0x38] sm:$0xff] }
 0x14c   :  { %v3641_v9 = vpop.permute.xlu2 %944 }
 0x14d   :  { %898 = vmatpush.msrb.mxu1 %v801_v58 }
 0x14f   :  { %899 = vmatpush.msrb.mxu1 %v799_v62 }
 0x152   :  { %989 = vperm.xlu1 %2768, %v922_v27  }
 0x153   :  { %1073 = vperm.xlu2 %2769, %v922_v27  }
 0x154   :  { %v950_v26 = vpop.permute.xlu2 %949 }
 0x15a   :  { %2771 = vset.pattern.permute.xlu1 %v3272_v4 }
 0x15b   :  { %1170 = vperm.xlu1 %2771, %v922_v27   ;;  %2772 = vset.pattern.permute.xlu2 %v3270_v0  ;;  %v768_v0 = vld [vmem:[#allocation13 + $0x50] sm:$0xff]  ;;  %v1254_v27 = vld [vmem:[#allocation19] sm:$0xff] }
 0x15c   :  { %994 = vperm.xlu2 %2772, %v3598_v5   ;;  %838 = vmatpush.msra.mxu2 %v768_v0  ;;  %v930_v0 = vpop.permute.xlu0 %929 }
 0x15d   :  { %v1139_v40 = vpop.permute.xlu2 %1138 }
 0x15e   :  { %839 = vmatpush.msra.mxu2 %v766_v42 }
 0x160   :  { %840 = vmatpush.msra.mxu2 %v764_v46 }
 0x162   :  { %841 = vmatpush.msra.mxu2 %v762_v50  ;;  %v3643_v23 = vpop.permute.xlu1 %1134  ;;  %v3660_v50 = vld [vmem:[#allocation17] ss:$0 sm:$0xff] }
 0x163   :  { %1174 = vperm.xlu1 %2771, %v3598_v5   ;;  %v797_v5 = vld [vmem:[#allocation13 + $0x138] sm:$0xff] }
 0x164   :  { %999 = vperm.xlu2 %2772, %v924_v31   ;;  %842 = vmatpush.msra.mxu2 %v760_v54  ;;  %v1127_v54 = vpop.permute.xlu0 %1126 }
 0x165   :  { %900 = vmatpush.msrb.mxu1 %v797_v5 }
 0x166   :  { %843 = vmatpush.msra.mxu2 %v758_v59 }
 0x167   :  { %901 = vmatpush.msrb.mxu1 %v795_v13 }
 0x168   :  { %1322 = vmatpush.msrb.mxu2 %v1261_v63 }
 0x169   :  { %902 = vmatpush.msrb.mxu1 %v793_v17 }
 0x16a   :  { %1323 = vmatpush.msrb.mxu2 %v1260_v7 }
 0x16b   :  { %2774 = vset.pattern.permute.xlu1 %v3271_v1  ;;  %v773_v1 = vld [vmem:[#allocation13 + $0x78] sm:$0xff]  ;;  %903 = vmatpush.msrb.mxu1 %v791_v21  ;;  %v1042_v34 = vpop.permute.xlu1 %1041 }
 0x16c   :  { %1081 = vperm.xlu1 %2774, %v924_v31   ;;  %876 = vmatpush.msra.mxu0 %v773_v1  ;;  %v701_v1 = vperm.slane %v3638_v6, 0  ;;  %v1038_v37 = vpop.permute.xlu0 %1037 }
 0x16d   :  { %2775 = vset.pattern.permute.xlu2 %v3272_v4  ;;  %1324 = vmatpush.msrb.mxu2 %v1259_v14 }
 0x16e   :  { %1178 = vperm.xlu2 %2775, %v924_v31   ;;  %877 = vmatpush.msra.mxu0 %v771_v45  ;;  %v926_v31 = vld [vmem:[#allocation16] sm:$0x7]  ;;  %v1143_v45 = vpop.permute.xlu2 %1142 }
 0x16f   :  { %1325 = vmatpush.msrb.mxu2 %v1258_v18  ;;  %v3646_v36 = vperm.slane %v926_v31, 1  ;;  %v3648_v38 = vperm.slane %v926_v31, 0  ;;  %v3655_v43 = vperm.slane %v926_v31, 2 }
 0x170   :  { %878 = vmatpush.msra.mxu0 %v769_v52 }
 0x171   :  { %1326 = vmatpush.msrb.mxu2 %v1257_v22  ;;  %v1089_v41 = vmul.f32 %v3646_v36, %v3613_v28  ;;  %v1008_v42 = vmul.f32 %v3648_v38, %v930_v0  ;;  %v1186_v46 = vmul.f32 %v3655_v43, %v3624_v32  ;;  %v1009_v28 = vmul.f32 %v3648_v38, %v3617_v29 }
 0x172   :  { %879 = vmatpush.msra.mxu0 %v767_v56  ;;  %v1090_v52 = vmul.f32 %v3646_v36, %v3626_v33  ;;  %v1187_v58 = vmul.f32 %v3655_v43, %v1127_v54  ;;  %v1091_v29 = vmul.f32 %v3646_v36, %v3631_v48  ;;  %v1188_v63 = vmul.f32 %v3655_v43, %v3633_v60 }
 0x173   :  { %1327 = vmatpush.msrb.mxu2 %v1256_v30  ;;  %v1046_v4 = vpop.permute.xlu1 %1045  ;;  %v1105_v44 = vadd.f32 %v1089_v41, %v1008_v42  ;;  %v1011_v6 = vmul.f32 %v3648_v38, %v3641_v9  ;;  %v1189_v48 = vmul.f32 %v3655_v43, %v3643_v23  ;;  %v1093_v13 = vmul.f32 %v3646_v36, %v1042_v34 }
 0x174   :  { %880 = vmatpush.msra.mxu0 %v765_v61  ;;  %1085 = vperm.xlu1 %2774, %v925_v2   ;;  %v1106_v32 = vadd.f32 %v1090_v52, %v1009_v28  ;;  %v1010_v61 = vmul.f32 %v3648_v38, %v3628_v47  ;;  %v1092_v47 = vmul.f32 %v3646_v36, %v1038_v37  ;;  %v955_v18 = vpop.permute.xlu0 %954 }
 0x175   :  { %v753_v57 = vpop.f32.mrf.mxu3  ;;  %1328 = vmatpush.msrb.mxu2 %v1255_v25  ;;  %v1202_v51 = vadd.f32 %v1186_v46, %v1105_v44  ;;  %v1013_v21 = vmul.f32 %v3648_v38, %v955_v18  ;;  %v1191_v30 = vmul.f32 %v3655_v43, %v1143_v45 }
 0x176   :  { %881 = vmatpush.msra.mxu0 %v763_v3  ;;  %v754_v12 = vadd.f32 %v753_v57, %v702_v8  ;;  %1182 = vperm.xlu2 %2775, %v925_v2   ;;  %v1050_v59 = vpop.permute.xlu2 %1049  ;;  %v1203_v62 = vadd.f32 %v1187_v58, %v1106_v32  ;;  %v1107_v33 = vadd.f32 %v1091_v29, %v1010_v61 }
 0x177   :  { %1329 = vmatpush.msrb.mxu2 %v1254_v27  ;;  %v1222_v56 = vadd.f32 %v3660_v50, %v1202_v51  ;;  %v1108_v57 = vadd.f32 %v1092_v47, %v1011_v6  ;;  %v1095_v0 = vmul.f32 %v3646_v36, %v1050_v59 }
 0x178   :  { %882 = vmatpush.msra.mxu0 %v761_v11  ;;  %v757_v20 = vmax.f32 %v754_v12, 0.0  ;;  %v1223_v2 = vadd.f32 %v3660_v50, %v1203_v62  ;;  %v1204_v5 = vadd.f32 %v1188_v63, %v1107_v33  ;;  %v1012_v11 = vmul.f32 %v3648_v38, %v950_v26 }
 0x179   :  { %v1238_v24 = vmax.f32 %v1222_v56, 0.0  ;;  %v1205_v12 = vadd.f32 %v1189_v48, %v1108_v57 }
 0x17a   :  { %883 = vmatpush.msra.mxu0 %v759_v16  ;;  %864 = vmatmul.f32.vlgmr.msrb.gmra.mxu3 %v757_v20  ;;  %v1239_v7 = vmax.f32 %v1223_v2, 0.0  ;;  %v1224_v60 = vadd.f32 %v3660_v50, %v1204_v5  ;;  %v1109_v15 = vadd.f32 %v1093_v13, %v1012_v11  ;;  %v1190_v16 = vmul.f32 %v3655_v43, %v1139_v40  ;;  %v1769_v13 = vld [vmem:[#allocation25 + $0xe8] sm:$0xff] }
 0x17b   :  { %904 = vmatmul.f32.vlgmr.msrb.gmra.mxu1 %v757_v20  ;;  %v1225_v17 = vadd.f32 %v3660_v50, %v1205_v12  ;;  %v1094_v20 = vmul.f32 %v3646_v36, %v1046_v4  ;;  %v1771_v12 = vld [vmem:[#allocation25 + $0xf8] sm:$0xff] }
 0x17c   :  { %v960_v55 = vpop.permute.xlu1 %959  ;;  %v1240_v14 = vmax.f32 %v1224_v60, 0.0  ;;  %v1206_v19 = vadd.f32 %v1190_v16, %v1109_v15  ;;  %v1147_v41 = vpop.permute.xlu0 %1146 }
 0x17d   :  { %v1241_v22 = vmax.f32 %v1225_v17, 0.0  ;;  %v1110_v25 = vadd.f32 %v1094_v20, %v1013_v21  ;;  %v1014_v34 = vmul.f32 %v3648_v38, %v960_v55  ;;  %v1767_v17 = vld [vmem:[#allocation25 + $0xd8] sm:$0xff] }
 0x17e   :  { %v1054_v8 = vpop.permute.xlu2 %1053  ;;  %v1226_v26 = vadd.f32 %v3660_v50, %v1206_v19 }
 0x17f   :  { %v1207_v31 = vadd.f32 %v1191_v30, %v1110_v25  ;;  %v1111_v4 = vadd.f32 %v1095_v0, %v1014_v34  ;;  %v1096_v45 = vmul.f32 %v3646_v36, %v1054_v8  ;;  %v1765_v30 = vld [vmem:[#allocation25 + $0xc8] sm:$0xff]  ;;  %v1763_v25 = vld [vmem:[#allocation25 + $0xb8] sm:$0xff] }
 0x180   :  { %v1242_v40 = vmax.f32 %v1226_v26, 0.0  ;;  %v1761_v34 = vld [vmem:[#allocation25 + $0xa8] sm:$0xff] }
 0x181   :  { %v1227_v44 = vadd.f32 %v3660_v50, %v1207_v31 }
 0x183   :  { %v1243_v51 = vmax.f32 %v1227_v44, 0.0  ;;  %v1757_v44 = vld [vmem:[#allocation25 + $0x88] sm:$0xff] }
 0x184   :  { %v1058_v55 = vpop.permute.xlu0 %1057 }
 0x185   :  { %v1097_v59 = vmul.f32 %v3646_v36, %v1058_v55 }
 0x186   :  { %v970_v9 = vpop.permute.xlu2 %969 }
 0x187   :  { %v1016_v58 = vmul.f32 %v3648_v38, %v970_v9 }
 0x189   :  { %v1113_v62 = vadd.f32 %v1097_v59, %v1016_v58 }
 0x18c   :  { %v980_v8 = vpop.permute.xlu0 %979 }
 0x18e   :  { %v975_v27 = vpop.permute.xlu2 %974 }
 0x18f   :  { %v1017_v63 = vmul.f32 %v3648_v38, %v975_v27 }
 0x191   :  { %v965_v3 = vpop.permute.xlu1 %964 }
 0x196   :  { %v1159_v46 = vpop.permute.xlu2 %1158 }
 0x197   :  { %v1195_v47 = vmul.f32 %v3655_v43, %v1159_v46  ;;  %v1755_v46 = vld [vmem:[#allocation25 + $0x78] sm:$0xff] }
 0x19a   :  { %v1151_v10 = vpop.permute.xlu1 %1150 }
 0x19e   :  { %v1163_v56 = vpop.permute.xlu2 %1162 }
 0x19f   :  { %v1196_v9 = vmul.f32 %v3655_v43, %v1163_v56 }
 0x1a2   :  { %v1155_v23 = vpop.permute.xlu1 %1154 }
 0x1a3   :  { %v1194_v61 = vmul.f32 %v3655_v43, %v1155_v23  ;;  %v1167_v23 = vpop.permute.xlu0 %1166 }
 0x1a4   :  { %v1197_v27 = vmul.f32 %v3655_v43, %v1167_v23 }
 0x1a5   :  { %v1210_v2 = vadd.f32 %v1194_v61, %v1113_v62  ;;  %v1751_v61 = vld [vmem:[#allocation25 + $0x58] sm:$0xff]  ;;  %v1749_v62 = vld [vmem:[#allocation25 + $0x48] sm:$0xff] }
 0x1a6   :  { %v1070_v5 = vpop.permute.xlu2 %1069 }
 0x1a7   :  { %v1100_v20 = vmul.f32 %v3646_v36, %v1070_v5 }
 0x1ab   :  { %v1062_v42 = vpop.permute.xlu1 %1061 }
 0x1ac   :  { %v1098_v37 = vmul.f32 %v3646_v36, %v1062_v42 }
 0x1ae   :  { %v1114_v6 = vadd.f32 %v1098_v37, %v1017_v63 }
 0x1b0   :  { %v1211_v57 = vadd.f32 %v1195_v47, %v1114_v6  ;;  %v1745_v6 = vld [vmem:[#allocation25 + $0x28] sm:$0xff]  ;;  %v1743_v47 = vld [vmem:[#allocation25 + $0x18] sm:$0xff] }
 0x1b2   :  { %v1231_v16 = vadd.f32 %v3660_v50, %v1211_v57  ;;  %v1741_v57 = vld [vmem:[#allocation25 + $0x8] sm:$0xff] }
 0x1b3   :  { %v1066_v28 = vpop.permute.xlu1 %1065 }
 0x1b4   :  { %v1099_v60 = vmul.f32 %v3646_v36, %v1066_v28  ;;  %v1247_v21 = vmax.f32 %v1231_v16, 0.0  ;;  %v1078_v28 = vpop.permute.xlu0 %1077 }
 0x1b5   :  { %v1102_v55 = vmul.f32 %v3646_v36, %v1078_v28 }
 0x1b7   :  { %v3650_v39 = vpop.f32.mrf.mxu2 }
 0x1bc   :  { %v985_v33 = vpop.permute.xlu1 %984 }
 0x1bd   :  { %v1019_v19 = vmul.f32 %v3648_v38, %v985_v33  ;;  %v1747_v33 = vld [vmem:[#allocation25 + $0x38] sm:$0xff] }
 0x1bf   :  { %v733_v35 = vpop.f32.mrf.mxu2  ;;  %v1116_v26 = vadd.f32 %v1100_v20, %v1019_v19 }
 0x1c0   :  { %v734_v49 = vadd.f32 %v733_v35, %v701_v1  ;;  %v1192_v1 = vmul.f32 %v3655_v43, %v1147_v41  ;;  %v1015_v35 = vmul.f32 %v3648_v38, %v965_v3 }
 0x1c2   :  { %v756_v53 = vmax.f32 %v734_v49, 0.0  ;;  %v1208_v49 = vadd.f32 %v1192_v1, %v1111_v4  ;;  %v1112_v52 = vadd.f32 %v1096_v45, %v1015_v35  ;;  %v1213_v4 = vadd.f32 %v1197_v27, %v1116_v26 }
 0x1c4   :  { %844 = vmatmul.f32.vlgmr.msra.gmra.mxu2 %v756_v53  ;;  %884 = vmatmul.f32.vlgmr.msra.gmra.mxu0 %v756_v53  ;;  %v1193_v53 = vmul.f32 %v3655_v43, %v1151_v10  ;;  %v1228_v54 = vadd.f32 %v3660_v50, %v1208_v49  ;;  %v990_v48 = vpop.permute.xlu1 %989  ;;  %v1018_v10 = vmul.f32 %v3648_v38, %v980_v8 }
 0x1c5   :  { %1916 = vmatpush.msra.mxu2 %v1771_v12  ;;  %v1020_v41 = vmul.f32 %v3648_v38, %v990_v48 }
 0x1c6   :  { %v1209_v32 = vadd.f32 %v1193_v53, %v1112_v52  ;;  %v1115_v15 = vadd.f32 %v1099_v60, %v1018_v10  ;;  %v1005_v10 = vpop.permute.xlu0 %1004 }
 0x1c7   :  { %1917 = vmatpush.msra.mxu2 %v1769_v13  ;;  %v1023_v13 = vmul.f32 %v3648_v38, %v1005_v10  ;;  %v1510_v10 = vld [vmem:[#allocation22 + $0x2c8] sm:$0xff] }
 0x1c8   :  { %v1229_v29 = vadd.f32 %v3660_v50, %v1209_v32  ;;  %v1212_v18 = vadd.f32 %v1196_v9, %v1115_v15  ;;  %v1753_v32 = vld [vmem:[#allocation25 + $0x68] sm:$0xff] }
 0x1c9   :  { %1918 = vmatpush.msra.mxu2 %v1767_v17 }
 0x1ca   :  { %v1245_v3 = vmax.f32 %v1229_v29, 0.0  ;;  %v1232_v31 = vadd.f32 %v3660_v50, %v1212_v18 }
 0x1cb   :  { %1919 = vmatpush.msra.mxu2 %v1765_v30 }
 0x1cc   :  { %2697 = vmatmul.msk.f32.vlgmr.msrb.gmra.mxu2 %vm643_vm3, %v1238_v24  ;;  %v1244_v24 = vmax.f32 %v1228_v54, 0.0  ;;  %v1248_v1 = vmax.f32 %v1232_v31, 0.0 }
 0x1cd   :  { %1920 = vmatpush.msra.mxu2 %v1763_v25 }
 0x1cf   :  { %1921 = vmatpush.msra.mxu2 %v1761_v34 }
 0x1d4   :  { %2698 = vmatmul.msk.f32.gmra.mxu2 %vm643_vm3, %v1239_v7  ;;  %v1230_v7 = vadd.f32 %v3660_v50, %v1210_v2 }
 0x1d6   :  { %v1246_v11 = vmax.f32 %v1230_v7, 0.0 }
 0x1dc   :  { %2699 = vmatmul.msk.f32.gmra.mxu2 %vm643_vm3, %v1240_v14  ;;  %v1074_v14 = vpop.permute.xlu2 %1073 }
 0x1dd   :  { %v1101_v42 = vmul.f32 %v3646_v36, %v1074_v14 }
 0x1df   :  { %v1117_v45 = vadd.f32 %v1101_v42, %v1020_v41 }
 0x1e4   :  { %2700 = vmatmul.msk.f32.gmra.mxu2 %vm643_vm3, %v1241_v22  ;;  %v1171_v22 = vpop.permute.xlu1 %1170  ;;  %v995_v0 = vpop.permute.xlu2 %994 }
 0x1e5   :  { %v1198_v49 = vmul.f32 %v3655_v43, %v1171_v22  ;;  %v1021_v54 = vmul.f32 %v3648_v38, %v995_v0  ;;  %v3745_v22 = vld [vmem:[#allocation14] sm:$0x3] }
 0x1e7   :  { %v1214_v53 = vadd.f32 %v1198_v49, %v1117_v45  ;;  %v1118_v59 = vadd.f32 %v1102_v55, %v1021_v54 }
 0x1ec   :  { %2701 = vmatmul.msk.f32.gmra.mxu2 %vm643_vm3, %v1242_v40  ;;  %v1759_v40 = vld [vmem:[#allocation25 + $0x98] sm:$0xff]  ;;  %v1175_v35 = vpop.permute.xlu1 %1174  ;;  %v1000_v52 = vpop.permute.xlu2 %999 }
 0x1ed   :  { %1922 = vmatpush.msra.mxu2 %v1759_v40  ;;  %v1199_v58 = vmul.f32 %v3655_v43, %v1175_v35  ;;  %v1022_v63 = vmul.f32 %v3648_v38, %v1000_v52 }
 0x1ef   :  { %1923 = vmatpush.msra.mxu2 %v1757_v44  ;;  %v1215_v2 = vadd.f32 %v1199_v58, %v1118_v59 }
 0x1f1   :  { %1924 = vmatpush.msra.mxu2 %v1755_v46  ;;  %v1235_v48 = vadd.f32 %v3660_v50, %v1215_v2  ;;  %v1535_v2 = vld [vmem:[#allocation22 + $0x390] sm:$0xff] }
 0x1f3   :  { %1925 = vmatpush.msra.mxu2 %v1753_v32  ;;  %v1251_v14 = vmax.f32 %v1235_v48, 0.0 }
 0x1f4   :  { %2702 = vmatmul.msk.f32.gmra.mxu2 %vm643_vm3, %v1243_v51  ;;  %v1233_v51 = vadd.f32 %v3660_v50, %v1213_v4  ;;  %v1082_v29 = vpop.permute.xlu1 %1081  ;;  %v1179_v5 = vpop.permute.xlu2 %1178 }
 0x1f5   :  { %1926 = vmatpush.msra.mxu2 %v1751_v61  ;;  %v1103_v37 = vmul.f32 %v3646_v36, %v1082_v29  ;;  %v1200_v8 = vmul.f32 %v3655_v43, %v1179_v5  ;;  %v1542_v61 = vld [vmem:[#allocation22 + $0x3c8] sm:$0xff]  ;;  %v1527_v5 = vld [vmem:[#allocation22 + $0x350] sm:$0xff] }
 0x1f6   :  { %v1249_v56 = vmax.f32 %v1233_v51, 0.0  ;;  %1592 = vmatpush.msrb.mxu0 %v1542_v61  ;;  %v1536_v61 = vld [vmem:[#allocation22 + $0x398] sm:$0xff] }
 0x1f7   :  { %1927 = vmatpush.msra.mxu2 %v1749_v62  ;;  %v1119_v7 = vadd.f32 %v1103_v37, %v1022_v63  ;;  %v1543_v62 = vld [vmem:[#allocation22 + $0x3d0] sm:$0xff]  ;;  %v1534_v63 = vld [vmem:[#allocation22 + $0x388] sm:$0xff]  ;;  %v1525_v37 = vld [vmem:[#allocation22 + $0x340] sm:$0xff] }
 0x1f8   :  { %1612 = vmatpush.msra.mxu1 %v1543_v62  ;;  %1593 = vmatpush.msrb.mxu0 %v1534_v63  ;;  %v1537_v62 = vld [vmem:[#allocation22 + $0x3a0] sm:$0xff] }
 0x1f9   :  { %1928 = vmatpush.msra.mxu2 %v1747_v33  ;;  %v1533_v33 = vld [vmem:[#allocation22 + $0x380] sm:$0xff] }
 0x1fa   :  { %1613 = vmatpush.msra.mxu1 %v1535_v2  ;;  %v1529_v63 = vld [vmem:[#allocation22 + $0x360] sm:$0xff]  ;;  %v1530_v2 = vld [vmem:[#allocation22 + $0x368] sm:$0xff] }
 0x1fb   :  { %1929 = vmatpush.msra.mxu2 %v1745_v6  ;;  %v1517_v6 = vld [vmem:[#allocation22 + $0x300] sm:$0xff] }
 0x1fc   :  { %2703 = vmatmul.msk.f32.gmra.mxu2 %vm643_vm3, %v1244_v24  ;;  %v1234_v24 = vadd.f32 %v3660_v50, %v1214_v53  ;;  %v1086_v60 = vpop.permute.xlu1 %1085  ;;  %v1183_v9 = vpop.permute.xlu2 %1182  ;;  %1614 = vmatpush.msra.mxu1 %v1527_v5  ;;  %v1522_v5 = vld [vmem:[#allocation22 + $0x328] sm:$0xff] }
 0x1fd   :  { %1930 = vmatpush.msra.mxu2 %v1743_v47  ;;  %v1104_v12 = vmul.f32 %v3646_v36, %v1086_v60  ;;  %v1201_v16 = vmul.f32 %v3655_v43, %v1183_v9  ;;  %v824_v36 = vperm.slane %v3745_v22, 0  ;;  %v865_v23 = vpop.f32.mrf.mxu3  ;;  %v1518_v47 = vld [vmem:[#allocation22 + $0x308] sm:$0xff]  ;;  %v1509_v60 = vld [vmem:[#allocation22 + $0x2c0] sm:$0xff]  ;;  %v1503_v9 = vld [vmem:[#allocation22 + $0x290] sm:$0xff] }
 0x1ff   :  { %1931 = vmatpush.msra.mxu2 %v1741_v57  ;;  %v1120_v15 = vadd.f32 %v1104_v12, %v1023_v13  ;;  %v1501_v13 = vld [vmem:[#allocation22 + $0x280] sm:$0xff] }
 0x201   :  { %v1217_v18 = vadd.f32 %v1201_v16, %v1120_v15  ;;  %v1493_v15 = vld [vmem:[#allocation22 + $0x240] sm:$0xff]  ;;  %v1494_v16 = vld [vmem:[#allocation22 + $0x248] sm:$0xff] }
 0x203   :  { %v1237_v20 = vadd.f32 %v3660_v50, %v1217_v18 }
 0x204   :  { %2704 = vmatmul.msk.f32.gmra.mxu2 %vm643_vm3, %v1245_v3  ;;  %v1250_v3 = vmax.f32 %v1234_v24, 0.0  ;;  %v1541_v24 = vld [vmem:[#allocation22 + $0x3c0] sm:$0xff] }
 0x205   :  { %1572 = vmatpush.msra.mxu3 %v1541_v24  ;;  %v1546_v24 = vld [vmem:[#allocation22 + $0x3e8] sm:$0xff] }
 0x207   :  { %1573 = vmatpush.msra.mxu3 %v1533_v33  ;;  %v1528_v33 = vld [vmem:[#allocation22 + $0x358] sm:$0xff] }
 0x209   :  { %1574 = vmatpush.msra.mxu3 %v1525_v37  ;;  %v1520_v37 = vld [vmem:[#allocation22 + $0x318] sm:$0xff] }
 0x20b   :  { %1575 = vmatpush.msra.mxu3 %v1517_v6 }
 0x20c   :  { %2705 = vmatmul.msk.f32.gmra.mxu2 %vm643_vm3, %v1246_v11  ;;  %v1216_v11 = vadd.f32 %v1200_v8, %v1119_v7  ;;  %v1519_v8 = vld [vmem:[#allocation22 + $0x310] sm:$0xff] }
 0x20d   :  { %1615 = vmatpush.msra.mxu1 %v1519_v8  ;;  %1576 = vmatpush.msra.mxu3 %v1509_v60  ;;  %v1514_v8 = vld [vmem:[#allocation22 + $0x2e8] sm:$0xff] }
 0x20e   :  { %v1236_v17 = vadd.f32 %v3660_v50, %v1216_v11  ;;  %v3754_v50 = vld [vmem:[#allocation20] ss:$0 sm:$0xff]  ;;  %v1511_v11 = vld [vmem:[#allocation22 + $0x2d0] sm:$0xff]  ;;  %v1506_v60 = vld [vmem:[#allocation22 + $0x2a8] sm:$0xff] }
 0x20f   :  { %1616 = vmatpush.msra.mxu1 %v1511_v11  ;;  %1577 = vmatpush.msra.mxu3 %v1501_v13  ;;  %v1497_v11 = vld [vmem:[#allocation22 + $0x260] sm:$0xff] }
 0x210   :  { %v1252_v19 = vmax.f32 %v1236_v17, 0.0  ;;  %v1495_v17 = vld [vmem:[#allocation22 + $0x250] sm:$0xff] }
 0x211   :  { %1617 = vmatpush.msra.mxu1 %v1503_v9  ;;  %1578 = vmatpush.msra.mxu3 %v1493_v15  ;;  %v1489_v9 = vld [vmem:[#allocation22 + $0x220] sm:$0xff]  ;;  %v1490_v15 = vld [vmem:[#allocation22 + $0x228] sm:$0xff] }
 0x213   :  { %1618 = vmatpush.msra.mxu1 %v1495_v17  ;;  %v1481_v17 = vld [vmem:[#allocation22 + $0x1e0] sm:$0xff] }
 0x214   :  { %2706 = vmatmul.msk.f32.gmra.mxu2 %vm643_vm3, %v1247_v21  ;;  %v1253_v21 = vmax.f32 %v1237_v20, 0.0  ;;  %v1486_v20 = vld [vmem:[#allocation22 + $0x208] sm:$0xff] }
 0x21c   :  { %2707 = vmatmul.msk.f32.gmra.mxu2 %vm643_vm3, %v1248_v1 }
 0x224   :  { %2708 = vmatmul.msk.f32.gmra.mxu2 %vm643_vm3, %v1249_v56 }
 0x22c   :  { %2709 = vmatmul.msk.f32.gmra.mxu2 %vm643_vm3, %v1250_v3  ;;  %v1526_v3 = vld [vmem:[#allocation22 + $0x348] sm:$0xff] }
 0x22d   :  { %1594 = vmatpush.msrb.mxu0 %v1526_v3  ;;  %v1521_v3 = vld [vmem:[#allocation22 + $0x320] sm:$0xff] }
 0x22f   :  { %1595 = vmatpush.msrb.mxu0 %v1518_v47  ;;  %v1512_v47 = vld [vmem:[#allocation22 + $0x2d8] sm:$0xff] }
 0x231   :  { %1596 = vmatpush.msrb.mxu0 %v1510_v10  ;;  %v1496_v10 = vld [vmem:[#allocation22 + $0x258] sm:$0xff] }
 0x234   :  { %2710 = vmatmul.msk.f32.gmra.mxu2 %vm643_vm3, %v1251_v14  ;;  %v1502_v14 = vld [vmem:[#allocation22 + $0x288] sm:$0xff] }
 0x235   :  { %1597 = vmatpush.msrb.mxu0 %v1502_v14  ;;  %v1488_v14 = vld [vmem:[#allocation22 + $0x218] sm:$0xff] }
 0x237   :  { %1598 = vmatpush.msrb.mxu0 %v1494_v16  ;;  %v1480_v16 = vld [vmem:[#allocation22 + $0x1d8] sm:$0xff] }
 0x239   :  { %1599 = vmatpush.msrb.mxu0 %v1486_v20  ;;  %v1472_v20 = vld [vmem:[#allocation22 + $0x198] sm:$0xff] }
 0x23c   :  { %2711 = vmatmul.msk.f32.gmra.mxu2 %vm643_vm3, %v1252_v19  ;;  %v1485_v19 = vld [vmem:[#allocation22 + $0x200] sm:$0xff] }
 0x23d   :  { %1579 = vmatpush.msra.mxu3 %v1485_v19  ;;  %v1482_v19 = vld [vmem:[#allocation22 + $0x1e8] sm:$0xff] }
 0x244   :  { %2712 = vmatmul.msk.f32.gmra.mxu2 %vm643_vm3, %v1253_v21 }
 0x247   :  { %v845_v38 = vpop.f32.mrf.mxu2 }
 0x248   :  { %v846_v30 = vadd.f32 %v845_v38, %v824_v36  ;;  %v1487_v36 = vld [vmem:[#allocation22 + $0x210] sm:$0xff]  ;;  %v1477_v38 = vld [vmem:[#allocation22 + $0x1c0] sm:$0xff] }
 0x249   :  { %1619 = vmatpush.msra.mxu1 %v1487_v36  ;;  %1580 = vmatpush.msra.mxu3 %v1477_v38  ;;  %v1473_v36 = vld [vmem:[#allocation22 + $0x1a0] sm:$0xff]  ;;  %v1474_v38 = vld [vmem:[#allocation22 + $0x1a8] sm:$0xff] }
 0x24a   :  { %v3749_v25 = vadd.f32 %v865_v23, %v846_v30  ;;  %v1478_v23 = vld [vmem:[#allocation22 + $0x1c8] sm:$0xff]  ;;  %v1479_v30 = vld [vmem:[#allocation22 + $0x1d0] sm:$0xff] }
 0x24b   :  { %1600 = vmatpush.msrb.mxu0 %v1478_v23  ;;  %1620 = vmatpush.msra.mxu1 %v1479_v30  ;;  %v1464_v23 = vld [vmem:[#allocation22 + $0x158] sm:$0xff]  ;;  %v1465_v30 = vld [vmem:[#allocation22 + $0x160] sm:$0xff] }
 0x24c   :  { %v908_v43 = vmax.f32 %v3749_v25, 0.0  ;;  %v2028_v25 = vld [vmem:[#allocation25 + $0x540] sm:$0xff] }
 0x24e   :  { %1932 = vmatmul.f32.vlgmr.msra.gmra.mxu2 %v908_v43 }
 0x24f   :  { %v1331_v26 = vpop.f32.mrf.mxu2 }
 0x250   :  { %v1332_v31 = vadd.f32 %v3754_v50, %v1331_v26  ;;  %v1469_v26 = vld [vmem:[#allocation22 + $0x180] sm:$0xff] }
 0x251   :  { %1581 = vmatpush.msra.mxu3 %v1469_v26  ;;  %v1466_v26 = vld [vmem:[#allocation22 + $0x168] sm:$0xff] }
 0x252   :  { %v1379_v40 = vmax.f32 %v1332_v31, 0.0  ;;  %v1471_v31 = vld [vmem:[#allocation22 + $0x190] sm:$0xff] }
 0x253   :  { %1621 = vmatpush.msra.mxu1 %v1471_v31  ;;  %v1456_v31 = vld [vmem:[#allocation22 + $0x118] sm:$0xff] }
 0x257   :  { %v1334_v27 = vpop.f32.mrf.mxu2 }
 0x258   :  { %v1335_v4 = vadd.f32 %v3754_v50, %v1334_v27  ;;  %v1470_v27 = vld [vmem:[#allocation22 + $0x188] sm:$0xff] }
 0x259   :  { %1601 = vmatpush.msrb.mxu0 %v1470_v27 }
 0x25a   :  { %v1380_v46 = vmax.f32 %v1335_v4, 0.0 }
 0x25f   :  { %v1337_v34 = vpop.f32.mrf.mxu2 }
 0x260   :  { %v1338_v0 = vadd.f32 %v3754_v50, %v1337_v34  ;;  %v1461_v34 = vld [vmem:[#allocation22 + $0x140] sm:$0xff] }
 0x261   :  { %1582 = vmatpush.msra.mxu3 %v1461_v34  ;;  %v1457_v34 = vld [vmem:[#allocation22 + $0x120] sm:$0xff] }
 0x262   :  { %v1381_v41 = vmax.f32 %v1338_v0, 0.0  ;;  %v1462_v0 = vld [vmem:[#allocation22 + $0x148] sm:$0xff] }
 0x263   :  { %1602 = vmatpush.msrb.mxu0 %v1462_v0  ;;  %v1458_v0 = vld [vmem:[#allocation22 + $0x128] sm:$0xff] }
 0x264   :  { %v1395_v42 = vmax.f32 %v1379_v40, %v1381_v41  ;;  %v1463_v40 = vld [vmem:[#allocation22 + $0x150] sm:$0xff]  ;;  %v1453_v41 = vld [vmem:[#allocation22 + $0x100] sm:$0xff] }
 0x265   :  { %1622 = vmatpush.msra.mxu1 %v1463_v40  ;;  %1583 = vmatpush.msra.mxu3 %v1453_v41  ;;  %v1448_v40 = vld [vmem:[#allocation22 + $0xd8] sm:$0xff]  ;;  %v1449_v41 = vld [vmem:[#allocation22 + $0xe0] sm:$0xff] }
 0x267   :  { %v1340_v1 = vpop.f32.mrf.mxu2 }
 0x268   :  { %v1341_v44 = vadd.f32 %v3754_v50, %v1340_v1  ;;  %v1455_v1 = vld [vmem:[#allocation22 + $0x110] sm:$0xff] }
 0x269   :  { %1623 = vmatpush.msra.mxu1 %v1455_v1  ;;  %v1440_v1 = vld [vmem:[#allocation22 + $0x98] sm:$0xff] }
 0x26a   :  { %v1382_v35 = vmax.f32 %v1341_v44, 0.0  ;;  %v1445_v44 = vld [vmem:[#allocation22 + $0xc0] sm:$0xff] }
 0x26b   :  { %1584 = vmatpush.msra.mxu3 %v1445_v44  ;;  %v1441_v44 = vld [vmem:[#allocation22 + $0xa0] sm:$0xff] }
 0x26c   :  { %v1396_v45 = vmax.f32 %v1380_v46, %v1382_v35  ;;  %v1446_v46 = vld [vmem:[#allocation22 + $0xc8] sm:$0xff]  ;;  %v1447_v35 = vld [vmem:[#allocation22 + $0xd0] sm:$0xff] }
 0x26d   :  { %1624 = vmatpush.msra.mxu1 %v1447_v35  ;;  %v1432_v35 = vld [vmem:[#allocation22 + $0x58] sm:$0xff] }
 0x26f   :  { %v1343_v49 = vpop.f32.mrf.mxu2 }
 0x270   :  { %v1344_v51 = vadd.f32 %v3754_v50, %v1343_v49  ;;  %v1438_v49 = vld [vmem:[#allocation22 + $0x88] sm:$0xff] }
 0x272   :  { %v1383_v28 = vmax.f32 %v1344_v51, 0.0  ;;  %v1439_v51 = vld [vmem:[#allocation22 + $0x90] sm:$0xff] }
 0x273   :  { %1625 = vmatpush.msra.mxu1 %v1439_v51  ;;  %v1424_v51 = vld [vmem:[#allocation22 + $0x18] sm:$0xff] }
 0x274   :  { %v1397_v52 = vmax.f32 %v1395_v42, %v1383_v28  ;;  %v1454_v42 = vld [vmem:[#allocation22 + $0x108] sm:$0xff]  ;;  %v1429_v28 = vld [vmem:[#allocation22 + $0x40] sm:$0xff] }
 0x275   :  { %1603 = vmatpush.msrb.mxu0 %v1454_v42  ;;  %v1450_v42 = vld [vmem:[#allocation22 + $0xe8] sm:$0xff] }
 0x277   :  { %v1346_v53 = vpop.f32.mrf.mxu2  ;;  %1604 = vmatpush.msrb.mxu0 %v1446_v46  ;;  %v1442_v46 = vld [vmem:[#allocation22 + $0xa8] sm:$0xff] }
 0x278   :  { %v1347_v54 = vadd.f32 %v3754_v50, %v1346_v53  ;;  %v1431_v53 = vld [vmem:[#allocation22 + $0x50] sm:$0xff] }
 0x279   :  { %1605 = vmatpush.msrb.mxu0 %v1438_v49  ;;  %1626 = vmatpush.msra.mxu1 %v1431_v53  ;;  %v1434_v49 = vld [vmem:[#allocation22 + $0x68] sm:$0xff] }
 0x27a   :  { %v1384_v55 = vmax.f32 %v1347_v54, 0.0  ;;  %v1421_v54 = vld [vmem:[#allocation22] sm:$0xff] }
 0x27c   :  { %v1398_v56 = vmax.f32 %v1396_v45, %v1384_v55  ;;  %v1437_v45 = vld [vmem:[#allocation22 + $0x80] sm:$0xff]  ;;  %v1422_v55 = vld [vmem:[#allocation22 + $0x8] sm:$0xff] }
 0x27d   :  { %1585 = vmatpush.msra.mxu3 %v1437_v45  ;;  %v1433_v45 = vld [vmem:[#allocation22 + $0x60] sm:$0xff] }
 0x27f   :  { %v1349_v32 = vpop.f32.mrf.mxu2  ;;  %1586 = vmatpush.msra.mxu3 %v1429_v28  ;;  %v1425_v28 = vld [vmem:[#allocation22 + $0x20] sm:$0xff] }
 0x280   :  { %v1350_v58 = vadd.f32 %v3754_v50, %v1349_v32  ;;  %v1423_v32 = vld [vmem:[#allocation22 + $0x10] sm:$0xff] }
 0x281   :  { %1587 = vmatpush.msra.mxu3 %v1421_v54  ;;  %1627 = vmatpush.msra.mxu1 %v1423_v32 }
 0x282   :  { %v1385_v59 = vmax.f32 %v1350_v58, 0.0  ;;  %v1544_v58 = vld [vmem:[#allocation22 + $0x3d8] sm:$0xff] }
 0x283   :  { %1632 = vmatpush.msrb.mxu3 %v1544_v58  ;;  %1672 = vmatpush.msrb.mxu1 %v1546_v24 }
 0x284   :  { %v1399_v29 = vmax.f32 %v1397_v52, %v1385_v59  ;;  %v1430_v52 = vld [vmem:[#allocation22 + $0x48] sm:$0xff]  ;;  %v1545_v59 = vld [vmem:[#allocation22 + $0x3e0] sm:$0xff] }
 0x285   :  { %1606 = vmatpush.msrb.mxu0 %v1430_v52  ;;  %1633 = vmatpush.msrb.mxu3 %v1536_v61  ;;  %v1426_v52 = vld [vmem:[#allocation22 + $0x28] sm:$0xff] }
 0x287   :  { %v1352_v7 = vpop.f32.mrf.mxu2  ;;  %1607 = vmatpush.msrb.mxu0 %v1422_v55  ;;  %1634 = vmatpush.msrb.mxu3 %v1528_v33 }
 0x288   :  { %v1353_v48 = vadd.f32 %v3754_v50, %v1352_v7  ;;  %v1513_v7 = vld [vmem:[#allocation22 + $0x2e0] sm:$0xff] }
 0x289   :  { %1652 = vmatpush.msra.mxu0 %v1545_v59  ;;  %1635 = vmatpush.msrb.mxu3 %v1520_v37 }
 0x28a   :  { %v1386_v57 = vmax.f32 %v1353_v48, 0.0  ;;  %v1504_v48 = vld [vmem:[#allocation22 + $0x298] sm:$0xff] }
 0x28b   :  { %1653 = vmatpush.msra.mxu0 %v1537_v62  ;;  %1636 = vmatpush.msrb.mxu3 %v1512_v47 }
 0x28c   :  { %v1400_v12 = vmax.f32 %v1398_v56, %v1386_v57  ;;  %v1505_v57 = vld [vmem:[#allocation22 + $0x2a0] sm:$0xff] }
 0x28d   :  { %1654 = vmatpush.msra.mxu0 %v1529_v63  ;;  %1637 = vmatpush.msrb.mxu3 %v1504_v48 }
 0x28e   :  { %v3764_v18 = vmax.f32 %v1399_v29, %v1400_v12  ;;  %v1538_v29 = vld [vmem:[#allocation22 + $0x3a8] sm:$0xff] }
 0x28f   :  { %v3766_v21 = vpop.f32.mrf.mxu2  ;;  %1673 = vmatpush.msrb.mxu1 %v1538_v29  ;;  %1655 = vmatpush.msra.mxu0 %v1521_v3  ;;  %v1498_v12 = vld [vmem:[#allocation22 + $0x268] sm:$0xff] }
 0x290   :  { %1638 = vmatpush.msrb.mxu3 %v1496_v10  ;;  %v1356_v32 = vadd.f32 %v3754_v50, %v3766_v21  ;;  %v1402_v29 = vrot.slane %v3764_v18, 4 }
 0x291   :  { %1674 = vmatpush.msrb.mxu1 %v1530_v2  ;;  %1656 = vmatpush.msra.mxu0 %v1513_v7 }
 0x292   :  { %1639 = vmatpush.msrb.mxu3 %v1488_v14  ;;  %v1387_v33 = vmax.f32 %v1356_v32, 0.0  ;;  %v1403_v47 = vmax.f32 %v3764_v18, %v1402_v29  ;;  %v1548_v18 = vld [vmem:[#allocation22 + $0x3f8] sm:$0xff] }
 0x293   :  { %1675 = vmatpush.msrb.mxu1 %v1522_v5  ;;  %1657 = vmatpush.msra.mxu0 %v1505_v57  ;;  %v1484_v32 = vld [vmem:[#allocation22 + $0x1f8] sm:$0xff] }
 0x294   :  { %1640 = vmatpush.msrb.mxu3 %v1480_v16  ;;  %v1404_v10 = vrot.slane %v1403_v47, 2  ;;  %v1814_v29 = vld [vmem:[#allocation25 + $0x250] sm:$0xff] }
 0x295   :  { %1676 = vmatpush.msrb.mxu1 %v1514_v8  ;;  %1658 = vmatpush.msra.mxu0 %v1497_v11 }
 0x296   :  { %1641 = vmatpush.msrb.mxu3 %v1472_v20 }
 0x297   :  { %v3768_v4 = vpop.f32.mrf.mxu2  ;;  %1677 = vmatpush.msrb.mxu1 %v1506_v60  ;;  %1659 = vmatpush.msra.mxu0 %v1489_v9 }
 0x298   :  { %1642 = vmatpush.msrb.mxu3 %v1464_v23  ;;  %v1359_v58 = vadd.f32 %v3754_v50, %v3768_v4  ;;  %v1539_v23 = vld [vmem:[#allocation22 + $0x3b0] sm:$0xff] }
 0x299   :  { %1678 = vmatpush.msrb.mxu1 %v1498_v12  ;;  %1660 = vmatpush.msra.mxu0 %v1481_v17 }
 0x29a   :  { %1643 = vmatpush.msrb.mxu3 %v1456_v31  ;;  %v1388_v63 = vmax.f32 %v1359_v58, 0.0  ;;  %v1532_v31 = vld [vmem:[#allocation22 + $0x378] sm:$0xff] }
 0x29b   :  { %1679 = vmatpush.msrb.mxu1 %v1490_v15  ;;  %1661 = vmatpush.msra.mxu0 %v1473_v36  ;;  %v1818_v58 = vld [vmem:[#allocation25 + $0x270] sm:$0xff] }
 0x29c   :  { %1644 = vmatpush.msrb.mxu3 %v1448_v40  ;;  %v1524_v40 = vld [vmem:[#allocation22 + $0x338] sm:$0xff] }
 0x29d   :  { %1680 = vmatpush.msrb.mxu1 %v1482_v19  ;;  %1662 = vmatpush.msra.mxu0 %v1465_v30  ;;  %v1540_v30 = vld [vmem:[#allocation22 + $0x3b8] sm:$0xff] }
 0x29e   :  { %1645 = vmatpush.msrb.mxu3 %v1440_v1  ;;  %v1516_v1 = vld [vmem:[#allocation22 + $0x2f8] sm:$0xff] }
 0x29f   :  { %v3770_v56 = vpop.f32.mrf.mxu2  ;;  %1681 = vmatpush.msrb.mxu1 %v1474_v38  ;;  %1663 = vmatpush.msra.mxu0 %v1457_v34  ;;  %v1834_v38 = vld [vmem:[#allocation25 + $0x2f0] sm:$0xff] }
 0x2a0   :  { %1646 = vmatpush.msrb.mxu3 %v1432_v35  ;;  %v1362_v54 = vadd.f32 %v3754_v50, %v3770_v56  ;;  %v1830_v34 = vld [vmem:[#allocation25 + $0x2d0] sm:$0xff] }
 0x2a1   :  { %1682 = vmatpush.msrb.mxu1 %v1466_v26  ;;  %1664 = vmatpush.msra.mxu0 %v1449_v41  ;;  %v1832_v26 = vld [vmem:[#allocation25 + $0x2e0] sm:$0xff]  ;;  %v1508_v35 = vld [vmem:[#allocation22 + $0x2b8] sm:$0xff] }
 0x2a2   :  { %1647 = vmatpush.msrb.mxu3 %v1424_v51  ;;  %v1389_v61 = vmax.f32 %v1362_v54, 0.0  ;;  %v1828_v41 = vld [vmem:[#allocation25 + $0x2c0] sm:$0xff]  ;;  %v1500_v51 = vld [vmem:[#allocation22 + $0x278] sm:$0xff] }
 0x2a3   :  { %1683 = vmatpush.msrb.mxu1 %v1458_v0  ;;  %1665 = vmatpush.msra.mxu0 %v1441_v44  ;;  %v1523_v0 = vld [vmem:[#allocation22 + $0x330] sm:$0xff]  ;;  %v1826_v44 = vld [vmem:[#allocation25 + $0x2b0] sm:$0xff]  ;;  %v1820_v54 = vld [vmem:[#allocation25 + $0x280] sm:$0xff] }
 0x2a4   :  { %v1408_v21 = vmax.f32 %v1387_v33, %v1389_v61  ;;  %v1816_v61 = vld [vmem:[#allocation25 + $0x260] sm:$0xff]  ;;  %v1459_v33 = vld [vmem:[#allocation22 + $0x130] sm:$0xff] }
 0x2a5   :  { %1684 = vmatpush.msrb.mxu1 %v1450_v42  ;;  %1666 = vmatpush.msra.mxu0 %v1433_v45  ;;  %v1515_v42 = vld [vmem:[#allocation22 + $0x2f0] sm:$0xff]  ;;  %v1824_v45 = vld [vmem:[#allocation25 + $0x2a0] sm:$0xff] }
 0x2a7   :  { %v3772_v6 = vpop.f32.mrf.mxu2  ;;  %1685 = vmatpush.msrb.mxu1 %v1442_v46  ;;  %1667 = vmatpush.msra.mxu0 %v1425_v28  ;;  %v1507_v46 = vld [vmem:[#allocation22 + $0x2b0] sm:$0xff]  ;;  %v1822_v28 = vld [vmem:[#allocation25 + $0x290] sm:$0xff] }
 0x2a8   :  { %v1365_v55 = vadd.f32 %v3754_v50, %v3772_v6 }
 0x2a9   :  { %1686 = vmatpush.msrb.mxu1 %v1434_v49  ;;  %v1499_v49 = vld [vmem:[#allocation22 + $0x270] sm:$0xff] }
 0x2aa   :  { %v1390_v62 = vmax.f32 %v1365_v55, 0.0  ;;  %v1483_v55 = vld [vmem:[#allocation22 + $0x1f0] sm:$0xff] }
 0x2ab   :  { %1687 = vmatpush.msrb.mxu1 %v1426_v52  ;;  %v1491_v52 = vld [vmem:[#allocation22 + $0x230] sm:$0xff] }
 0x2ac   :  { %v1409_v5 = vmax.f32 %v1388_v63, %v1390_v62  ;;  %v1467_v62 = vld [vmem:[#allocation22 + $0x170] sm:$0xff]  ;;  %v1460_v63 = vld [vmem:[#allocation22 + $0x138] sm:$0xff] }
 0x2af   :  { %v3774_v13 = vpop.f32.mrf.mxu2 }
 0x2b0   :  { %v1368_v59 = vadd.f32 %v3754_v50, %v3774_v13  ;;  %v1405_v13 = vmax.f32 %v1403_v47, %v1404_v10  ;;  %v1443_v47 = vld [vmem:[#allocation22 + $0xb0] sm:$0xff] }
 0x2b2   :  { %v1391_v2 = vmax.f32 %v1368_v59, 0.0  ;;  %v1406_v15 = vrot.slane %v1405_v13, 1  ;;  %v1475_v59 = vld [vmem:[#allocation22 + $0x1b0] sm:$0xff] }
 0x2b4   :  { %v1410_v7 = vmax.f32 %v1408_v21, %v1391_v2  ;;  %v1407_v19 = vmax.f32 %v1405_v13, %v1406_v15  ;;  %v1812_v2 = vld [vmem:[#allocation25 + $0x240] sm:$0xff]  ;;  %v1452_v21 = vld [vmem:[#allocation22 + $0xf8] sm:$0xff]  ;;  %v1835_v13 = vld [vmem:[#allocation25 + $0x2f8] sm:$0xff] }
 0x2b5   :  { %v1802_v15 = vld [vmem:[#allocation25 + $0x1f0] sm:$0xff] }
 0x2b7   :  { %v1370_v27 = vpop.f32.mrf.mxu2 }
 0x2b8   :  { %v1371_v24 = vadd.f32 %v3754_v50, %v1370_v27  ;;  %v1531_v27 = vld [vmem:[#allocation22 + $0x370] sm:$0xff] }
 0x2ba   :  { %v1392_v37 = vmax.f32 %v1371_v24, 0.0  ;;  %v1476_v24 = vld [vmem:[#allocation22 + $0x1b8] sm:$0xff] }
 0x2bc   :  { %v1411_v8 = vmax.f32 %v1409_v5, %v1392_v37  ;;  %v1451_v37 = vld [vmem:[#allocation22 + $0xf0] sm:$0xff]  ;;  %v1810_v5 = vld [vmem:[#allocation25 + $0x230] sm:$0xff] }
 0x2bf   :  { %v1373_v53 = vpop.f32.mrf.mxu2 }
 0x2c0   :  { %v1374_v56 = vadd.f32 %v3754_v50, %v1373_v53  ;;  %v1492_v53 = vld [vmem:[#allocation22 + $0x238] sm:$0xff] }
 0x2c2   :  { %v1393_v6 = vmax.f32 %v1374_v56, 0.0  ;;  %v1468_v56 = vld [vmem:[#allocation22 + $0x178] sm:$0xff] }
 0x2c4   :  { %v1412_v57 = vmax.f32 %v1410_v7, %v1393_v6  ;;  %v1444_v7 = vld [vmem:[#allocation22 + $0xb8] sm:$0xff] }
 0x2c7   :  { %v1376_v3 = vpop.f32.mrf.mxu2 }
 0x2c8   :  { %v1377_v4 = vadd.f32 %v3754_v50, %v1376_v3  ;;  %v1547_v50 = vld [vmem:[#allocation22 + $0x3f0] sm:$0xff]  ;;  %v687_v3 = vpop.f32.mrf.mxu1 }
 0x2c9   :  { %v688_v6 = vadd.f32 %v687_v3, %v3650_v39  ;;  %v1428_v39 = vld [vmem:[#allocation22 + $0x38] sm:$0xff] }
 0x2ca   :  { %v1394_v48 = vmax.f32 %v1377_v4, 0.0  ;;  %v2780_v4 = vld [vmem:[#allocation7] ss:$0 sm:$0xff]  ;;  %v1778_v3 = vld [vmem:[#allocation25 + $0x130] sm:$0xff] }
 0x2cb   :  { %v3800_v10 = vadd.f32 %v2780_v4, %v688_v6  ;;  %v1744_v4 = vld [vmem:[#allocation25 + $0x20] sm:$0xff] }
 0x2cc   :  { %v1413_v60 = vmax.f32 %v1411_v8, %v1394_v48  ;;  %v1808_v8 = vld [vmem:[#allocation25 + $0x220] sm:$0xff]  ;;  %v1435_v48 = vld [vmem:[#allocation22 + $0x70] sm:$0xff] }
 0x2ce   :  { %v1414_v11 = vmax.f32 %v1412_v57, %v1413_v60  ;;  %v1436_v57 = vld [vmem:[#allocation22 + $0x78] sm:$0xff] }
 0x2cf   :  { %v1806_v60 = vld [vmem:[#allocation25 + $0x210] sm:$0xff] }
 0x2d0   :  { %v1415_v12 = vrot.slane %v1414_v11, 4  ;;  %v905_v6 = vpop.f32.mrf.mxu1 }
 0x2d2   :  { %v1416_v14 = vmax.f32 %v1414_v11, %v1415_v12  ;;  %v1427_v11 = vld [vmem:[#allocation22 + $0x30] sm:$0xff]  ;;  %v1804_v12 = vld [vmem:[#allocation25 + $0x200] sm:$0xff] }
 0x2d4   :  { %v1417_v9 = vrot.slane %v1416_v14, 2 }
 0x2d6   :  { %v1418_v16 = vmax.f32 %v1416_v14, %v1417_v9  ;;  %v695_v14 = vmax.f32 %v3800_v10, 0.0  ;;  %v1770_v9 = vld [vmem:[#allocation25 + $0xf0] sm:$0xff]  ;;  %v1797_v10 = vld [vmem:[#allocation25 + $0x1c8] sm:$0xff] }
 0x2d8   :  { %v1419_v17 = vrot.slane %v1418_v16, 1 }
 0x2da   :  { %v1420_v20 = vmax.f32 %v1418_v16, %v1419_v17  ;;  %v1833_v16 = vld [vmem:[#allocation25 + $0x2e8] sm:$0xff]  ;;  %v1768_v17 = vld [vmem:[#allocation25 + $0xe0] sm:$0xff] }
 0x2dc   :  { %v3791_v36 = vsel %vm1569_vm8, %v1420_v20, %v1407_v19  ;;  %v1800_v19 = vld [vmem:[#allocation25 + $0x1e0] sm:$0xff]  ;;  %v1831_v20 = vld [vmem:[#allocation25 + $0x2d8] sm:$0xff] }
 0x2dd   :  { %1588 = vmatmul.f32.vlgmr.msra.gmra.mxu3 %v3791_v36  ;;  %1608 = vmatmul.f32.vlgmr.msrb.gmra.mxu0 %v3791_v36 }
 0x2de   :  { %1628 = vmatmul.f32.vlgmr.msra.gmra.mxu1 %v3791_v36  ;;  %1692 = vmatpush.msra.mxu3 %v1547_v50  ;;  %v1766_v50 = vld [vmem:[#allocation25 + $0xd0] sm:$0xff] }
 0x2df   :  { %1712 = vmatpush.msrb.mxu0 %v1548_v18  ;;  %1836 = vmatpush.msra.mxu1 %v1834_v38  ;;  %v1798_v18 = vld [vmem:[#allocation25 + $0x1d0] sm:$0xff]  ;;  %v1829_v38 = vld [vmem:[#allocation25 + $0x2c8] sm:$0xff] }
 0x2e0   :  { %1693 = vmatpush.msra.mxu3 %v1539_v23  ;;  %v1764_v23 = vld [vmem:[#allocation25 + $0xc0] sm:$0xff] }
 0x2e1   :  { %1713 = vmatpush.msrb.mxu0 %v1540_v30  ;;  %1837 = vmatpush.msra.mxu1 %v1832_v26  ;;  %v1796_v30 = vld [vmem:[#allocation25 + $0x1c0] sm:$0xff]  ;;  %v1762_v26 = vld [vmem:[#allocation25 + $0xb0] sm:$0xff] }
 0x2e2   :  { %1694 = vmatpush.msra.mxu3 %v1531_v27  ;;  %v1794_v27 = vld [vmem:[#allocation25 + $0x1b0] sm:$0xff] }
 0x2e3   :  { %1714 = vmatpush.msrb.mxu0 %v1532_v31  ;;  %1838 = vmatpush.msra.mxu1 %v1830_v34  ;;  %v1825_v31 = vld [vmem:[#allocation25 + $0x2a8] sm:$0xff]  ;;  %v1760_v34 = vld [vmem:[#allocation25 + $0xa0] sm:$0xff] }
 0x2e4   :  { %1695 = vmatpush.msra.mxu3 %v1523_v0  ;;  %v1792_v0 = vld [vmem:[#allocation25 + $0x1a0] sm:$0xff] }
 0x2e5   :  { %1715 = vmatpush.msrb.mxu0 %v1524_v40  ;;  %1839 = vmatpush.msra.mxu1 %v1828_v41  ;;  %v1823_v40 = vld [vmem:[#allocation25 + $0x298] sm:$0xff]  ;;  %v1758_v41 = vld [vmem:[#allocation25 + $0x90] sm:$0xff] }
 0x2e6   :  { %1648 = vmatmul.f32.vlgmr.msrb.gmra.mxu3 %v3791_v36  ;;  %1668 = vmatmul.f32.vlgmr.msra.gmra.mxu0 %v3791_v36 }
 0x2e7   :  { %1688 = vmatmul.f32.vlgmr.msrb.gmra.mxu1 %v3791_v36  ;;  %1696 = vmatpush.msra.mxu3 %v1515_v42  ;;  %v1790_v42 = vld [vmem:[#allocation25 + $0x190] sm:$0xff] }
 0x2e8   :  { %1716 = vmatpush.msrb.mxu0 %v1516_v1  ;;  %1840 = vmatpush.msra.mxu1 %v1826_v44  ;;  %v1821_v1 = vld [vmem:[#allocation25 + $0x288] sm:$0xff]  ;;  %v1756_v44 = vld [vmem:[#allocation25 + $0x80] sm:$0xff] }
 0x2e9   :  { %1697 = vmatpush.msra.mxu3 %v1507_v46  ;;  %v1788_v46 = vld [vmem:[#allocation25 + $0x180] sm:$0xff] }
 0x2ea   :  { %1717 = vmatpush.msrb.mxu0 %v1508_v35  ;;  %1841 = vmatpush.msra.mxu1 %v1824_v45  ;;  %v2050_v35 = vld [vmem:[#allocation25 + $0x5f0] sm:$0xff]  ;;  %v1819_v45 = vld [vmem:[#allocation25 + $0x278] sm:$0xff] }
 0x2eb   :  { %1698 = vmatpush.msra.mxu3 %v1499_v49  ;;  %v1754_v49 = vld [vmem:[#allocation25 + $0x70] sm:$0xff]  ;;  %2252 = vmatpush.msrb.mxu2 %v2050_v35 }
 0x2ec   :  { %1718 = vmatpush.msrb.mxu0 %v1500_v51  ;;  %1842 = vmatpush.msra.mxu1 %v1822_v28  ;;  %v1786_v51 = vld [vmem:[#allocation25 + $0x170] sm:$0xff]  ;;  %v2048_v28 = vld [vmem:[#allocation25 + $0x5e0] sm:$0xff] }
 0x2ed   :  { %1699 = vmatpush.msra.mxu3 %v1491_v52  ;;  %v1817_v52 = vld [vmem:[#allocation25 + $0x268] sm:$0xff]  ;;  %2253 = vmatpush.msrb.mxu2 %v2048_v28  ;;  %v2006_v35 = vld [vmem:[#allocation25 + $0x490] sm:$0xff]  ;;  %v2004_v28 = vld [vmem:[#allocation25 + $0x480] sm:$0xff] }
 0x2ee   :  { %1719 = vmatpush.msrb.mxu0 %v1492_v53  ;;  %1843 = vmatpush.msra.mxu1 %v1820_v54  ;;  %v1752_v53 = vld [vmem:[#allocation25 + $0x60] sm:$0xff] }
 0x2ef   :  { %1700 = vmatpush.msra.mxu3 %v1483_v55  ;;  %v1784_v54 = vld [vmem:[#allocation25 + $0x160] sm:$0xff]  ;;  %v2046_v55 = vld [vmem:[#allocation25 + $0x5d0] sm:$0xff] }
 0x2f0   :  { %1720 = vmatpush.msrb.mxu0 %v1484_v32  ;;  %1844 = vmatpush.msra.mxu1 %v1818_v58  ;;  %v1815_v32 = vld [vmem:[#allocation25 + $0x258] sm:$0xff]  ;;  %v1750_v58 = vld [vmem:[#allocation25 + $0x50] sm:$0xff] }
 0x2f1   :  { %1701 = vmatpush.msra.mxu3 %v1475_v59  ;;  %v1782_v59 = vld [vmem:[#allocation25 + $0x150] sm:$0xff]  ;;  %2254 = vmatpush.msrb.mxu2 %v2046_v55 }
 0x2f2   :  { %1721 = vmatpush.msrb.mxu0 %v1476_v24  ;;  %1845 = vmatpush.msra.mxu1 %v1816_v61  ;;  %v2044_v24 = vld [vmem:[#allocation25 + $0x5c0] sm:$0xff]  ;;  %v825_v61 = vperm.slane %v3745_v22, 1  ;;  %v1809_v22 = vld [vmem:[#allocation25 + $0x228] sm:$0xff]  ;;  %v2002_v55 = vld [vmem:[#allocation25 + $0x470] sm:$0xff] }
 0x2f3   :  { %1702 = vmatpush.msra.mxu3 %v1467_v62  ;;  %v1813_v62 = vld [vmem:[#allocation25 + $0x248] sm:$0xff]  ;;  %2255 = vmatpush.msrb.mxu2 %v2044_v24  ;;  %v2000_v24 = vld [vmem:[#allocation25 + $0x460] sm:$0xff] }
 0x2f4   :  { %1722 = vmatpush.msrb.mxu0 %v1468_v56  ;;  %1846 = vmatpush.msra.mxu1 %v1814_v29  ;;  %v885_v56 = vpop.f32.mrf.mxu0  ;;  %v1748_v29 = vld [vmem:[#allocation25 + $0x40] sm:$0xff] }
 0x2f5   :  { %1703 = vmatpush.msra.mxu3 %v1459_v33  ;;  %v1780_v33 = vld [vmem:[#allocation25 + $0x140] sm:$0xff] }
 0x2f6   :  { %1723 = vmatpush.msrb.mxu0 %v1460_v63  ;;  %1847 = vmatpush.msra.mxu1 %v1812_v2  ;;  %v2042_v63 = vld [vmem:[#allocation25 + $0x5b0] sm:$0xff]  ;;  %v1811_v2 = vld [vmem:[#allocation25 + $0x238] sm:$0xff] }
 0x2f7   :  { %1704 = vmatpush.msra.mxu3 %v1451_v37  ;;  %v1746_v37 = vld [vmem:[#allocation25 + $0x30] sm:$0xff]  ;;  %2256 = vmatpush.msrb.mxu2 %v2042_v63  ;;  %v1781_v63 = vld [vmem:[#allocation25 + $0x148] sm:$0xff] }
 0x2f8   :  { %1724 = vmatpush.msrb.mxu0 %v1452_v21  ;;  %1848 = vmatpush.msra.mxu1 %v1810_v5  ;;  %v2040_v21 = vld [vmem:[#allocation25 + $0x5a0] sm:$0xff]  ;;  %v886_v5 = vadd.f32 %v885_v56, %v825_v61  ;;  %v2174_v56 = vld [vmem:[#allocation25 + $0x9d0] sm:$0xff] }
 0x2f9   :  { %1705 = vmatpush.msra.mxu3 %v1443_v47  ;;  %v1776_v47 = vld [vmem:[#allocation25 + $0x120] sm:$0xff]  ;;  %2257 = vmatpush.msrb.mxu2 %v2040_v21  ;;  %v1779_v21 = vld [vmem:[#allocation25 + $0x138] sm:$0xff] }
 0x2fa   :  { %1725 = vmatpush.msrb.mxu0 %v1444_v7  ;;  %1849 = vmatpush.msra.mxu1 %v1808_v8  ;;  %v2038_v7 = vld [vmem:[#allocation25 + $0x590] sm:$0xff]  ;;  %v1807_v8 = vld [vmem:[#allocation25 + $0x218] sm:$0xff]  ;;  %v1968_v61 = vld [vmem:[#allocation25 + $0x360] sm:$0xff] }
 0x2fb   :  { %1706 = vmatpush.msra.mxu3 %v1435_v48  ;;  %v1742_v48 = vld [vmem:[#allocation25 + $0x10] sm:$0xff]  ;;  %2258 = vmatpush.msrb.mxu2 %v2038_v7  ;;  %v1992_v7 = vld [vmem:[#allocation25 + $0x420] sm:$0xff] }
 0x2fc   :  { %1726 = vmatpush.msrb.mxu0 %v1436_v57  ;;  %1850 = vmatpush.msra.mxu1 %v1806_v60  ;;  %v1774_v57 = vld [vmem:[#allocation25 + $0x110] sm:$0xff]  ;;  %v2036_v60 = vld [vmem:[#allocation25 + $0x580] sm:$0xff] }
 0x2fd   :  { %1707 = vmatpush.msra.mxu3 %v1427_v11  ;;  %v3808_v11 = vadd.f32 %v905_v6, %v886_v5  ;;  %2259 = vmatpush.msrb.mxu2 %v2036_v60  ;;  %v2170_v5 = vld [vmem:[#allocation25 + $0x9b0] sm:$0xff] }
 0x2fe   :  { %1727 = vmatpush.msrb.mxu0 %v1428_v39  ;;  %1851 = vmatpush.msra.mxu1 %v1804_v12  ;;  %v1805_v39 = vld [vmem:[#allocation25 + $0x208] sm:$0xff]  ;;  %v1740_v12 = vld [vmem:[#allocation25] sm:$0xff]  ;;  %v1962_v6 = vld [vmem:[#allocation25 + $0x330] sm:$0xff] }
 0x2ff   :  { %1708 = vmatmul.f32.vlgmr.msra.gmra.mxu3 %v3791_v36  ;;  %1728 = vmatmul.f32.vlgmr.msrb.gmra.mxu0 %v3791_v36  ;;  %v1827_v36 = vld [vmem:[#allocation25 + $0x2b8] sm:$0xff]  ;;  %v1990_v60 = vld [vmem:[#allocation25 + $0x410] sm:$0xff] }
 0x300   :  { %1852 = vmatmul.f32.vlgmr.msra.gmra.mxu1 %v695_v14  ;;  %1856 = vmatpush.msrb.mxu3 %v1835_v13  ;;  %v1772_v13 = vld [vmem:[#allocation25 + $0x100] sm:$0xff] }
 0x301   :  { %1876 = vmatpush.msra.mxu0 %v1770_v9  ;;  %1896 = vmatpush.msrb.mxu1 %v1802_v15  ;;  %v2034_v9 = vld [vmem:[#allocation25 + $0x570] sm:$0xff]  ;;  %v1803_v15 = vld [vmem:[#allocation25 + $0x1f8] sm:$0xff] }
 0x302   :  { %1857 = vmatpush.msrb.mxu3 %v1833_v16  ;;  %2260 = vmatpush.msrb.mxu2 %v2034_v9  ;;  %v909_v16 = vmax.f32 %v3808_v11, 0.0  ;;  %v1988_v9 = vld [vmem:[#allocation25 + $0x400] sm:$0xff]  ;;  %v2110_v11 = vld [vmem:[#allocation25 + $0x7d0] sm:$0xff] }
 0x303   :  { %1877 = vmatpush.msra.mxu0 %v1768_v17  ;;  %1897 = vmatpush.msrb.mxu1 %v1800_v19  ;;  %v2018_v17 = vld [vmem:[#allocation25 + $0x4f0] sm:$0xff] }
 0x304   :  { %1858 = vmatpush.msrb.mxu3 %v1831_v20  ;;  %v1986_v19 = vld [vmem:[#allocation25 + $0x3f0] sm:$0xff]  ;;  %v1801_v20 = vld [vmem:[#allocation25 + $0x1e8] sm:$0xff] }
 0x305   :  { %1878 = vmatpush.msra.mxu0 %v1766_v50  ;;  %1898 = vmatpush.msrb.mxu1 %v1798_v18  ;;  %v2032_v50 = vld [vmem:[#allocation25 + $0x560] sm:$0xff] }
 0x306   :  { %1859 = vmatpush.msrb.mxu3 %v1829_v38  ;;  %v2016_v18 = vld [vmem:[#allocation25 + $0x4e0] sm:$0xff]  ;;  %2261 = vmatpush.msrb.mxu2 %v2032_v50 }
 0x307   :  { %1879 = vmatpush.msra.mxu0 %v1764_v23  ;;  %1899 = vmatpush.msrb.mxu1 %v1796_v30  ;;  %v1984_v38 = vld [vmem:[#allocation25 + $0x3e0] sm:$0xff]  ;;  %v1799_v23 = vld [vmem:[#allocation25 + $0x1d8] sm:$0xff]  ;;  %v2030_v30 = vld [vmem:[#allocation25 + $0x550] sm:$0xff] }
 0x308   :  { %1860 = vmatpush.msrb.mxu3 %v1827_v36  ;;  %v2014_v36 = vld [vmem:[#allocation25 + $0x4d0] sm:$0xff]  ;;  %2262 = vmatpush.msrb.mxu2 %v2030_v30  ;;  %v2080_v50 = vld [vmem:[#allocation25 + $0x6e0] sm:$0xff] }
 0x309   :  { %1880 = vmatpush.msra.mxu0 %v1762_v26  ;;  %1900 = vmatpush.msrb.mxu1 %v1794_v27  ;;  %v1982_v26 = vld [vmem:[#allocation25 + $0x3d0] sm:$0xff]  ;;  %v1795_v27 = vld [vmem:[#allocation25 + $0x1b8] sm:$0xff] }
 0x30a   :  { %1861 = vmatpush.msrb.mxu3 %v1825_v31  ;;  %v2026_v31 = vld [vmem:[#allocation25 + $0x530] sm:$0xff]  ;;  %2263 = vmatpush.msrb.mxu2 %v2028_v25  ;;  %v2076_v25 = vld [vmem:[#allocation25 + $0x6c0] sm:$0xff] }
 0x30b   :  { %1881 = vmatpush.msra.mxu0 %v1760_v34  ;;  %1901 = vmatpush.msrb.mxu1 %v1792_v0  ;;  %v2010_v34 = vld [vmem:[#allocation25 + $0x4b0] sm:$0xff] }
 0x30c   :  { %1862 = vmatpush.msrb.mxu3 %v1823_v40  ;;  %v1978_v0 = vld [vmem:[#allocation25 + $0x3b0] sm:$0xff]  ;;  %v1793_v40 = vld [vmem:[#allocation25 + $0x1a8] sm:$0xff]  ;;  %2264 = vmatpush.msrb.mxu2 %v2026_v31  ;;  %v2108_v31 = vld [vmem:[#allocation25 + $0x7c0] sm:$0xff] }
 0x30d   :  { %1882 = vmatpush.msra.mxu0 %v1758_v41  ;;  %1902 = vmatpush.msrb.mxu1 %v1790_v42  ;;  %v2024_v41 = vld [vmem:[#allocation25 + $0x520] sm:$0xff]  ;;  %v2078_v30 = vld [vmem:[#allocation25 + $0x6d0] sm:$0xff] }
 0x30e   :  { %1863 = vmatpush.msrb.mxu3 %v1821_v1  ;;  %v2008_v42 = vld [vmem:[#allocation25 + $0x4a0] sm:$0xff]  ;;  %2265 = vmatpush.msrb.mxu2 %v2024_v41  ;;  %v2106_v41 = vld [vmem:[#allocation25 + $0x7b0] sm:$0xff] }
 0x30f   :  { %1883 = vmatpush.msra.mxu0 %v1756_v44  ;;  %1903 = vmatpush.msrb.mxu1 %v1788_v46  ;;  %v1976_v1 = vld [vmem:[#allocation25 + $0x3a0] sm:$0xff]  ;;  %v1791_v44 = vld [vmem:[#allocation25 + $0x198] sm:$0xff]  ;;  %v2022_v46 = vld [vmem:[#allocation25 + $0x510] sm:$0xff] }
 0x310   :  { %1864 = vmatpush.msrb.mxu3 %v1819_v45  ;;  %v1974_v45 = vld [vmem:[#allocation25 + $0x390] sm:$0xff]  ;;  %2266 = vmatpush.msrb.mxu2 %v2022_v46  ;;  %v2104_v46 = vld [vmem:[#allocation25 + $0x7a0] sm:$0xff] }
 0x311   :  { %1884 = vmatpush.msra.mxu0 %v1754_v49  ;;  %1904 = vmatpush.msrb.mxu1 %v1786_v51  ;;  %v1789_v49 = vld [vmem:[#allocation25 + $0x188] sm:$0xff]  ;;  %v2020_v51 = vld [vmem:[#allocation25 + $0x500] sm:$0xff] }
 0x312   :  { %1865 = vmatpush.msrb.mxu3 %v1817_v52  ;;  %v1972_v52 = vld [vmem:[#allocation25 + $0x380] sm:$0xff]  ;;  %2267 = vmatpush.msrb.mxu2 %v2020_v51  ;;  %v2102_v51 = vld [vmem:[#allocation25 + $0x790] sm:$0xff] }
 0x313   :  { %1885 = vmatpush.msra.mxu0 %v1752_v53  ;;  %1905 = vmatpush.msrb.mxu1 %v1784_v54  ;;  %v1787_v53 = vld [vmem:[#allocation25 + $0x178] sm:$0xff]  ;;  %v2178_v54 = vld [vmem:[#allocation25 + $0x9f0] sm:$0xff] }
 0x314   :  { %1866 = vmatpush.msrb.mxu3 %v1815_v32  ;;  %v1970_v32 = vld [vmem:[#allocation25 + $0x370] sm:$0xff]  ;;  %2332 = vmatpush.msra.mxu2 %v2178_v54  ;;  %v2100_v54 = vld [vmem:[#allocation25 + $0x780] sm:$0xff] }
 0x315   :  { %1886 = vmatpush.msra.mxu0 %v1750_v58  ;;  %1906 = vmatpush.msrb.mxu1 %v1782_v59  ;;  %v1785_v58 = vld [vmem:[#allocation25 + $0x168] sm:$0xff]  ;;  %v2176_v59 = vld [vmem:[#allocation25 + $0x9e0] sm:$0xff] }
 0x316   :  { %1867 = vmatpush.msrb.mxu3 %v1813_v62  ;;  %v1783_v62 = vld [vmem:[#allocation25 + $0x158] sm:$0xff]  ;;  %2333 = vmatpush.msra.mxu2 %v2176_v59  ;;  %v2062_v59 = vld [vmem:[#allocation25 + $0x650] sm:$0xff] }
 0x317   :  { %1887 = vmatpush.msra.mxu0 %v1748_v29  ;;  %1907 = vmatpush.msrb.mxu1 %v1780_v33  ;;  %v1998_v29 = vld [vmem:[#allocation25 + $0x450] sm:$0xff] }
 0x318   :  { %1868 = vmatpush.msrb.mxu3 %v1811_v2  ;;  %v1966_v33 = vld [vmem:[#allocation25 + $0x350] sm:$0xff]  ;;  %v2172_v2 = vld [vmem:[#allocation25 + $0x9c0] sm:$0xff]  ;;  %2334 = vmatpush.msra.mxu2 %v2174_v56 }
 0x319   :  { %1888 = vmatpush.msra.mxu0 %v1746_v37  ;;  %1908 = vmatpush.msrb.mxu1 %v1778_v3  ;;  %v1996_v37 = vld [vmem:[#allocation25 + $0x440] sm:$0xff] }
 0x31a   :  { %1869 = vmatpush.msrb.mxu3 %v1809_v22  ;;  %v1964_v3 = vld [vmem:[#allocation25 + $0x340] sm:$0xff]  ;;  %v1994_v22 = vld [vmem:[#allocation25 + $0x430] sm:$0xff]  ;;  %2335 = vmatpush.msra.mxu2 %v2172_v2 }
 0x31b   :  { %1889 = vmatpush.msra.mxu0 %v1744_v4  ;;  %1909 = vmatpush.msrb.mxu1 %v1776_v47  ;;  %v1777_v4 = vld [vmem:[#allocation25 + $0x128] sm:$0xff]  ;;  %v2168_v47 = vld [vmem:[#allocation25 + $0x9a0] sm:$0xff]  ;;  %v2122_v2 = vld [vmem:[#allocation25 + $0x830] sm:$0xff] }
 0x31c   :  { %1870 = vmatpush.msrb.mxu3 %v1807_v8  ;;  %v1960_v8 = vld [vmem:[#allocation25 + $0x320] sm:$0xff]  ;;  %2336 = vmatpush.msra.mxu2 %v2170_v5 }
 0x31d   :  { %1890 = vmatpush.msra.mxu0 %v1742_v48  ;;  %1910 = vmatpush.msrb.mxu1 %v1774_v57  ;;  %v1775_v48 = vld [vmem:[#allocation25 + $0x118] sm:$0xff]  ;;  %v2166_v57 = vld [vmem:[#allocation25 + $0x990] sm:$0xff]  ;;  %v2124_v56 = vld [vmem:[#allocation25 + $0x840] sm:$0xff] }
 0x31e   :  { %1871 = vmatpush.msrb.mxu3 %v1805_v39  ;;  %v1958_v39 = vld [vmem:[#allocation25 + $0x310] sm:$0xff]  ;;  %2337 = vmatpush.msra.mxu2 %v2168_v47 }
 0x31f   :  { %1891 = vmatpush.msra.mxu0 %v1740_v12  ;;  %1911 = vmatpush.msrb.mxu1 %v1772_v13  ;;  %v1773_v12 = vld [vmem:[#allocation25 + $0x108] sm:$0xff]  ;;  %v2164_v13 = vld [vmem:[#allocation25 + $0x980] sm:$0xff] }
 0x320   :  { %1872 = vmatmul.f32.vlgmr.msrb.gmra.mxu3 %v695_v14  ;;  %1892 = vmatmul.f32.vlgmr.msra.gmra.mxu0 %v908_v43  ;;  %v2012_v43 = vld [vmem:[#allocation25 + $0x4c0] sm:$0xff] }
 0x321   :  { %1912 = vmatmul.f32.vlgmr.msrb.gmra.mxu1 %v909_v16  ;;  %1936 = vmatpush.msra.mxu3 %v1803_v15  ;;  %v1980_v14 = vld [vmem:[#allocation25 + $0x3c0] sm:$0xff]  ;;  %v2082_v15 = vld [vmem:[#allocation25 + $0x6f0] sm:$0xff] }
 0x322   :  { %2232 = vmatpush.msra.mxu1 %v2018_v17  ;;  %2212 = vmatpush.msrb.mxu0 %v1986_v19  ;;  %v2146_v17 = vld [vmem:[#allocation25 + $0x8f0] sm:$0xff]  ;;  %v1956_v19 = vld [vmem:[#allocation25 + $0x300] sm:$0xff] }
 0x323   :  { %1937 = vmatpush.msra.mxu3 %v1801_v20  ;;  %2338 = vmatpush.msra.mxu2 %v2166_v57  ;;  %v2162_v20 = vld [vmem:[#allocation25 + $0x970] sm:$0xff]  ;;  %v2088_v57 = vld [vmem:[#allocation25 + $0x720] sm:$0xff] }
 0x324   :  { %2233 = vmatpush.msra.mxu1 %v2016_v18  ;;  %2213 = vmatpush.msrb.mxu0 %v1984_v38  ;;  %v2144_v18 = vld [vmem:[#allocation25 + $0x8e0] sm:$0xff]  ;;  %v2114_v38 = vld [vmem:[#allocation25 + $0x7f0] sm:$0xff] }
 0x325   :  { %1938 = vmatpush.msra.mxu3 %v1799_v23  ;;  %2339 = vmatpush.msra.mxu2 %v2164_v13  ;;  %v2160_v23 = vld [vmem:[#allocation25 + $0x960] sm:$0xff]  ;;  %v2210_v13 = vld [vmem:[#allocation25 + $0xaf0] sm:$0xff] }
 0x326   :  { %2234 = vmatpush.msra.mxu1 %v2014_v36  ;;  %2214 = vmatpush.msrb.mxu0 %v1982_v26  ;;  %v2142_v36 = vld [vmem:[#allocation25 + $0x8d0] sm:$0xff]  ;;  %v2112_v26 = vld [vmem:[#allocation25 + $0x7e0] sm:$0xff] }
 0x327   :  { %1939 = vmatpush.msra.mxu3 %v1797_v10  ;;  %2340 = vmatpush.msra.mxu2 %v2162_v20  ;;  %v2158_v10 = vld [vmem:[#allocation25 + $0x950] sm:$0xff]  ;;  %v2208_v20 = vld [vmem:[#allocation25 + $0xae0] sm:$0xff] }
 0x328   :  { %2235 = vmatpush.msra.mxu1 %v2012_v43  ;;  %2215 = vmatpush.msrb.mxu0 %v1980_v14  ;;  %v2140_v43 = vld [vmem:[#allocation25 + $0x8c0] sm:$0xff]  ;;  %v2074_v14 = vld [vmem:[#allocation25 + $0x6b0] sm:$0xff] }
 0x329   :  { %1940 = vmatpush.msra.mxu3 %v1795_v27  ;;  %2341 = vmatpush.msra.mxu2 %v2160_v23  ;;  %v2138_v27 = vld [vmem:[#allocation25 + $0x8b0] sm:$0xff]  ;;  %v2051_v23 = vld [vmem:[#allocation25 + $0x5f8] sm:$0xff] }
 0x32a   :  { %2236 = vmatpush.msra.mxu1 %v2010_v34  ;;  %2216 = vmatpush.msrb.mxu0 %v1978_v0  ;;  %v2154_v34 = vld [vmem:[#allocation25 + $0x930] sm:$0xff]  ;;  %v2072_v0 = vld [vmem:[#allocation25 + $0x6a0] sm:$0xff] }
 0x32b   :  { %1941 = vmatpush.msra.mxu3 %v1793_v40  ;;  %2342 = vmatpush.msra.mxu2 %v2158_v10  ;;  %v2136_v40 = vld [vmem:[#allocation25 + $0x8a0] sm:$0xff] }
 0x32c   :  { %2237 = vmatpush.msra.mxu1 %v2008_v42  ;;  %2217 = vmatpush.msrb.mxu0 %v1976_v1  ;;  %v2152_v42 = vld [vmem:[#allocation25 + $0x920] sm:$0xff]  ;;  %v2070_v1 = vld [vmem:[#allocation25 + $0x690] sm:$0xff] }
 0x32d   :  { %1942 = vmatpush.msra.mxu3 %v1791_v44  ;;  %v2134_v44 = vld [vmem:[#allocation25 + $0x890] sm:$0xff]  ;;  %v2084_v10 = vld [vmem:[#allocation25 + $0x700] sm:$0xff] }
 0x32e   :  { %2238 = vmatpush.msra.mxu1 %v2006_v35  ;;  %2218 = vmatpush.msrb.mxu0 %v1974_v45  ;;  %v2150_v35 = vld [vmem:[#allocation25 + $0x910] sm:$0xff]  ;;  %v2068_v45 = vld [vmem:[#allocation25 + $0x680] sm:$0xff] }
 0x32f   :  { %1943 = vmatpush.msra.mxu3 %v1789_v49  ;;  %v2132_v49 = vld [vmem:[#allocation25 + $0x880] sm:$0xff] }
 0x330   :  { %2239 = vmatpush.msra.mxu1 %v2004_v28  ;;  %2219 = vmatpush.msrb.mxu0 %v1972_v52  ;;  %v2148_v28 = vld [vmem:[#allocation25 + $0x900] sm:$0xff]  ;;  %v2066_v52 = vld [vmem:[#allocation25 + $0x670] sm:$0xff] }
 0x331   :  { %1944 = vmatpush.msra.mxu3 %v1787_v53  ;;  %v2130_v53 = vld [vmem:[#allocation25 + $0x870] sm:$0xff] }
 0x332   :  { %2240 = vmatpush.msra.mxu1 %v2002_v55  ;;  %2220 = vmatpush.msrb.mxu0 %v1970_v32  ;;  %v2064_v55 = vld [vmem:[#allocation25 + $0x660] sm:$0xff] }
 0x333   :  { %1945 = vmatpush.msra.mxu3 %v1785_v58  ;;  %v2128_v32 = vld [vmem:[#allocation25 + $0x860] sm:$0xff]  ;;  %v2098_v58 = vld [vmem:[#allocation25 + $0x770] sm:$0xff] }
 0x334   :  { %2241 = vmatpush.msra.mxu1 %v2000_v24  ;;  %2221 = vmatpush.msrb.mxu0 %v1968_v61  ;;  %v2126_v24 = vld [vmem:[#allocation25 + $0x850] sm:$0xff]  ;;  %v2096_v61 = vld [vmem:[#allocation25 + $0x760] sm:$0xff] }
 0x335   :  { %1946 = vmatpush.msra.mxu3 %v1783_v62  ;;  %v2060_v62 = vld [vmem:[#allocation25 + $0x640] sm:$0xff] }
 0x336   :  { %2242 = vmatpush.msra.mxu1 %v1998_v29  ;;  %2222 = vmatpush.msrb.mxu0 %v1966_v33  ;;  %v3819_v29 = vld [vmem:[#allocation23] sm:$0xff]  ;;  %v2094_v33 = vld [vmem:[#allocation25 + $0x750] sm:$0xff] }
 0x337   :  { %1947 = vmatpush.msra.mxu3 %v1781_v63  ;;  %v2058_v63 = vld [vmem:[#allocation25 + $0x630] sm:$0xff]  ;;  %v1553_v5 = vperm.slane %v3819_v29, 2 }
 0x338   :  { %2243 = vmatpush.msra.mxu1 %v1996_v37  ;;  %2223 = vmatpush.msrb.mxu0 %v1964_v3  ;;  %v1552_v37 = vperm.slane %v3819_v29, 1  ;;  %v2092_v3 = vld [vmem:[#allocation25 + $0x740] sm:$0xff] }
 0x339   :  { %1948 = vmatpush.msra.mxu3 %v1779_v21  ;;  %v2056_v21 = vld [vmem:[#allocation25 + $0x620] sm:$0xff] }
 0x33a   :  { %2244 = vmatpush.msra.mxu1 %v1994_v22  ;;  %2224 = vmatpush.msrb.mxu0 %v1962_v6  ;;  %v2120_v22 = vld [vmem:[#allocation25 + $0x820] sm:$0xff]  ;;  %v2090_v6 = vld [vmem:[#allocation25 + $0x730] sm:$0xff] }
 0x33b   :  { %1949 = vmatpush.msra.mxu3 %v1777_v4  ;;  %v2054_v4 = vld [vmem:[#allocation25 + $0x610] sm:$0xff] }
 0x33c   :  { %2245 = vmatpush.msra.mxu1 %v1992_v7  ;;  %2225 = vmatpush.msrb.mxu0 %v1960_v8  ;;  %v2118_v7 = vld [vmem:[#allocation25 + $0x810] sm:$0xff] }
 0x33d   :  { %1950 = vmatpush.msra.mxu3 %v1775_v48 }
 0x33e   :  { %2246 = vmatpush.msra.mxu1 %v1990_v60  ;;  %2226 = vmatpush.msrb.mxu0 %v1958_v39  ;;  %v2052_v60 = vld [vmem:[#allocation25 + $0x600] sm:$0xff] }
 0x33f   :  { %1951 = vmatpush.msra.mxu3 %v1773_v12  ;;  %v2116_v12 = vld [vmem:[#allocation25 + $0x800] sm:$0xff] }
 0x340   :  { %1952 = vmatmul.f32.vlgmr.msra.gmra.mxu3 %v909_v16  ;;  %2247 = vmatpush.msra.mxu1 %v1988_v9  ;;  %v2156_v16 = vld [vmem:[#allocation25 + $0x940] sm:$0xff] }
 0x341   :  { %2272 = vmatpush.msrb.mxu3 %v2082_v15  ;;  %2227 = vmatpush.msrb.mxu0 %v1956_v19  ;;  %v1551_v15 = vperm.slane %v3819_v29, 0  ;;  %v2019_v19 = vld [vmem:[#allocation25 + $0x4f8] sm:$0xff] }
 0x342   :  { %2312 = vmatpush.msrb.mxu1 %v2146_v17  ;;  %2343 = vmatpush.msra.mxu2 %v2156_v16  ;;  %v1987_v16 = vld [vmem:[#allocation25 + $0x3f8] sm:$0xff] }
 0x343   :  { %2273 = vmatpush.msrb.mxu3 %v2080_v50  ;;  %2292 = vmatpush.msra.mxu0 %v2114_v38  ;;  %v2086_v50 = vld [vmem:[#allocation25 + $0x710] sm:$0xff]  ;;  %v2017_v38 = vld [vmem:[#allocation25 + $0x4e8] sm:$0xff] }
 0x344   :  { %2313 = vmatpush.msrb.mxu1 %v2144_v18  ;;  %2344 = vmatpush.msra.mxu2 %v2154_v34  ;;  %v2202_v34 = vld [vmem:[#allocation25 + $0xab0] sm:$0xff] }
 0x345   :  { %2274 = vmatpush.msrb.mxu3 %v2078_v30  ;;  %2293 = vmatpush.msra.mxu0 %v2112_v26  ;;  %v2206_v30 = vld [vmem:[#allocation25 + $0xad0] sm:$0xff]  ;;  %v1556_v26 = vperm.slane %v3819_v29, 5 }
 0x346   :  { %2314 = vmatpush.msrb.mxu1 %v2142_v36  ;;  %2345 = vmatpush.msra.mxu2 %v2152_v42 }
 0x347   :  { %2275 = vmatpush.msrb.mxu3 %v2076_v25  ;;  %2294 = vmatpush.msra.mxu0 %v2110_v11  ;;  %v2015_v25 = vld [vmem:[#allocation25 + $0x4d8] sm:$0xff] }
 0x348   :  { %2315 = vmatpush.msrb.mxu1 %v2140_v43  ;;  %2346 = vmatpush.msra.mxu2 %v2150_v35  ;;  %v2204_v43 = vld [vmem:[#allocation25 + $0xac0] sm:$0xff] }
 0x349   :  { %2276 = vmatpush.msrb.mxu3 %v2074_v14  ;;  %2295 = vmatpush.msra.mxu0 %v2108_v31  ;;  %v2049_v31 = vld [vmem:[#allocation25 + $0x5e8] sm:$0xff]  ;;  %v2200_v35 = vld [vmem:[#allocation25 + $0xaa0] sm:$0xff] }
 0x34a   :  { %2316 = vmatpush.msrb.mxu1 %v2138_v27  ;;  %2347 = vmatpush.msra.mxu2 %v2148_v28  ;;  %v2013_v27 = vld [vmem:[#allocation25 + $0x4c8] sm:$0xff] }
 0x34b   :  { %2277 = vmatpush.msrb.mxu3 %v2072_v0  ;;  %2296 = vmatpush.msra.mxu0 %v2106_v41  ;;  %v1555_v0 = vperm.slane %v3819_v29, 4  ;;  %v1985_v41 = vld [vmem:[#allocation25 + $0x3e8] sm:$0xff] }
 0x34c   :  { %2317 = vmatpush.msrb.mxu1 %v2136_v40 }
 0x34d   :  { %2278 = vmatpush.msrb.mxu3 %v2070_v1  ;;  %2297 = vmatpush.msra.mxu0 %v2104_v46  ;;  %v1554_v1 = vperm.slane %v3819_v29, 3 }
 0x34e   :  { %2318 = vmatpush.msrb.mxu1 %v2134_v44  ;;  %v2047_v44 = vld [vmem:[#allocation25 + $0x5d8] sm:$0xff] }
 0x34f   :  { %2279 = vmatpush.msrb.mxu3 %v2068_v45  ;;  %2298 = vmatpush.msra.mxu0 %v2102_v51  ;;  %v2011_v45 = vld [vmem:[#allocation25 + $0x4b8] sm:$0xff]  ;;  %v2045_v51 = vld [vmem:[#allocation25 + $0x5c8] sm:$0xff] }
 0x350   :  { %2319 = vmatpush.msrb.mxu1 %v2132_v49  ;;  %v1983_v49 = vld [vmem:[#allocation25 + $0x3d8] sm:$0xff] }
 0x351   :  { %2280 = vmatpush.msrb.mxu3 %v2066_v52  ;;  %2299 = vmatpush.msra.mxu0 %v2100_v54  ;;  %v2198_v52 = vld [vmem:[#allocation25 + $0xa90] sm:$0xff]  ;;  %v2009_v54 = vld [vmem:[#allocation25 + $0x4a8] sm:$0xff] }
 0x352   :  { %2320 = vmatpush.msrb.mxu1 %v2130_v53 }
 0x353   :  { %2281 = vmatpush.msrb.mxu3 %v2064_v55  ;;  %2300 = vmatpush.msra.mxu0 %v2098_v58  ;;  %v2043_v58 = vld [vmem:[#allocation25 + $0x5b8] sm:$0xff] }
 0x354   :  { %2321 = vmatpush.msrb.mxu1 %v2128_v32  ;;  %v1981_v32 = vld [vmem:[#allocation25 + $0x3c8] sm:$0xff] }
 0x355   :  { %2282 = vmatpush.msrb.mxu3 %v2062_v59  ;;  %2301 = vmatpush.msra.mxu0 %v2096_v61  ;;  %v2196_v59 = vld [vmem:[#allocation25 + $0xa80] sm:$0xff] }
 0x356   :  { %2322 = vmatpush.msrb.mxu1 %v2126_v24  ;;  %v2007_v24 = vld [vmem:[#allocation25 + $0x498] sm:$0xff] }
 0x357   :  { %2283 = vmatpush.msrb.mxu3 %v2060_v62  ;;  %2302 = vmatpush.msra.mxu0 %v2094_v33  ;;  %v1979_v33 = vld [vmem:[#allocation25 + $0x3b8] sm:$0xff] }
 0x358   :  { %2323 = vmatpush.msrb.mxu1 %v2124_v56  ;;  %v2194_v56 = vld [vmem:[#allocation25 + $0xa70] sm:$0xff] }
 0x359   :  { %2284 = vmatpush.msrb.mxu3 %v2058_v63  ;;  %2303 = vmatpush.msra.mxu0 %v2092_v3  ;;  %v2005_v63 = vld [vmem:[#allocation25 + $0x488] sm:$0xff] }
 0x35a   :  { %2324 = vmatpush.msrb.mxu1 %v2122_v2  ;;  %v1609_v47 = vpop.f32.mrf.mxu0  ;;  %v2041_v2 = vld [vmem:[#allocation25 + $0x5a8] sm:$0xff] }
 0x35b   :  { %2285 = vmatpush.msrb.mxu3 %v2056_v21  ;;  %v3823_v8 = vadd.f32 %v1609_v47, %v1552_v37  ;;  %v1629_v48 = vpop.f32.mrf.mxu1  ;;  %2304 = vmatpush.msra.mxu0 %v2090_v6  ;;  %v2192_v37 = vld [vmem:[#allocation25 + $0xa60] sm:$0xff]  ;;  %v1977_v3 = vld [vmem:[#allocation25 + $0x3a8] sm:$0xff]  ;;  %v2003_v21 = vld [vmem:[#allocation25 + $0x478] sm:$0xff] }
 0x35c   :  { %2325 = vmatpush.msrb.mxu1 %v2120_v22  ;;  %v3825_v39 = vadd.f32 %v1629_v48, %v1553_v5  ;;  %v2039_v5 = vld [vmem:[#allocation25 + $0x598] sm:$0xff]  ;;  %v2190_v22 = vld [vmem:[#allocation25 + $0xa50] sm:$0xff]  ;;  %v2037_v47 = vld [vmem:[#allocation25 + $0x588] sm:$0xff] }
 0x35d   :  { %2286 = vmatpush.msrb.mxu3 %v2054_v4  ;;  %v1733_v9 = vmax.f32 %v3823_v8, 0.0  ;;  %2305 = vmatpush.msra.mxu0 %v2088_v57  ;;  %v1975_v6 = vld [vmem:[#allocation25 + $0x398] sm:$0xff]  ;;  %v2001_v4 = vld [vmem:[#allocation25 + $0x468] sm:$0xff] }
 0x35e   :  { %2326 = vmatpush.msrb.mxu1 %v2118_v7  ;;  %v1734_v17 = vmax.f32 %v3825_v39, 0.0  ;;  %v2188_v7 = vld [vmem:[#allocation25 + $0xa40] sm:$0xff]  ;;  %v1973_v48 = vld [vmem:[#allocation25 + $0x388] sm:$0xff]  ;;  %v1999_v57 = vld [vmem:[#allocation25 + $0x458] sm:$0xff] }
 0x35f   :  { %2287 = vmatpush.msrb.mxu3 %v2052_v60  ;;  %2248 = vmatmul.f32.vlgmr.msra.gmra.mxu1 %v1733_v9  ;;  %v2035_v60 = vld [vmem:[#allocation25 + $0x578] sm:$0xff]  ;;  %v2021_v8 = vld [vmem:[#allocation25 + $0x508] sm:$0xff] }
 0x360   :  { %2327 = vmatpush.msrb.mxu1 %v2116_v12  ;;  %v1589_v18 = vpop.f32.mrf.mxu3  ;;  %2268 = vmatmul.f32.vlgmr.msrb.gmra.mxu2 %v1734_v17  ;;  %v2186_v12 = vld [vmem:[#allocation25 + $0xa30] sm:$0xff]  ;;  %v2165_v39 = vld [vmem:[#allocation25 + $0x988] sm:$0xff] }
 0x361   :  { %2352 = vmatpush.msra.mxu3 %v2210_v13  ;;  %v3834_v36 = vadd.f32 %v1589_v18, %v1551_v15  ;;  %2306 = vmatpush.msra.mxu0 %v2086_v50  ;;  %v1971_v13 = vld [vmem:[#allocation25 + $0x378] sm:$0xff]  ;;  %v1997_v15 = vld [vmem:[#allocation25 + $0x448] sm:$0xff] }
 0x362   :  { %2392 = vmatpush.msra.mxu1 %v2019_v19  ;;  %2412 = vmatpush.msrb.mxu2 %v2051_v23  ;;  %v2033_v19 = vld [vmem:[#allocation25 + $0x568] sm:$0xff]  ;;  %v1995_v18 = vld [vmem:[#allocation25 + $0x438] sm:$0xff]  ;;  %v2182_v23 = vld [vmem:[#allocation25 + $0xa10] sm:$0xff] }
 0x363   :  { %2353 = vmatpush.msra.mxu3 %v2208_v20  ;;  %v1732_v11 = vmax.f32 %v3834_v36, 0.0  ;;  %2307 = vmatpush.msra.mxu0 %v2084_v10  ;;  %v1669_v42 = vpop.f32.mrf.mxu0  ;;  %v2184_v20 = vld [vmem:[#allocation25 + $0xa20] sm:$0xff]  ;;  %v1969_v50 = vld [vmem:[#allocation25 + $0x368] sm:$0xff] }
 0x364   :  { %2393 = vmatpush.msra.mxu1 %v2017_v38  ;;  %v1689_v14 = vpop.f32.mrf.mxu1  ;;  %2413 = vmatpush.msrb.mxu2 %v2049_v31  ;;  %v3845_v28 = vadd.f32 %v1669_v42, %v1555_v0  ;;  %v2031_v38 = vld [vmem:[#allocation25 + $0x558] sm:$0xff]  ;;  %v1993_v10 = vld [vmem:[#allocation25 + $0x428] sm:$0xff] }
 0x365   :  { %2354 = vmatpush.msra.mxu3 %v2206_v30  ;;  %v3839_v40 = vadd.f32 %v1689_v14, %v1556_v26  ;;  %2228 = vmatmul.f32.vlgmr.msrb.gmra.mxu0 %v1732_v11  ;;  %v1558_v30 = vperm.slane %v3819_v29, 7  ;;  %v1967_v26 = vld [vmem:[#allocation25 + $0x358] sm:$0xff]  ;;  %v2081_v42 = vld [vmem:[#allocation25 + $0x6e8] sm:$0xff] }
 0x366   :  { %2394 = vmatpush.msra.mxu1 %v2015_v25  ;;  %2372 = vmatpush.msrb.mxu0 %v1987_v16  ;;  %v1736_v62 = vmax.f32 %v3845_v28, 0.0  ;;  %v2029_v25 = vld [vmem:[#allocation25 + $0x548] sm:$0xff]  ;;  %v2083_v14 = vld [vmem:[#allocation25 + $0x6f8] sm:$0xff] }
 0x367   :  { %2355 = vmatpush.msra.mxu3 %v2204_v43  ;;  %v1737_v46 = vmax.f32 %v3839_v40, 0.0  ;;  %2414 = vmatpush.msrb.mxu2 %v2047_v44  ;;  %v2180_v43 = vld [vmem:[#allocation25 + $0xa00] sm:$0xff]  ;;  %v1965_v16 = vld [vmem:[#allocation25 + $0x348] sm:$0xff]  ;;  %v1991_v31 = vld [vmem:[#allocation25 + $0x418] sm:$0xff] }
 0x368   :  { %2395 = vmatpush.msra.mxu1 %v2013_v27  ;;  %2373 = vmatpush.msrb.mxu0 %v1985_v41  ;;  %v1963_v0 = vld [vmem:[#allocation25 + $0x338] sm:$0xff]  ;;  %v2109_v36 = vld [vmem:[#allocation25 + $0x7c8] sm:$0xff] }
 0x369   :  { %2356 = vmatpush.msra.mxu3 %v2202_v34  ;;  %2328 = vmatmul.f32.vlgmr.msrb.gmra.mxu1 %v1737_v46  ;;  %v1649_v53 = vpop.f32.mrf.mxu3  ;;  %v2027_v41 = vld [vmem:[#allocation25 + $0x538] sm:$0xff]  ;;  %v2197_v40 = vld [vmem:[#allocation25 + $0xa88] sm:$0xff] }
 0x36a   :  { %2396 = vmatpush.msra.mxu1 %v2011_v45  ;;  %v3849_v55 = vadd.f32 %v1649_v53, %v1554_v1  ;;  %2374 = vmatpush.msrb.mxu0 %v1983_v49  ;;  %v1989_v1 = vld [vmem:[#allocation25 + $0x408] sm:$0xff]  ;;  %v2079_v45 = vld [vmem:[#allocation25 + $0x6d8] sm:$0xff] }
 0x36b   :  { %2357 = vmatpush.msra.mxu3 %v2200_v35  ;;  %2415 = vmatpush.msrb.mxu2 %v2045_v51  ;;  %v1557_v35 = vperm.slane %v3819_v29, 6  ;;  %v2147_v49 = vld [vmem:[#allocation25 + $0x8f8] sm:$0xff]  ;;  %v1961_v51 = vld [vmem:[#allocation25 + $0x328] sm:$0xff] }
 0x36c   :  { %v1735_v61 = vmax.f32 %v3849_v55, 0.0  ;;  %2397 = vmatpush.msra.mxu1 %v2009_v54  ;;  %2375 = vmatpush.msrb.mxu0 %v1981_v32  ;;  %v2077_v53 = vld [vmem:[#allocation25 + $0x6c8] sm:$0xff] }
 0x36d   :  { %2358 = vmatpush.msra.mxu3 %v2198_v52  ;;  %2416 = vmatpush.msrb.mxu2 %v2043_v58  ;;  %v2025_v52 = vld [vmem:[#allocation25 + $0x528] sm:$0xff]  ;;  %v1959_v58 = vld [vmem:[#allocation25 + $0x318] sm:$0xff] }
 0x36e   :  { %2398 = vmatpush.msra.mxu1 %v2007_v24  ;;  %2288 = vmatmul.f32.vlgmr.msrb.gmra.mxu3 %v1735_v61  ;;  %v2145_v32 = vld [vmem:[#allocation25 + $0x8e8] sm:$0xff]  ;;  %v2075_v24 = vld [vmem:[#allocation25 + $0x6b8] sm:$0xff] }
 0x36f   :  { %2359 = vmatpush.msra.mxu3 %v2196_v59  ;;  %2308 = vmatmul.f32.vlgmr.msra.gmra.mxu0 %v1736_v62  ;;  %v2023_v59 = vld [vmem:[#allocation25 + $0x518] sm:$0xff]  ;;  %v2181_v28 = vld [vmem:[#allocation25 + $0xa08] sm:$0xff] }
 0x370   :  { %2376 = vmatpush.msrb.mxu0 %v1979_v33  ;;  %2399 = vmatpush.msra.mxu1 %v2005_v63  ;;  %v1957_v63 = vld [vmem:[#allocation25 + $0x308] sm:$0xff] }
 0x371   :  { %2360 = vmatpush.msra.mxu3 %v2194_v56  ;;  %2417 = vmatpush.msrb.mxu2 %v2041_v2  ;;  %v2143_v56 = vld [vmem:[#allocation25 + $0x8d8] sm:$0xff]  ;;  %v2141_v2 = vld [vmem:[#allocation25 + $0x8c8] sm:$0xff] }
 0x372   :  { %2377 = vmatpush.msrb.mxu0 %v1977_v3  ;;  %2400 = vmatpush.msra.mxu1 %v2003_v21  ;;  %v2115_v3 = vld [vmem:[#allocation25 + $0x7f8] sm:$0xff] }
 0x373   :  { %2361 = vmatpush.msra.mxu3 %v2192_v37  ;;  %2418 = vmatpush.msrb.mxu2 %v2039_v5  ;;  %v2071_v37 = vld [vmem:[#allocation25 + $0x698] sm:$0xff] }
 0x374   :  { %2378 = vmatpush.msrb.mxu0 %v1975_v6  ;;  %2401 = vmatpush.msra.mxu1 %v2001_v4  ;;  %v2179_v21 = vld [vmem:[#allocation25 + $0x9f8] sm:$0xff]  ;;  %v2113_v6 = vld [vmem:[#allocation25 + $0x7e8] sm:$0xff] }
 0x375   :  { %2362 = vmatpush.msra.mxu3 %v2190_v22  ;;  %2419 = vmatpush.msrb.mxu2 %v2037_v47  ;;  %v2139_v5 = vld [vmem:[#allocation25 + $0x8b8] sm:$0xff]  ;;  %v2069_v22 = vld [vmem:[#allocation25 + $0x688] sm:$0xff] }
 0x376   :  { %2379 = vmatpush.msrb.mxu0 %v1973_v48  ;;  %2402 = vmatpush.msra.mxu1 %v1999_v57  ;;  %v2177_v4 = vld [vmem:[#allocation25 + $0x9e8] sm:$0xff]  ;;  %v2111_v48 = vld [vmem:[#allocation25 + $0x7d8] sm:$0xff] }
 0x377   :  { %2363 = vmatpush.msra.mxu3 %v2188_v7  ;;  %2420 = vmatpush.msrb.mxu2 %v2035_v60  ;;  %v2137_v47 = vld [vmem:[#allocation25 + $0x8a8] sm:$0xff]  ;;  %v2067_v7 = vld [vmem:[#allocation25 + $0x678] sm:$0xff] }
 0x378   :  { %2380 = vmatpush.msrb.mxu0 %v1971_v13  ;;  %2403 = vmatpush.msra.mxu1 %v1997_v15  ;;  %v2175_v57 = vld [vmem:[#allocation25 + $0x9d8] sm:$0xff]  ;;  %v2133_v13 = vld [vmem:[#allocation25 + $0x888] sm:$0xff] }
 0x379   :  { %2364 = vmatpush.msra.mxu3 %v2186_v12  ;;  %2421 = vmatpush.msrb.mxu2 %v2033_v19  ;;  %v2135_v60 = vld [vmem:[#allocation25 + $0x898] sm:$0xff]  ;;  %v2065_v12 = vld [vmem:[#allocation25 + $0x668] sm:$0xff] }
 0x37a   :  { %2381 = vmatpush.msrb.mxu0 %v1969_v50  ;;  %2404 = vmatpush.msra.mxu1 %v1995_v18  ;;  %v2063_v15 = vld [vmem:[#allocation25 + $0x658] sm:$0xff]  ;;  %v2061_v50 = vld [vmem:[#allocation25 + $0x648] sm:$0xff] }
 0x37b   :  { %2365 = vmatpush.msra.mxu3 %v2184_v20  ;;  %2422 = vmatpush.msrb.mxu2 %v2031_v38  ;;  %v2107_v19 = vld [vmem:[#allocation25 + $0x7b8] sm:$0xff]  ;;  %v2105_v38 = vld [vmem:[#allocation25 + $0x7a8] sm:$0xff] }
 0x37c   :  { %v1729_v27 = vpop.f32.mrf.mxu0  ;;  %2382 = vmatpush.msrb.mxu0 %v1967_v26  ;;  %2405 = vmatpush.msra.mxu1 %v1993_v10  ;;  %v2171_v20 = vld [vmem:[#allocation25 + $0x9b8] sm:$0xff]  ;;  %v2129_v26 = vld [vmem:[#allocation25 + $0x868] sm:$0xff] }
 0x37d   :  { %2366 = vmatpush.msra.mxu3 %v2182_v23  ;;  %v3858_v34 = vadd.f32 %v1729_v27, %v1558_v30  ;;  %2423 = vmatpush.msrb.mxu2 %v2029_v25  ;;  %v2131_v18 = vld [vmem:[#allocation25 + $0x878] sm:$0xff]  ;;  %v2169_v23 = vld [vmem:[#allocation25 + $0x9a8] sm:$0xff] }
 0x37e   :  { %2383 = vmatpush.msrb.mxu0 %v1965_v16  ;;  %2406 = vmatpush.msra.mxu1 %v1991_v31  ;;  %v2059_v30 = vld [vmem:[#allocation25 + $0x638] sm:$0xff]  ;;  %v2125_v27 = vld [vmem:[#allocation25 + $0x848] sm:$0xff] }
 0x37f   :  { %2367 = vmatpush.msra.mxu3 %v2180_v43  ;;  %v1739_v44 = vmax.f32 %v3858_v34, 0.0  ;;  %2424 = vmatpush.msrb.mxu2 %v2027_v41  ;;  %v2103_v10 = vld [vmem:[#allocation25 + $0x798] sm:$0xff]  ;;  %v2057_v43 = vld [vmem:[#allocation25 + $0x628] sm:$0xff] }
 0x380   :  { %2384 = vmatpush.msrb.mxu0 %v1963_v0  ;;  %2407 = vmatpush.msra.mxu1 %v1989_v1  ;;  %v2167_v25 = vld [vmem:[#allocation25 + $0x998] sm:$0xff]  ;;  %v2053_v41 = vld [vmem:[#allocation25 + $0x608] sm:$0xff] }
 0x381   :  { %2432 = vmatpush.msrb.mxu3 %v2083_v14  ;;  %2408 = vmatmul.f32.vlgmr.msra.gmra.mxu1 %v1733_v9  ;;  %v2073_v9 = vld [vmem:[#allocation25 + $0x6a8] sm:$0xff]  ;;  %v2127_v16 = vld [vmem:[#allocation25 + $0x858] sm:$0xff] }
 0x382   :  { %2368 = vmatmul.f32.vlgmr.msra.gmra.mxu3 %v1739_v44  ;;  %v1709_v54 = vpop.f32.mrf.mxu3  ;;  %2472 = vmatpush.msrb.mxu1 %v2147_v49  ;;  %v2101_v14 = vld [vmem:[#allocation25 + $0x788] sm:$0xff]  ;;  %v2099_v31 = vld [vmem:[#allocation25 + $0x778] sm:$0xff] }
 0x383   :  { %2433 = vmatpush.msrb.mxu3 %v2081_v42  ;;  %v3866_v29 = vadd.f32 %v1709_v54, %v1557_v35  ;;  %2385 = vmatpush.msrb.mxu0 %v1961_v51  ;;  %v2163_v0 = vld [vmem:[#allocation25 + $0x978] sm:$0xff]  ;;  %v2097_v1 = vld [vmem:[#allocation25 + $0x768] sm:$0xff] }
 0x384   :  { %2425 = vmatpush.msrb.mxu2 %v2025_v52  ;;  %2473 = vmatpush.msrb.mxu1 %v2145_v32  ;;  %v2123_v42 = vld [vmem:[#allocation25 + $0x838] sm:$0xff]  ;;  %v2161_v35 = vld [vmem:[#allocation25 + $0x968] sm:$0xff] }
 0x385   :  { %2434 = vmatpush.msrb.mxu3 %v2079_v45  ;;  %v1738_v33 = vmax.f32 %v3866_v29, 0.0  ;;  %2386 = vmatpush.msrb.mxu0 %v1959_v58  ;;  %v2121_v45 = vld [vmem:[#allocation25 + $0x828] sm:$0xff]  ;;  %v2211_v49 = vld [vmem:[#allocation25 + $0xaf8] sm:$0xff] }
 0x386   :  { %2426 = vmatpush.msrb.mxu2 %v2023_v59  ;;  %2474 = vmatpush.msrb.mxu1 %v2143_v56  ;;  %v2095_v51 = vld [vmem:[#allocation25 + $0x758] sm:$0xff]  ;;  %v2209_v54 = vld [vmem:[#allocation25 + $0xae8] sm:$0xff] }
 0x387   :  { %2435 = vmatpush.msrb.mxu3 %v2077_v53  ;;  %2387 = vmatpush.msrb.mxu0 %v1957_v63  ;;  %v2159_v52 = vld [vmem:[#allocation25 + $0x958] sm:$0xff]  ;;  %v2093_v32 = vld [vmem:[#allocation25 + $0x748] sm:$0xff] }
 0x388   :  { %2427 = vmatpush.msrb.mxu2 %v2021_v8  ;;  %2388 = vmatmul.f32.vlgmr.msrb.gmra.mxu0 %v1732_v11  ;;  %v2173_v11 = vld [vmem:[#allocation25 + $0x9c8] sm:$0xff]  ;;  %v2119_v53 = vld [vmem:[#allocation25 + $0x818] sm:$0xff]  ;;  %v1933_v8 = vpop.f32.mrf.mxu2 }
 0x389   :  { %2436 = vmatpush.msrb.mxu3 %v2075_v24  ;;  %2348 = vmatmul.f32.vlgmr.msra.gmra.mxu2 %v1738_v33  ;;  %v2157_v58 = vld [vmem:[#allocation25 + $0x948] sm:$0xff]  ;;  %v2207_v24 = vld [vmem:[#allocation25 + $0xad8] sm:$0xff] }
 0x38a   :  { %2475 = vmatpush.msrb.mxu1 %v2141_v2  ;;  %2452 = vmatpush.msra.mxu0 %v2115_v3  ;;  %v2117_v59 = vld [vmem:[#allocation25 + $0x808] sm:$0xff]  ;;  %v2091_v56 = vld [vmem:[#allocation25 + $0x738] sm:$0xff] }
 0x38b   :  { %2437 = vmatpush.msrb.mxu3 %v2073_v9  ;;  %2492 = vmatpush.msra.mxu2 %v2179_v21  ;;  %v2155_v63 = vld [vmem:[#allocation25 + $0x938] sm:$0xff]  ;;  %v2205_v9 = vld [vmem:[#allocation25 + $0xac8] sm:$0xff] }
 0x38c   :  { %2476 = vmatpush.msrb.mxu1 %v2139_v5  ;;  %2453 = vmatpush.msra.mxu0 %v2113_v6  ;;  %v2203_v3 = vld [vmem:[#allocation25 + $0xab8] sm:$0xff]  ;;  %v2085_v6 = vld [vmem:[#allocation25 + $0x708] sm:$0xff] }
 0x38d   :  { %2438 = vmatpush.msrb.mxu3 %v2071_v37  ;;  %2493 = vmatpush.msra.mxu2 %v2177_v4  ;;  %v2153_v37 = vld [vmem:[#allocation25 + $0x928] sm:$0xff]  ;;  %v2087_v21 = vld [vmem:[#allocation25 + $0x718] sm:$0xff] }
 0x38e   :  { %2477 = vmatpush.msrb.mxu1 %v2137_v47  ;;  %2454 = vmatpush.msra.mxu0 %v2111_v48  ;;  %v2151_v5 = vld [vmem:[#allocation25 + $0x918] sm:$0xff]  ;;  %v2149_v4 = vld [vmem:[#allocation25 + $0x908] sm:$0xff] }
 0x38f   :  { %2439 = vmatpush.msrb.mxu3 %v2069_v22  ;;  %2494 = vmatpush.msra.mxu2 %v2175_v57  ;;  %v2201_v22 = vld [vmem:[#allocation25 + $0xaa8] sm:$0xff]  ;;  %v2199_v47 = vld [vmem:[#allocation25 + $0xa98] sm:$0xff] }
 0x390   :  { %2478 = vmatpush.msrb.mxu1 %v2135_v60  ;;  %2455 = vmatpush.msra.mxu0 %v2109_v36  ;;  %v2191_v48 = vld [vmem:[#allocation25 + $0xa58] sm:$0xff]  ;;  %v2189_v57 = vld [vmem:[#allocation25 + $0xa48] sm:$0xff] }
 0x391   :  { %2440 = vmatpush.msrb.mxu3 %v2067_v7  ;;  %2495 = vmatpush.msra.mxu2 %v2173_v11  ;;  %v2193_v7 = vld [vmem:[#allocation25 + $0xa68] sm:$0xff]  ;;  %v2187_v60 = vld [vmem:[#allocation25 + $0xa38] sm:$0xff] }
 0x392   :  { %2479 = vmatpush.msrb.mxu1 %v2133_v13  ;;  %2428 = vmatmul.f32.vlgmr.msrb.gmra.mxu2 %v1734_v17  ;;  %v2055_v17 = vld [vmem:[#allocation25 + $0x618] sm:$0xff] }
 0x393   :  { %2441 = vmatpush.msrb.mxu3 %v2065_v12  ;;  %2456 = vmatpush.msra.mxu0 %v2107_v19  ;;  %v2185_v12 = vld [vmem:[#allocation25 + $0xa28] sm:$0xff]  ;;  %v2183_v36 = vld [vmem:[#allocation25 + $0xa18] sm:$0xff] }
 0x394   :  { %2496 = vmatpush.msra.mxu2 %v2171_v20  ;;  %2480 = vmatpush.msrb.mxu1 %v2131_v18  ;;  %v2597_v19 = vld [vmem:[%s4009_s18 + $0x78] sm:$0xff]  ;;  %v2596_v20 = vld [vmem:[%s4009_s18 + $0x70] sm:$0xff] }
 0x395   :  { %2442 = vmatpush.msrb.mxu3 %v2063_v15  ;;  %2457 = vmatpush.msra.mxu0 %v2105_v38 }
 0x396   :  { %2497 = vmatpush.msra.mxu2 %v2169_v23  ;;  %2481 = vmatpush.msrb.mxu1 %v2129_v26  ;;  %v2595_v23 = vld [vmem:[%s4009_s18 + $0x68] sm:$0xff]  ;;  %v2594_v26 = vld [vmem:[%s4009_s18 + $0x60] sm:$0xff] }
 0x397   :  { %2443 = vmatpush.msrb.mxu3 %v2061_v50  ;;  %2458 = vmatpush.msra.mxu0 %v2103_v10  ;;  %v2593_v10 = vld [vmem:[%s4009_s18 + $0x58] sm:$0xff] }
 0x398   :  { %2498 = vmatpush.msra.mxu2 %v2167_v25  ;;  %2482 = vmatpush.msrb.mxu1 %v2127_v16  ;;  %v2592_v16 = vld [vmem:[%s4009_s18 + $0x50] sm:$0xff] }
 0x399   :  { %2444 = vmatpush.msrb.mxu3 %v2059_v30  ;;  %2459 = vmatpush.msra.mxu0 %v2101_v14  ;;  %v2591_v14 = vld [vmem:[%s4009_s18 + $0x48] sm:$0xff] }
 0x39a   :  { %2499 = vmatpush.msra.mxu2 %v2165_v39  ;;  %2483 = vmatpush.msrb.mxu1 %v2125_v27 }
 0x39b   :  { %2445 = vmatpush.msrb.mxu3 %v2057_v43  ;;  %2460 = vmatpush.msra.mxu0 %v2099_v31 }
 0x39c   :  { %2500 = vmatpush.msra.mxu2 %v2163_v0  ;;  %2484 = vmatpush.msrb.mxu1 %v2123_v42 }
 0x39d   :  { %2446 = vmatpush.msrb.mxu3 %v2055_v17  ;;  %2461 = vmatpush.msra.mxu0 %v2097_v1  ;;  %v1893_v11 = vpop.f32.mrf.mxu0  ;;  %v2590_v17 = vld [vmem:[%s4009_s18 + $0x40] sm:$0xff] }
 0x39e   :  { %2501 = vmatpush.msra.mxu2 %v2161_v35  ;;  %2485 = vmatpush.msrb.mxu1 %v2121_v45  ;;  %v2589_v35 = vld [vmem:[%s4009_s18 + $0x38] sm:$0xff] }
 0x39f   :  { %2447 = vmatpush.msrb.mxu3 %v2053_v41  ;;  %2462 = vmatpush.msra.mxu0 %v2095_v51  ;;  %v3911_v41 = vld [vmem:[#allocation26] sm:$0x3] }
 0x3a0   :  { %2448 = vmatmul.f32.vlgmr.msrb.gmra.mxu3 %v1735_v61  ;;  %2502 = vmatpush.msra.mxu2 %v2159_v52  ;;  %v2089_v61 = vld [vmem:[#allocation25 + $0x728] sm:$0xff]  ;;  %v2536_v51 = vperm.slane %v3911_v41, 0 }
 0x3a1   :  { %2512 = vmatpush.msra.mxu3 %v2211_v49  ;;  %2486 = vmatpush.msrb.mxu1 %v2119_v53  ;;  %v2588_v52 = vld [vmem:[%s4009_s18 + $0x30] sm:$0xff]  ;;  %v2587_v53 = vld [vmem:[%s4009_s18 + $0x28] sm:$0xff] }
 0x3a2   :  { %2463 = vmatpush.msra.mxu0 %v2093_v32  ;;  %2503 = vmatpush.msra.mxu2 %v2157_v58  ;;  %v2586_v32 = vld [vmem:[%s4009_s18 + $0x20] sm:$0xff] }
 0x3a3   :  { %2513 = vmatpush.msra.mxu3 %v2209_v54  ;;  %2487 = vmatpush.msrb.mxu1 %v2117_v59  ;;  %v1873_v55 = vpop.f32.mrf.mxu3  ;;  %v2585_v59 = vld [vmem:[%s4009_s18 + $0x18] sm:$0xff] }
 0x3a4   :  { %2464 = vmatpush.msra.mxu0 %v2091_v56  ;;  %v1934_v2 = vadd.f32 %v1933_v8, %v1873_v55  ;;  %2504 = vmatpush.msra.mxu2 %v2155_v63  ;;  %v2584_v56 = vld [vmem:[%s4009_s18 + $0x10] sm:$0xff]  ;;  %v2583_v8 = vld [vmem:[%s4009_s18 + $0x8] sm:$0xff]  ;;  %v2582_v55 = vld [vmem:[%s4009_s18] sm:$0xff] }
 0x3a5   :  { %2514 = vmatpush.msra.mxu3 %v2207_v24  ;;  %2488 = vmatmul.f32.vlgmr.msrb.gmra.mxu1 %v1737_v46  ;;  %v2195_v46 = vld [vmem:[#allocation25 + $0xa78] sm:$0xff] }
 0x3a6   :  { %2465 = vmatpush.msra.mxu0 %v2089_v61  ;;  %2505 = vmatpush.msra.mxu2 %v2153_v37 }
 0x3a7   :  { %2515 = vmatpush.msra.mxu3 %v2205_v9 }
 0x3a8   :  { %2466 = vmatpush.msra.mxu0 %v2087_v21  ;;  %2506 = vmatpush.msra.mxu2 %v2151_v5 }
 0x3a9   :  { %2516 = vmatpush.msra.mxu3 %v2203_v3 }
 0x3aa   :  { %2467 = vmatpush.msra.mxu0 %v2085_v6  ;;  %2507 = vmatpush.msra.mxu2 %v2149_v4 }
 0x3ab   :  { %2517 = vmatpush.msra.mxu3 %v2201_v22  ;;  %2468 = vmatmul.f32.vlgmr.msra.gmra.mxu0 %v1736_v62 }
 0x3ac   :  { %2508 = vmatmul.f32.vlgmr.msra.gmra.mxu2 %v1738_v33  ;;  %v1853_v33 = vpop.f32.mrf.mxu1  ;;  %2618 = vmatpush.msrb.mxu0 %v2597_v19 }
 0x3ad   :  { %2518 = vmatpush.msra.mxu3 %v2199_v47  ;;  %v1894_v27 = vadd.f32 %v1893_v11, %v1853_v33  ;;  %v2609_v11 = vld [vmem:[%s4009_s18 + $0xd8] sm:$0xff] }
 0x3ae   :  { %2619 = vmatpush.msrb.mxu0 %v2596_v20 }
 0x3af   :  { %2519 = vmatpush.msra.mxu3 %v2197_v40 }
 0x3b0   :  { %2620 = vmatpush.msrb.mxu0 %v2595_v23 }
 0x3b1   :  { %2520 = vmatpush.msra.mxu3 %v2195_v46  ;;  %v2613_v46 = vld [vmem:[%s4009_s18 + $0xf8] sm:$0xff] }
 0x3b2   :  { %2621 = vmatpush.msrb.mxu0 %v2594_v26  ;;  %2638 = vmatpush.msra.mxu1 %v2613_v46  ;;  %v2605_v26 = vld [vmem:[%s4009_s18 + $0xb8] sm:$0xff] }
 0x3b3   :  { %2521 = vmatpush.msra.mxu3 %v2193_v7 }
 0x3b4   :  { %v1913_v13 = vpop.f32.mrf.mxu1  ;;  %2622 = vmatpush.msrb.mxu0 %v2593_v10 }
 0x3b5   :  { %2522 = vmatpush.msra.mxu3 %v2191_v48  ;;  %v1914_v45 = vadd.f32 %v1913_v13, %v1894_v27  ;;  %v2537_v27 = vperm.slane %v3911_v41, 1  ;;  %v2598_v41 = vld [vmem:[%s4009_s18 + $0x80] sm:$0xff] }
 0x3b6   :  { %2623 = vmatpush.msrb.mxu0 %v2592_v16 }
 0x3b7   :  { %2523 = vmatpush.msra.mxu3 %v2189_v57  ;;  %v2612_v57 = vld [vmem:[%s4009_s18 + $0xf0] sm:$0xff] }
 0x3b8   :  { %2624 = vmatpush.msrb.mxu0 %v2591_v14  ;;  %2639 = vmatpush.msra.mxu1 %v2612_v57  ;;  %v2603_v14 = vld [vmem:[%s4009_s18 + $0xa8] sm:$0xff] }
 0x3b9   :  { %2524 = vmatpush.msra.mxu3 %v2187_v60  ;;  %v2611_v60 = vld [vmem:[%s4009_s18 + $0xe8] sm:$0xff] }
 0x3ba   :  { %2625 = vmatpush.msrb.mxu0 %v2590_v17  ;;  %2640 = vmatpush.msra.mxu1 %v2611_v60 }
 0x3bb   :  { %2525 = vmatpush.msra.mxu3 %v2185_v12 }
 0x3bc   :  { %2626 = vmatpush.msrb.mxu0 %v2589_v35  ;;  %v2599_v35 = vld [vmem:[%s4009_s18 + $0x88] sm:$0xff] }
 0x3bd   :  { %2526 = vmatpush.msra.mxu3 %v2183_v36 }
 0x3be   :  { %2627 = vmatpush.msrb.mxu0 %v2588_v52 }
 0x3bf   :  { %2527 = vmatpush.msra.mxu3 %v2181_v28  ;;  %v2610_v28 = vld [vmem:[%s4009_s18 + $0xe0] sm:$0xff] }
 0x3c0   :  { %2528 = vmatmul.f32.vlgmr.msra.gmra.mxu3 %v1739_v44  ;;  %2628 = vmatpush.msrb.mxu0 %v2587_v53 }
 0x3c1   :  { %2641 = vmatpush.msra.mxu1 %v2610_v28 }
 0x3c2   :  { %2629 = vmatpush.msrb.mxu0 %v2586_v32 }
 0x3c3   :  { %v1953_v62 = vpop.f32.mrf.mxu3  ;;  %2642 = vmatpush.msra.mxu1 %v2609_v11 }
 0x3c4   :  { %v3885_v29 = vadd.f32 %v1953_v62, %v1934_v2  ;;  %2630 = vmatpush.msrb.mxu0 %v2585_v59 }
 0x3c6   :  { %2631 = vmatpush.msrb.mxu0 %v2584_v56 }
 0x3c8   :  { %2632 = vmatpush.msrb.mxu0 %v2583_v8 }
 0x3ca   :  { %2633 = vmatpush.msrb.mxu0 %v2582_v55 }
 0x3dc   :  { %v2249_v50 = vpop.f32.mrf.mxu1 }
 0x3e2   :  { %v2229_v15 = vpop.f32.mrf.mxu0 }
 0x3e3   :  { %v2250_v18 = vadd.f32 %v2249_v50, %v2229_v15  ;;  %v2269_v34 = vpop.f32.mrf.mxu2  ;;  %v2608_v50 = vld [vmem:[%s4009_s18 + $0xd0] sm:$0xff] }
 0x3e4   :  { %2643 = vmatpush.msra.mxu1 %v2608_v50 }
 0x3e5   :  { %v2270_v38 = vadd.f32 %v2269_v34, %v2250_v18  ;;  %v2607_v34 = vld [vmem:[%s4009_s18 + $0xc8] sm:$0xff] }
 0x3e6   :  { %v2329_v39 = vpop.f32.mrf.mxu1  ;;  %2644 = vmatpush.msra.mxu1 %v2607_v34 }
 0x3ec   :  { %v2309_v25 = vpop.f32.mrf.mxu0 }
 0x3f1   :  { %v2289_v44 = vpop.f32.mrf.mxu3 }
 0x3f2   :  { %v2290_v30 = vadd.f32 %v2289_v44, %v2270_v38  ;;  %v2606_v38 = vld [vmem:[%s4009_s18 + $0xc0] sm:$0xff] }
 0x3f3   :  { %2645 = vmatpush.msra.mxu1 %v2606_v38 }
 0x3f4   :  { %v2310_v43 = vadd.f32 %v2309_v25, %v2290_v30  ;;  %v2604_v25 = vld [vmem:[%s4009_s18 + $0xb0] sm:$0xff] }
 0x3f5   :  { %2646 = vmatpush.msra.mxu1 %v2605_v26 }
 0x3f6   :  { %v2330_v31 = vadd.f32 %v2329_v39, %v2310_v43  ;;  %v2602_v39 = vld [vmem:[%s4009_s18 + $0xa0] sm:$0xff] }
 0x3f7   :  { %2647 = vmatpush.msra.mxu1 %v2604_v25 }
 0x3f9   :  { %2648 = vmatpush.msra.mxu1 %v2603_v14 }
 0x3fb   :  { %2649 = vmatpush.msra.mxu1 %v2602_v39 }
 0x3fe   :  { %v2409_v12 = vpop.f32.mrf.mxu1 }
 0x405   :  { %v2369_v1 = vpop.f32.mrf.mxu3  ;;  %v2389_v7 = vpop.f32.mrf.mxu0 }
 0x406   :  { %v2410_v62 = vadd.f32 %v2409_v12, %v2389_v7 }
 0x40c   :  { %v2349_v0 = vpop.f32.mrf.mxu2 }
 0x40d   :  { %v2350_v42 = vadd.f32 %v2349_v0, %v2330_v31  ;;  %v2601_v31 = vld [vmem:[%s4009_s18 + $0x98] sm:$0xff] }
 0x40e   :  { %2650 = vmatpush.msra.mxu1 %v2601_v31 }
 0x40f   :  { %v2370_v49 = vadd.f32 %v2369_v1, %v2350_v42  ;;  %v2600_v42 = vld [vmem:[%s4009_s18 + $0x90] sm:$0xff]  ;;  %s3279_s18 = smov [#allocation29]  }
 0x410   :  { %2651 = vmatpush.msra.mxu1 %v2600_v42  ;;  %s2665_s11 = sshll.u32 %s3279_s18, 4  ;;  %s2666_s11 = int_to_ptr.vmem [resolvable:$true] %s2665_s11 }
 0x411   :  { %v2532_v54 = vadd.f32 %v2370_v49, %v1914_v45 }
 0x412   :  { %2652 = vmatpush.msra.mxu1 %v2599_v35 }
 0x413   :  { %v2540_v58 = vadd.f32 %v2536_v51, %v2532_v54 }
 0x414   :  { %2653 = vmatpush.msra.mxu1 %v2598_v41 }
 0x415   :  { %v2548_v24 = vand.u32 2147483647, %v2540_v58  ;;  %v2542_v4 = vmax.f32 %v2540_v58, 0.0  ;;  %vm2544_vm10 = vcmp.ne.f32.partialorder %v2540_v58, %v2540_v58  ;;  %v2429_v36 = vpop.f32.mrf.mxu2 }
 0x416   :  { %v2430_v15 = vadd.f32 %v2429_v36, %v2410_v62 }
 0x417   :  { %v2550_v63 = vsub.f32 0.0, %v2548_v24 }
 0x419   :  { %v2552_v9 = vmul.f32 1.442695, %v2550_v63 }
 0x41b   :  { %2783 = vpow2.f32 %v2552_v9 }
 0x421   :  { %v2784_v61 = vpop.eup %2783 }
 0x422   :  { %v2556_v2 = vadd.f32 1.0, %v2784_v61  ;;  %v2559_v37 = vmul.f32 -0.5, %v2784_v61  ;;  %v2562_v21 = vand.u32 2147483647, %v2784_v61  ;;  %v2489_v23 = vpop.f32.mrf.mxu1 }
 0x423   :  { %v2449_v33 = vpop.f32.mrf.mxu3 }
 0x424   :  { %2785 = vlog2.f32 %v2556_v2  ;;  %v2560_v3 = vadd.f32 1.0, %v2559_v37  ;;  %vm2563_vm9 = vcmp.lt.f32.partialorder %v2562_v21, 0.0004427343  ;;  %v2450_v18 = vadd.f32 %v2449_v33, %v2430_v15  ;;  %v2782_v2 = vld [vmem:[#allocation28] ss:$0 sm:$0xff] }
 0x426   :  { %v2561_v6 = vmul.f32 %v2784_v61, %v2560_v3 }
 0x428   :  { %v2469_v19 = vpop.f32.mrf.mxu0 }
 0x429   :  { %v2470_v44 = vadd.f32 %v2469_v19, %v2450_v18 }
 0x42a   :  { %v2786_v5 = vpop.eup %2785 }
 0x42b   :  { %v2558_v22 = vmul.f32 0.6931472, %v2786_v5  ;;  %v2490_v10 = vadd.f32 %v2489_v23, %v2470_v44 }
 0x42d   :  { %v2564_v47 = vsel %vm2563_vm9, %v2561_v6, %v2558_v22 }
 0x42e   :  { %v2574_v40 = vadd.f32 %v2564_v47, %v2542_v4 }
 0x42f   :  { %v2509_v30 = vpop.f32.mrf.mxu2 }
 0x430   :  { %v2576_v48 = vsel %vm2544_vm10, %v2540_v58, %v2574_v40  ;;  %v2510_v43 = vadd.f32 %v2509_v30, %v2490_v10 }
 0x431   :  { %2787 = vtanh.f32 %v2576_v48 }
 0x437   :  { %v2788_v13 = vpop.eup %2787 }
 0x438   :  { %v2580_v20 = vmul.f32 %v2788_v13, %v2540_v58 }
 0x43a   :  { %2634 = vmatmul.f32.vlgmr.msrb.gmra.mxu0 %v2580_v20 }
 0x443   :  { %v2529_v16 = vpop.f32.mrf.mxu3 }
 0x444   :  { %v2530_v17 = vadd.f32 %v2529_v16, %v2510_v43 }
 0x446   :  { %v2533_v0 = vadd.f32 %v2530_v17, %v3885_v29 }
 0x448   :  { %v2541_v1 = vadd.f32 %v2537_v27, %v2533_v0 }
 0x44a   :  { %v2549_v45 = vand.u32 2147483647, %v2541_v1  ;;  %v2543_v56 = vmax.f32 %v2541_v1, 0.0  ;;  %vm2545_vm12 = vcmp.ne.f32.partialorder %v2541_v1, %v2541_v1 }
 0x44c   :  { %v2551_v49 = vsub.f32 0.0, %v2549_v45 }
 0x44e   :  { %v2554_v29 = vmul.f32 1.442695, %v2551_v49 }
 0x450   :  { %2789 = vpow2.f32 %v2554_v29 }
 0x456   :  { %v2790_v51 = vpop.eup %2789 }
 0x457   :  { %v2565_v52 = vadd.f32 1.0, %v2790_v51  ;;  %v2568_v53 = vmul.f32 -0.5, %v2790_v51  ;;  %v2571_v32 = vand.u32 2147483647, %v2790_v51 }
 0x459   :  { %2791 = vlog2.f32 %v2565_v52  ;;  %v2569_v54 = vadd.f32 1.0, %v2568_v53  ;;  %vm2572_vm11 = vcmp.lt.f32.partialorder %v2571_v32, 0.0004427343 }
 0x45b   :  { %v2570_v24 = vmul.f32 %v2790_v51, %v2569_v54 }
 0x45f   :  { %v2792_v58 = vpop.eup %2791 }
 0x460   :  { %v2567_v59 = vmul.f32 0.6931472, %v2792_v58 }
 0x462   :  { %v2573_v63 = vsel %vm2572_vm11, %v2570_v24, %v2567_v59 }
 0x463   :  { %v2575_v8 = vadd.f32 %v2573_v63, %v2543_v56 }
 0x465   :  { %v2577_v9 = vsel %vm2545_vm12, %v2541_v1, %v2575_v8 }
 0x466   :  { %2793 = vtanh.f32 %v2577_v9 }
 0x46c   :  { %v2794_v55 = vpop.eup %2793 }
 0x46d   :  { %v2581_v61 = vmul.f32 %v2794_v55, %v2541_v1 }
 0x46f   :  { %2654 = vmatmul.f32.vlgmr.msra.gmra.mxu1 %v2581_v61 }
 0x4b7   :  { %v2635_v37 = vpop.f32.mrf.mxu0 }
 0x4b8   :  { %v2636_v3 = vadd.f32 %v2782_v2, %v2635_v37 }
 0x4ec   :  { %v2655_v21 = vpop.f32.mrf.mxu1 }
 0x4ed   :  { %v2656_v5 = vadd.f32 %v2655_v21, %v2636_v3 }
 0x4ef   :  { %2659 = vst.msk [vmem:[#allocation29] sm:$0x3] %vm2658_vm13, %v2656_v5 }
 0x4f0   :  { %2670 = dma.vmem_to_hbm [thread:$0]  %s2666_s11, 32, %s2668_s3, [#allocation4]  }
 0x4f1   :  { %3245 = dma.done.wait [#allocation4], 32  }
 0x4f2   :  { %3246 = vsyncadd [#allocation4], 4294967264 }
 0x4f3   :  { %2675 = vsyncpa [#allocation3], 1 }
 0x4f4   :  { %2676 = vsyncpa [#allocation6], 1 }
 0x4f5   :  { %2677 = vsyncpa [#allocation9], 1 }
 0x4f6   :  { %2678 = vsyncpa [#allocation12], 1 }
 0x4f7   :  { %2679 = vsyncpa [#allocation15], 1 }
 0x4f8   :  { %2680 = vsyncpa [#allocation18], 1 }
 0x4f9   :  { %2681 = vsyncpa [#allocation21], 1 }
 0x4fa   :  { %2682 = vsyncpa [#allocation24], 1 }
 0x4fb   :  { %2683 = vsyncpa [#allocation27], 1 }
 0x4fc   :  { %2684 = vsyncpa [#allocation4], 1 }

</bundles_post_ra>
